<compile_context>
chip_gen: v5e
topology: v5e:2x2
jax: 0.10.0
libtpu: 0.0.40
codegen_flags: <defaults>
</compile_context>

<pallas_src>
import jax
import jax.numpy as jnp
import numpy as np
from jax.experimental import pallas as pl
from jax.experimental.pallas import tpu as pltpu

_VMEM = pl.BlockSpec(memory_space=pltpu.MemorySpace.VMEM)
_ANY = pl.BlockSpec(memory_space=pl.ANY)
_HIGH = jax.lax.Precision.HIGHEST       # used only by the pure-JAX reference


# ----------------------------------------------------------------------------
# In-kernel helpers
# ----------------------------------------------------------------------------
def _im2col(h, *, K, pad_l, pad_r):
    # h: (B, L, Cin) f32 -> (B*L, K*Cin) f32  ("same" padding built in).
    # TODO(synk): if the k=1..K-1 sublane-offset slices show up as XLU/vst hot
    #             spots on v6e/v7x bundle dumps, write cols straight into a
    #             lane-aligned VMEM scratch instead of concat-of-views.
    B, L, Cin = h.shape
    hp = jnp.concatenate([jnp.zeros((B, pad_l, Cin), jnp.float32), h,
                          jnp.zeros((B, pad_r, Cin), jnp.float32)], axis=1)
    cols = jnp.concatenate([hp[:, k:k + L, :] for k in range(K)], axis=-1)
    return cols.reshape(B * L, K * Cin)


def _matmul_bn_relu(cols, w_bf16, b, g, beta):
    # cols: (B*L, K*Cin) f32, w_bf16: (K*Cin, Cout) bf16, b/g/beta: (1, Cout) f32
    # One im2col matmul (explicit bf16 operands, f32 accumulation) followed by
    # BatchNorm1d training-mode stats (single pass, clamped var) and ReLU.
    acc = jnp.dot(cols.astype(jnp.bfloat16), w_bf16,
                  preferred_element_type=jnp.float32) + b
    inv_n = 1.0 / float(cols.shape[0])
    mean = jnp.sum(acc, axis=0, keepdims=True) * inv_n
    var = jnp.sum(acc * acc, axis=0, keepdims=True) * inv_n - mean * mean
    var = jnp.maximum(var, 0.0)          # guard rsqrt against cancellation
    y = (acc - mean) * jax.lax.rsqrt(var + 1e-5) * g + beta
    return jnp.maximum(y, 0.0)


# ----------------------------------------------------------------------------
# Fused kernel: FCN stack + temporal mean + LSTM recurrence + final Linear.
# ----------------------------------------------------------------------------
def _lstmfcn_kernel(cols1_ref, xlb_ref, w1_ref, w2_hbm, w3_hbm,
                    vec_ref, whhp_ref, wfp_ref,
                    out_ref,
                    gseq_ref, w2_buf, w3_buf, dma_sem):
    # cols1: (B*L, 8) precomputed conv1 im2col; xlb: (L, B) LSTM input.
    # w1: (8, C1) bf16 VMEM; w2_hbm/w3_hbm: bf16 im2col conv weights in HBM.
    # vec: (12, W) f32 slab [b1,g1,be1,b2,g2,be2,b3,g3,be3,bg,wih,bf].
    # whhp: (4H, 4H) bf16, rows >= H zero (load-bearing, see wrapper assert).
    # wfp: (C3+4H, C) bf16 fused head weight, rows C3+H.. zero. out: (B, C).
    L, B, H4 = gseq_ref.shape
    H = H4 // 4
    C1 = w1_ref.shape[1]
    C2 = w2_buf.shape[1]
    C3 = w3_buf.shape[1]
    C = out_ref.shape[1]

    # Kick off the big conv-weight DMAs immediately so they overlap conv1 and
    # the LSTM input-gate precompute.
    cp2 = pltpu.make_async_copy(w2_hbm, w2_buf, dma_sem.at[0])
    cp3 = pltpu.make_async_copy(w3_hbm, w3_buf, dma_sem.at[1])
    cp2.start()
    cp3.start()

    vec = vec_ref[...]
    b1, g1, be1 = vec[0:1, :C1], vec[1:2, :C1], vec[2:3, :C1]
    b2, g2, be2 = vec[3:4, :C2], vec[4:5, :C2], vec[5:6, :C2]
    b3, g3, be3 = vec[6:7, :C3], vec[7:8, :C3], vec[8:9, :C3]
    bg = vec[9:10, :H4]
    wih = vec[10:11, :H4]
    bf = vec[11:12, :C]

    # ----------------- ConvBlock 1 (weights already in VMEM, tiny) -----------
    y1 = _matmul_bn_relu(cols1_ref[...], w1_ref[...], b1, g1, be1)   # (B*L, C1)

    # LSTM per-step input-gate contributions, gates_in[t] = x_t*w_ih + (b_ih+b_hh).
    # Independent of the FCN path -> placed here to hide the w2/w3 DMA.
    gseq_ref[...] = (xlb_ref[...][:, :, None] * wih[None, :, :]
                     + bg[None, :, :])                               # (L, B, 4H)

    # ----------------- ConvBlocks 2 & 3 (manually DMAed bf16 weights) --------
    cp2.wait()
    y2 = _matmul_bn_relu(_im2col(y1.reshape(B, L, C1), K=5, pad_l=2, pad_r=2),
                         w2_buf[...], b2, g2, be2)                   # (B*L, C2)
    cp3.wait()
    y3 = _matmul_bn_relu(_im2col(y2.reshape(B, L, C2), K=3, pad_l=1, pad_r=1),
                         w3_buf[...], b3, g3, be3)                   # (B*L, C3)
    fcn_mean = jnp.mean(y3.reshape(B, L, C3), axis=1)                # (B, C3)

    # ----------------- LSTM recurrence ---------------------------------------
    # Single-tanh activation: sigmoid(x) = 0.5*(tanh(0.5*x) + 1); g-gate lanes
    # get a plain tanh. `pre` doubles as the post-scale (0.5 on i/f/o, 1 on g).
    lane = jax.lax.broadcasted_iota(jnp.int32, (B, H4), 1)
    is_g = jnp.logical_and(lane >= 2 * H, lane < 3 * H)
    pre = jnp.where(is_g, 1.0, 0.5).astype(jnp.float32)
    post = jnp.where(is_g, 0.0, 0.5).astype(jnp.float32)
    whh = whhp_ref[...]                                              # bf16, hoisted

    def step(t, carry):
        # h4/c4 are full-width (B, 4H); only lanes [0, H) are meaningful.
        # whh rows >= H are zero so garbage lanes never contribute to gates.
        h4, c4 = carry
        gates = gseq_ref[t] + jnp.dot(h4.astype(jnp.bfloat16), whh,
                                      preferred_element_type=jnp.float32)
        act = pre * jnp.tanh(gates * pre) + post        # i/f/o sigmoid, g tanh
        f_g = pltpu.roll(act, 3 * H, 1)     # f gate aligned onto lanes [0, H)
        g_g = pltpu.roll(act, 2 * H, 1)     # g gate aligned onto lanes [0, H)
        o_g = pltpu.roll(act, H, 1)         # o gate aligned onto lanes [0, H)
        c4n = f_g * c4 + act * g_g          # i gate already sits in lanes [0, H)
        h4n = o_g * jnp.tanh(c4n)
        return (h4n, c4n)

    zero = jnp.zeros((B, H4), jnp.float32)
    h4_last, _ = jax.lax.fori_loop(0, L, step, (zero, zero), unroll=L)

    # ----------------- final Linear on concat([fcn_mean, h_n]) ---------------
    feats = jnp.concatenate([fcn_mean, h4_last], axis=-1).astype(jnp.bfloat16)
    out_ref[...] = (jnp.dot(feats, wfp_ref[...],
                            preferred_element_type=jnp.float32) + bf)


# ----------------------------------------------------------------------------
# Full forward (thin glue: layout transposes, conv1 im2col, weight packing)
# ----------------------------------------------------------------------------
@jax.jit
def lstmfcn_forward(x_ncl, params):
    # x_ncl: (B, Cin=1, L) — PyTorch NCL layout (LSTM input_size=1 requires Cin=1).
    B, _, L = x_ncl.shape
    xf = x_ncl.astype(jnp.float32)
    x1 = xf[:, 0, :]                                    # (B, L)
    x_lb = jnp.transpose(x1, (1, 0))                    # (L, B) for the LSTM
    # conv1 im2col precomputed here (Cin=1 layout is terrible in-kernel).
    xp = jnp.pad(x1, ((0, 0), (3, 4)))                  # "same" pad for K=8
    cols1 = jnp.stack([xp[:, k:k + L] for k in range(8)],
                      axis=-1).reshape(B * L, 8)        # (B*L, 8)

    H = params["whh_t"].shape[0]
    C = params["bf"].shape[-1]
    H4 = 4 * H
    C3 = params["wf1_t"].shape[0]                       # 128

    b16 = lambda v: v.astype(jnp.bfloat16)
    w2col = lambda w: w.reshape(-1, w.shape[-1])        # (K,Cin,Cout)->(K*Cin,Cout)

    w1c = b16(w2col(params["w1"]))                      # (8, 128)
    w2c = b16(w2col(params["w2"]))                      # (640, 256)  -> HBM, DMA
    w3c = b16(w2col(params["w3"]))                      # (768, 128)  -> HBM, DMA

    # Zero-pad recurrent / head weights to 4H rows so the kernel can keep the
    # LSTM state in a full-width (B, 4H) vreg. LOAD-BEARING: lanes >= H of
    # h4/c4 carry bounded garbage that must hit zero weight rows.
    whh_p = b16(jnp.concatenate(
        [params["whh_t"], jnp.zeros((3 * H, H4), jnp.float32)], axis=0))
    wf_p = b16(jnp.concatenate(
        [params["wf1_t"], params["wf2_t"], jnp.zeros((3 * H, C), jnp.float32)],
        axis=0))                                        # (C3 + 4H, C)
    assert whh_p.shape == (H4, H4) and wf_p.shape == (C3 + H4, C)

    # Pack all tiny per-channel vectors into one slab -> one DMA instead of 12.
    W = max(256, H4, C)
    def row(v):
        v = v.reshape(-1).astype(jnp.float32)
        return jnp.pad(v, (0, W - v.shape[0]))[None, :]
    vec = jnp.concatenate(
        [row(params[k]) for k in ("b1", "g1", "be1", "b2", "g2", "be2",
                                  "b3", "g3", "be3", "bg", "wih_t", "bf")],
        axis=0)                                         # (12, W)

    return pl.pallas_call(
        _lstmfcn_kernel,
        out_shape=jax.ShapeDtypeStruct((B, C), jnp.float32),
        in_specs=[_VMEM, _VMEM, _VMEM, _ANY, _ANY, _VMEM, _VMEM, _VMEM],
        out_specs=_VMEM,
        scratch_shapes=[pltpu.VMEM((L, B, H4), jnp.float32),       # gseq
                        pltpu.VMEM(w2c.shape, jnp.bfloat16),       # w2 buffer
                        pltpu.VMEM(w3c.shape, jnp.bfloat16),       # w3 buffer
                        pltpu.SemaphoreType.DMA((2,))],
    )(cols1, x_lb, w1c, w2c, w3c, vec, whh_p, wf_p)


# ----------------------------------------------------------------------------
# Deterministic parameter init (shapes from LSTMFCN.__init__)
# ----------------------------------------------------------------------------
def init_params(key, hidden_size=32, num_classes=3):
    H = hidden_size
    ks = jax.random.split(key, 20)
    n = lambda k, s, sc=0.1: (sc * jax.random.normal(k, s)).astype(jnp.float32)
    return dict(
        # ConvBlock(1 -> 128, k=8) — conv weight stored (K, Cin, Cout)
        w1=n(ks[0], (8, 1, 128)), b1=n(ks[1], (128,)),
        g1=(1.0 + n(ks[2], (128,))), be1=n(ks[3], (128,)),
        # ConvBlock(128 -> 256, k=5)
        w2=n(ks[4], (5, 128, 256)), b2=n(ks[5], (256,)),
        g2=(1.0 + n(ks[6], (256,))), be2=n(ks[7], (256,)),
        # ConvBlock(256 -> 128, k=3)
        w3=n(ks[8], (3, 256, 128)), b3=n(ks[9], (128,)),
        g3=(1.0 + n(ks[10], (128,))), be3=n(ks[11], (128,)),
        # LSTM(input_size=1, hidden=H): weights stored transposed for NLC math.
        wih_t=n(ks[12], (1, 4 * H)),        # = weight_ih_l0.T
        whh_t=n(ks[13], (H, 4 * H)),        # = weight_hh_l0.T
        bg=n(ks[14], (1, 4 * H)),           # = b_ih + b_hh
        # Linear(128 + H -> num_classes), split instead of concat
        wf1_t=n(ks[15], (128, num_classes)),
        wf2_t=n(ks[16], (H, num_classes)),
        bf=n(ks[17], (1, num_classes)),
    )


# ----------------------------------------------------------------------------
# Pure-JAX reference (full f32 HIGHEST precision) for the correctness check
# ----------------------------------------------------------------------------
def _ref_forward(x_ncl, p):
    x = jnp.transpose(x_ncl, (0, 2, 1)).astype(jnp.float32)

    def conv_block_ref(h, w, b, g, be, pad_lr):
        B, L, _ = h.shape
        K, _, Cout = w.shape
        hp = jnp.pad(h, ((0, 0), pad_lr, (0, 0)))
        acc = jnp.zeros((B, L, Cout), jnp.float32)
        for k in range(K):
            acc = acc + jnp.einsum("blc,co->blo", hp[:, k:k + L, :], w[k],
                                   precision=_HIGH)
        acc = acc + b
        mean = jnp.mean(acc, axis=(0, 1), keepdims=True)
        var = jnp.mean((acc - mean) ** 2, axis=(0, 1), keepdims=True)
        y = (acc - mean) / jnp.sqrt(var + 1e-5) * g + be
        return jnp.maximum(y, 0.0)

    y = conv_block_ref(x, p["w1"], p["b1"], p["g1"], p["be1"], (3, 4))
    y = conv_block_ref(y, p["w2"], p["b2"], p["g2"], p["be2"], (2, 2))
    y = conv_block_ref(y, p["w3"], p["b3"], p["g3"], p["be3"], (1, 1))
    fcn_mean = jnp.mean(y, axis=1)

    H = p["whh_t"].shape[0]
    B = x.shape[0]
    x_seq = jnp.transpose(x, (1, 0, 2))                    # (L, B, 1)

    def step(carry, x_t):
        h, c = carry
        gates = (jnp.dot(x_t, p["wih_t"], precision=_HIGH)
                 + jnp.dot(h, p["whh_t"], precision=_HIGH) + p["bg"])
        i = jax.nn.sigmoid(gates[:, :H])
        f = jax.nn.sigmoid(gates[:, H:2 * H])
        g = jnp.tanh(gates[:, 2 * H:3 * H])
        o = jax.nn.sigmoid(gates[:, 3 * H:])
        c = f * c + i * g
        h = o * jnp.tanh(c)
        return (h, c), None

    init = (jnp.zeros((B, H), jnp.float32), jnp.zeros((B, H), jnp.float32))
    (h_last, _), _ = jax.lax.scan(step, init, x_seq)
    return (jnp.dot(fcn_mean, p["wf1_t"], precision=_HIGH)
            + jnp.dot(h_last, p["wf2_t"], precision=_HIGH) + p["bf"])


if __name__ == "__main__":
    key = jax.random.PRNGKey(0)
    pkey, xkey = jax.random.split(key)

    B, Cin, L = 2, 1, 16            # in_channels must be 1 (LSTM input_size=1)
    hidden_size, num_classes = 32, 3

    params = init_params(pkey, hidden_size=hidden_size, num_classes=num_classes)
    x = jax.random.normal(xkey, (B, Cin, L), jnp.float32)

    out = lstmfcn_forward(x, params)
    out = jax.block_until_ready(out)
    assert out.shape == (B, num_classes)

    # Kernel matmuls are explicit single-pass bf16 with f32 accumulation, so
    # compare against the f32-HIGHEST reference with a bf16-appropriate tolerance.
    ref = _ref_forward(x, params)
    np.testing.assert_allclose(np.asarray(out), np.asarray(ref),
                               rtol=5e-2, atol=5e-2)
    print("KERNEL_OK")
</pallas_src>

<mosaic_0001>
module attributes {stable_mosaic.version = 11 : i64} {
  func.func @_lstmfcn_kernel(%arg0: memref<32x8xf32, #tpu.memory_space<vmem>>, %arg1: memref<16x2xf32, #tpu.memory_space<vmem>>, %arg2: memref<8x128xbf16, #tpu.memory_space<vmem>>, %arg3: memref<640x256xbf16, #tpu.memory_space<any>>, %arg4: memref<768x128xbf16, #tpu.memory_space<any>>, %arg5: memref<12x256xf32, #tpu.memory_space<vmem>>, %arg6: memref<128x128xbf16, #tpu.memory_space<vmem>>, %arg7: memref<256x3xbf16, #tpu.memory_space<vmem>>, %arg8: memref<2x3xf32, #tpu.memory_space<vmem>>, %arg9: memref<16x2x128xf32, #tpu.memory_space<vmem>>, %arg10: memref<640x256xbf16, #tpu.memory_space<vmem>>, %arg11: memref<768x128xbf16, #tpu.memory_space<vmem>>, %arg12: memref<2x!tpu.dma_semaphore, #tpu.memory_space<semaphore_mem>>) attributes {dimension_semantics = [], scalar_prefetch = 0 : i64, scratch_operands = 4 : i64, tpu.core_type = #tpu.core_type<tc>} {
    %c0_i32 = arith.constant 0 : i32
    %0 = tpu.memref_slice %arg12[%c0_i32] : memref<2x!tpu.dma_semaphore, #tpu.memory_space<semaphore_mem>> -> memref<1x!tpu.dma_semaphore, #tpu.memory_space<semaphore_mem>>
    %1 = tpu.memref_squeeze %0 : memref<1x!tpu.dma_semaphore, #tpu.memory_space<semaphore_mem>> -> memref<!tpu.dma_semaphore, #tpu.memory_space<semaphore_mem>>
    tpu.enqueue_dma source(%arg3 : memref<640x256xbf16, #tpu.memory_space<any>>) target(%arg10 : memref<640x256xbf16, #tpu.memory_space<vmem>>) target_semaphore(%1 : memref<!tpu.dma_semaphore, #tpu.memory_space<semaphore_mem>>)
    %c1_i32 = arith.constant 1 : i32
    %2 = tpu.memref_slice %arg12[%c1_i32] : memref<2x!tpu.dma_semaphore, #tpu.memory_space<semaphore_mem>> -> memref<1x!tpu.dma_semaphore, #tpu.memory_space<semaphore_mem>>
    %3 = tpu.memref_squeeze %2 : memref<1x!tpu.dma_semaphore, #tpu.memory_space<semaphore_mem>> -> memref<!tpu.dma_semaphore, #tpu.memory_space<semaphore_mem>>
    tpu.enqueue_dma source(%arg4 : memref<768x128xbf16, #tpu.memory_space<any>>) target(%arg11 : memref<768x128xbf16, #tpu.memory_space<vmem>>) target_semaphore(%3 : memref<!tpu.dma_semaphore, #tpu.memory_space<semaphore_mem>>)
    %c0 = arith.constant 0 : index
    %c0_0 = arith.constant 0 : index
    %4 = vector.load %arg5[%c0, %c0_0] : memref<12x256xf32, #tpu.memory_space<vmem>>, vector<12x256xf32>
    %5 = vector.extract_strided_slice %4 {offsets = [0, 0], sizes = [1, 128], strides = [1, 1]} : vector<12x256xf32> to vector<1x128xf32>
    %6 = vector.extract_strided_slice %4 {offsets = [1, 0], sizes = [1, 128], strides = [1, 1]} : vector<12x256xf32> to vector<1x128xf32>
    %7 = vector.extract_strided_slice %4 {offsets = [2, 0], sizes = [1, 128], strides = [1, 1]} : vector<12x256xf32> to vector<1x128xf32>
    %8 = vector.extract_strided_slice %4 {offsets = [3, 0], sizes = [1, 256], strides = [1, 1]} : vector<12x256xf32> to vector<1x256xf32>
    %9 = vector.extract_strided_slice %4 {offsets = [4, 0], sizes = [1, 256], strides = [1, 1]} : vector<12x256xf32> to vector<1x256xf32>
    %10 = vector.extract_strided_slice %4 {offsets = [5, 0], sizes = [1, 256], strides = [1, 1]} : vector<12x256xf32> to vector<1x256xf32>
    %11 = vector.extract_strided_slice %4 {offsets = [6, 0], sizes = [1, 128], strides = [1, 1]} : vector<12x256xf32> to vector<1x128xf32>
    %12 = vector.extract_strided_slice %4 {offsets = [7, 0], sizes = [1, 128], strides = [1, 1]} : vector<12x256xf32> to vector<1x128xf32>
    %13 = vector.extract_strided_slice %4 {offsets = [8, 0], sizes = [1, 128], strides = [1, 1]} : vector<12x256xf32> to vector<1x128xf32>
    %14 = vector.extract_strided_slice %4 {offsets = [9, 0], sizes = [1, 128], strides = [1, 1]} : vector<12x256xf32> to vector<1x128xf32>
    %15 = vector.extract_strided_slice %4 {offsets = [10, 0], sizes = [1, 128], strides = [1, 1]} : vector<12x256xf32> to vector<1x128xf32>
    %16 = vector.extract_strided_slice %4 {offsets = [11, 0], sizes = [1, 3], strides = [1, 1]} : vector<12x256xf32> to vector<1x3xf32>
    %c0_1 = arith.constant 0 : index
    %c0_2 = arith.constant 0 : index
    %17 = vector.load %arg0[%c0_1, %c0_2] : memref<32x8xf32, #tpu.memory_space<vmem>>, vector<32x8xf32>
    %c0_3 = arith.constant 0 : index
    %c0_4 = arith.constant 0 : index
    %18 = vector.load %arg2[%c0_3, %c0_4] : memref<8x128xbf16, #tpu.memory_space<vmem>>, vector<8x128xbf16>
    %19 = arith.truncf %17 : vector<32x8xf32> to vector<32x8xbf16>
    %cst = arith.constant dense<0.000000e+00> : vector<32x128xf32>
    %20 = tpu.matmul %19, %18, %cst {dimension_numbers = #tpu.dot_dimension_numbers<[1], [0], [0], [1], [0, 0, 1, 1], [], []>} : vector<32x8xbf16>, vector<8x128xbf16>, vector<32x128xf32> -> vector<32x128xf32>
    %21 = vector.broadcast %5 : vector<1x128xf32> to vector<32x128xf32>
    %22 = arith.addf %20, %21 : vector<32x128xf32>
    %cst_5 = arith.constant dense<0.000000e+00> : vector<128xf32>
    %23 = vector.multi_reduction <add>, %22, %cst_5 [0] : vector<32x128xf32> to vector<128xf32>
    %24 = vector.shape_cast %23 : vector<128xf32> to vector<1x128xf32>
    %cst_6 = arith.constant 3.125000e-02 : f32
    %25 = vector.broadcast %cst_6 : f32 to vector<1x128xf32>
    %26 = arith.mulf %24, %25 : vector<1x128xf32>
    %27 = arith.mulf %22, %22 : vector<32x128xf32>
    %cst_7 = arith.constant dense<0.000000e+00> : vector<128xf32>
    %28 = vector.multi_reduction <add>, %27, %cst_7 [0] : vector<32x128xf32> to vector<128xf32>
    %29 = vector.shape_cast %28 : vector<128xf32> to vector<1x128xf32>
    %cst_8 = arith.constant 3.125000e-02 : f32
    %30 = vector.broadcast %cst_8 : f32 to vector<1x128xf32>
    %31 = arith.mulf %29, %30 : vector<1x128xf32>
    %32 = arith.mulf %26, %26 : vector<1x128xf32>
    %33 = arith.subf %31, %32 : vector<1x128xf32>
    %cst_9 = arith.constant 0.000000e+00 : f32
    %34 = vector.broadcast %cst_9 : f32 to vector<1x128xf32>
    %35 = arith.maximumf %33, %34 : vector<1x128xf32>
    %36 = vector.broadcast %26 : vector<1x128xf32> to vector<32x128xf32>
    %37 = arith.subf %22, %36 : vector<32x128xf32>
    %cst_10 = arith.constant 9.99999974E-6 : f32
    %38 = vector.broadcast %cst_10 : f32 to vector<1x128xf32>
    %39 = arith.addf %35, %38 : vector<1x128xf32>
    %40 = math.rsqrt %39 : vector<1x128xf32>
    %41 = vector.broadcast %40 : vector<1x128xf32> to vector<32x128xf32>
    %42 = arith.mulf %37, %41 : vector<32x128xf32>
    %43 = vector.broadcast %6 : vector<1x128xf32> to vector<32x128xf32>
    %44 = arith.mulf %42, %43 : vector<32x128xf32>
    %45 = vector.broadcast %7 : vector<1x128xf32> to vector<32x128xf32>
    %46 = arith.addf %44, %45 : vector<32x128xf32>
    %cst_11 = arith.constant 0.000000e+00 : f32
    %47 = vector.broadcast %cst_11 : f32 to vector<32x128xf32>
    %48 = arith.maximumf %46, %47 : vector<32x128xf32>
    %c0_12 = arith.constant 0 : index
    %c0_13 = arith.constant 0 : index
    %49 = vector.load %arg1[%c0_12, %c0_13] : memref<16x2xf32, #tpu.memory_space<vmem>>, vector<16x2xf32>
    %50 = vector.shape_cast %49 : vector<16x2xf32> to vector<16x2x1xf32>
    %51 = vector.shape_cast %15 : vector<1x128xf32> to vector<1x1x128xf32>
    %52 = vector.broadcast %50 : vector<16x2x1xf32> to vector<16x2x128xf32>
    %53 = vector.broadcast %51 : vector<1x1x128xf32> to vector<16x2x128xf32>
    %54 = arith.mulf %52, %53 : vector<16x2x128xf32>
    %55 = vector.shape_cast %14 : vector<1x128xf32> to vector<1x1x128xf32>
    %56 = vector.broadcast %55 : vector<1x1x128xf32> to vector<16x2x128xf32>
    %57 = arith.addf %54, %56 : vector<16x2x128xf32>
    %c0_14 = arith.constant 0 : index
    %c0_15 = arith.constant 0 : index
    %c0_16 = arith.constant 0 : index
    %58 = vector.load %arg9[%c0_14, %c0_15, %c0_16] : memref<16x2x128xf32, #tpu.memory_space<vmem>>, vector<16x2x128xf32>
    tpu.vector_store %arg9[%c0_14, %c0_15, %c0_16], %57 {strides = array<i32>} : memref<16x2x128xf32, #tpu.memory_space<vmem>>, vector<16x2x128xf32>,
    %c0_i32_17 = arith.constant 0 : i32
    %59 = tpu.memref_slice %arg12[%c0_i32_17] : memref<2x!tpu.dma_semaphore, #tpu.memory_space<semaphore_mem>> -> memref<1x!tpu.dma_semaphore, #tpu.memory_space<semaphore_mem>>
    %60 = tpu.memref_squeeze %59 : memref<1x!tpu.dma_semaphore, #tpu.memory_space<semaphore_mem>> -> memref<!tpu.dma_semaphore, #tpu.memory_space<semaphore_mem>>
    tpu.wait_dma2 semaphore(%60 : memref<!tpu.dma_semaphore, #tpu.memory_space<semaphore_mem>>) src(%arg3 : memref<640x256xbf16, #tpu.memory_space<any>>) dst(%arg10 : memref<640x256xbf16, #tpu.memory_space<vmem>>)
    %61 = vector.shape_cast %48 : vector<32x128xf32> to vector<2x16x128xf32>
    %cst_18 = arith.constant 0.000000e+00 : f32
    %62 = vector.broadcast %cst_18 : f32 to vector<2x2x128xf32>
    %cst_19 = arith.constant 0.000000e+00 : f32
    %63 = vector.broadcast %cst_19 : f32 to vector<2x2x128xf32>
    %64 = tpu.concatenate %62, %61, %63 in 1 : vector<2x2x128xf32>, vector<2x16x128xf32>, vector<2x2x128xf32> -> vector<2x20x128xf32>
    %65 = vector.extract_strided_slice %64 {offsets = [0, 0, 0], sizes = [2, 16, 128], strides = [1, 1, 1]} : vector<2x20x128xf32> to vector<2x16x128xf32>
    %66 = vector.extract_strided_slice %64 {offsets = [0, 1, 0], sizes = [2, 16, 128], strides = [1, 1, 1]} : vector<2x20x128xf32> to vector<2x16x128xf32>
    %67 = vector.extract_strided_slice %64 {offsets = [0, 2, 0], sizes = [2, 16, 128], strides = [1, 1, 1]} : vector<2x20x128xf32> to vector<2x16x128xf32>
    %68 = vector.extract_strided_slice %64 {offsets = [0, 3, 0], sizes = [2, 16, 128], strides = [1, 1, 1]} : vector<2x20x128xf32> to vector<2x16x128xf32>
    %69 = vector.extract_strided_slice %64 {offsets = [0, 4, 0], sizes = [2, 16, 128], strides = [1, 1, 1]} : vector<2x20x128xf32> to vector<2x16x128xf32>
    %70 = tpu.concatenate %65, %66, %67, %68, %69 in 2 : vector<2x16x128xf32>, vector<2x16x128xf32>, vector<2x16x128xf32>, vector<2x16x128xf32>, vector<2x16x128xf32> -> vector<2x16x640xf32>
    %71 = vector.shape_cast %70 : vector<2x16x640xf32> to vector<32x640xf32>
    %c0_20 = arith.constant 0 : index
    %c0_21 = arith.constant 0 : index
    %72 = vector.load %arg10[%c0_20, %c0_21] : memref<640x256xbf16, #tpu.memory_space<vmem>>, vector<640x256xbf16>
    %73 = arith.truncf %71 : vector<32x640xf32> to vector<32x640xbf16>
    %cst_22 = arith.constant dense<0.000000e+00> : vector<32x256xf32>
    %74 = tpu.matmul %73, %72, %cst_22 {dimension_numbers = #tpu.dot_dimension_numbers<[1], [0], [0], [1], [0, 0, 1, 1], [], []>} : vector<32x640xbf16>, vector<640x256xbf16>, vector<32x256xf32> -> vector<32x256xf32>
    %75 = vector.broadcast %8 : vector<1x256xf32> to vector<32x256xf32>
    %76 = arith.addf %74, %75 : vector<32x256xf32>
    %cst_23 = arith.constant dense<0.000000e+00> : vector<256xf32>
    %77 = vector.multi_reduction <add>, %76, %cst_23 [0] : vector<32x256xf32> to vector<256xf32>
    %78 = vector.shape_cast %77 : vector<256xf32> to vector<1x256xf32>
    %cst_24 = arith.constant 3.125000e-02 : f32
    %79 = vector.broadcast %cst_24 : f32 to vector<1x256xf32>
    %80 = arith.mulf %78, %79 : vector<1x256xf32>
    %81 = arith.mulf %76, %76 : vector<32x256xf32>
    %cst_25 = arith.constant dense<0.000000e+00> : vector<256xf32>
    %82 = vector.multi_reduction <add>, %81, %cst_25 [0] : vector<32x256xf32> to vector<256xf32>
    %83 = vector.shape_cast %82 : vector<256xf32> to vector<1x256xf32>
    %cst_26 = arith.constant 3.125000e-02 : f32
    %84 = vector.broadcast %cst_26 : f32 to vector<1x256xf32>
    %85 = arith.mulf %83, %84 : vector<1x256xf32>
    %86 = arith.mulf %80, %80 : vector<1x256xf32>
    %87 = arith.subf %85, %86 : vector<1x256xf32>
    %cst_27 = arith.constant 0.000000e+00 : f32
    %88 = vector.broadcast %cst_27 : f32 to vector<1x256xf32>
    %89 = arith.maximumf %87, %88 : vector<1x256xf32>
    %90 = vector.broadcast %80 : vector<1x256xf32> to vector<32x256xf32>
    %91 = arith.subf %76, %90 : vector<32x256xf32>
    %cst_28 = arith.constant 9.99999974E-6 : f32
    %92 = vector.broadcast %cst_28 : f32 to vector<1x256xf32>
    %93 = arith.addf %89, %92 : vector<1x256xf32>
    %94 = math.rsqrt %93 : vector<1x256xf32>
    %95 = vector.broadcast %94 : vector<1x256xf32> to vector<32x256xf32>
    %96 = arith.mulf %91, %95 : vector<32x256xf32>
    %97 = vector.broadcast %9 : vector<1x256xf32> to vector<32x256xf32>
    %98 = arith.mulf %96, %97 : vector<32x256xf32>
    %99 = vector.broadcast %10 : vector<1x256xf32> to vector<32x256xf32>
    %100 = arith.addf %98, %99 : vector<32x256xf32>
    %cst_29 = arith.constant 0.000000e+00 : f32
    %101 = vector.broadcast %cst_29 : f32 to vector<32x256xf32>
    %102 = arith.maximumf %100, %101 : vector<32x256xf32>
    %c1_i32_30 = arith.constant 1 : i32
    %103 = tpu.memref_slice %arg12[%c1_i32_30] : memref<2x!tpu.dma_semaphore, #tpu.memory_space<semaphore_mem>> -> memref<1x!tpu.dma_semaphore, #tpu.memory_space<semaphore_mem>>
    %104 = tpu.memref_squeeze %103 : memref<1x!tpu.dma_semaphore, #tpu.memory_space<semaphore_mem>> -> memref<!tpu.dma_semaphore, #tpu.memory_space<semaphore_mem>>
    tpu.wait_dma2 semaphore(%104 : memref<!tpu.dma_semaphore, #tpu.memory_space<semaphore_mem>>) src(%arg4 : memref<768x128xbf16, #tpu.memory_space<any>>) dst(%arg11 : memref<768x128xbf16, #tpu.memory_space<vmem>>)
    %105 = vector.shape_cast %102 : vector<32x256xf32> to vector<2x16x256xf32>
    %cst_31 = arith.constant 0.000000e+00 : f32
    %106 = vector.broadcast %cst_31 : f32 to vector<2x1x256xf32>
    %cst_32 = arith.constant 0.000000e+00 : f32
    %107 = vector.broadcast %cst_32 : f32 to vector<2x1x256xf32>
    %108 = tpu.concatenate %106, %105, %107 in 1 : vector<2x1x256xf32>, vector<2x16x256xf32>, vector<2x1x256xf32> -> vector<2x18x256xf32>
    %109 = vector.extract_strided_slice %108 {offsets = [0, 0, 0], sizes = [2, 16, 256], strides = [1, 1, 1]} : vector<2x18x256xf32> to vector<2x16x256xf32>
    %110 = vector.extract_strided_slice %108 {offsets = [0, 1, 0], sizes = [2, 16, 256], strides = [1, 1, 1]} : vector<2x18x256xf32> to vector<2x16x256xf32>
    %111 = vector.extract_strided_slice %108 {offsets = [0, 2, 0], sizes = [2, 16, 256], strides = [1, 1, 1]} : vector<2x18x256xf32> to vector<2x16x256xf32>
    %112 = tpu.concatenate %109, %110, %111 in 2 : vector<2x16x256xf32>, vector<2x16x256xf32>, vector<2x16x256xf32> -> vector<2x16x768xf32>
    %113 = vector.shape_cast %112 : vector<2x16x768xf32> to vector<32x768xf32>
    %c0_33 = arith.constant 0 : index
    %c0_34 = arith.constant 0 : index
    %114 = vector.load %arg11[%c0_33, %c0_34] : memref<768x128xbf16, #tpu.memory_space<vmem>>, vector<768x128xbf16>
    %115 = arith.truncf %113 : vector<32x768xf32> to vector<32x768xbf16>
    %cst_35 = arith.constant dense<0.000000e+00> : vector<32x128xf32>
    %116 = tpu.matmul %115, %114, %cst_35 {dimension_numbers = #tpu.dot_dimension_numbers<[1], [0], [0], [1], [0, 0, 1, 1], [], []>} : vector<32x768xbf16>, vector<768x128xbf16>, vector<32x128xf32> -> vector<32x128xf32>
    %117 = vector.broadcast %11 : vector<1x128xf32> to vector<32x128xf32>
    %118 = arith.addf %116, %117 : vector<32x128xf32>
    %cst_36 = arith.constant dense<0.000000e+00> : vector<128xf32>
    %119 = vector.multi_reduction <add>, %118, %cst_36 [0] : vector<32x128xf32> to vector<128xf32>
    %120 = vector.shape_cast %119 : vector<128xf32> to vector<1x128xf32>
    %cst_37 = arith.constant 3.125000e-02 : f32
    %121 = vector.broadcast %cst_37 : f32 to vector<1x128xf32>
    %122 = arith.mulf %120, %121 : vector<1x128xf32>
    %123 = arith.mulf %118, %118 : vector<32x128xf32>
    %cst_38 = arith.constant dense<0.000000e+00> : vector<128xf32>
    %124 = vector.multi_reduction <add>, %123, %cst_38 [0] : vector<32x128xf32> to vector<128xf32>
    %125 = vector.shape_cast %124 : vector<128xf32> to vector<1x128xf32>
    %cst_39 = arith.constant 3.125000e-02 : f32
    %126 = vector.broadcast %cst_39 : f32 to vector<1x128xf32>
    %127 = arith.mulf %125, %126 : vector<1x128xf32>
    %128 = arith.mulf %122, %122 : vector<1x128xf32>
    %129 = arith.subf %127, %128 : vector<1x128xf32>
    %cst_40 = arith.constant 0.000000e+00 : f32
    %130 = vector.broadcast %cst_40 : f32 to vector<1x128xf32>
    %131 = arith.maximumf %129, %130 : vector<1x128xf32>
    %132 = vector.broadcast %122 : vector<1x128xf32> to vector<32x128xf32>
    %133 = arith.subf %118, %132 : vector<32x128xf32>
    %cst_41 = arith.constant 9.99999974E-6 : f32
    %134 = vector.broadcast %cst_41 : f32 to vector<1x128xf32>
    %135 = arith.addf %131, %134 : vector<1x128xf32>
    %136 = math.rsqrt %135 : vector<1x128xf32>
    %137 = vector.broadcast %136 : vector<1x128xf32> to vector<32x128xf32>
    %138 = arith.mulf %133, %137 : vector<32x128xf32>
    %139 = vector.broadcast %12 : vector<1x128xf32> to vector<32x128xf32>
    %140 = arith.mulf %138, %139 : vector<32x128xf32>
    %141 = vector.broadcast %13 : vector<1x128xf32> to vector<32x128xf32>
    %142 = arith.addf %140, %141 : vector<32x128xf32>
    %cst_42 = arith.constant 0.000000e+00 : f32
    %143 = vector.broadcast %cst_42 : f32 to vector<32x128xf32>
    %144 = arith.maximumf %142, %143 : vector<32x128xf32>
    %145 = vector.shape_cast %144 : vector<32x128xf32> to vector<2x16x128xf32>
    %cst_43 = arith.constant dense<0.000000e+00> : vector<2x128xf32>
    %146 = vector.multi_reduction <add>, %145, %cst_43 [1] : vector<2x16x128xf32> to vector<2x128xf32>
    %cst_44 = arith.constant 1.600000e+01 : f32
    %147 = vector.broadcast %cst_44 : f32 to vector<2x128xf32>
    %148 = arith.divf %146, %147 : vector<2x128xf32>
    %149 = tpu.iota {dimensions = array<i32: 1>} : vector<2x128xi32>
    %c64_i32 = arith.constant 64 : i32
    %150 = vector.broadcast %c64_i32 : i32 to vector<2x128xi32>
    %151 = arith.cmpi sge, %149, %150 : vector<2x128xi32>
    %c96_i32 = arith.constant 96 : i32
    %152 = vector.broadcast %c96_i32 : i32 to vector<2x128xi32>
    %153 = arith.cmpi slt, %149, %152 : vector<2x128xi32>
    %154 = arith.andi %151, %153 : vector<2x128xi1>
    %cst_45 = arith.constant 1.000000e+00 : f32
    %cst_46 = arith.constant 5.000000e-01 : f32
    %155 = vector.broadcast %cst_45 : f32 to vector<2x128xf32>
    %156 = vector.broadcast %cst_46 : f32 to vector<2x128xf32>
    %157 = arith.select %154, %155, %156 : vector<2x128xi1>, vector<2x128xf32>
    %cst_47 = arith.constant 0.000000e+00 : f32
    %cst_48 = arith.constant 5.000000e-01 : f32
    %158 = vector.broadcast %cst_47 : f32 to vector<2x128xf32>
    %159 = vector.broadcast %cst_48 : f32 to vector<2x128xf32>
    %160 = arith.select %154, %158, %159 : vector<2x128xi1>, vector<2x128xf32>
    %c0_49 = arith.constant 0 : index
    %c0_50 = arith.constant 0 : index
    %161 = vector.load %arg6[%c0_49, %c0_50] : memref<128x128xbf16, #tpu.memory_space<vmem>>, vector<128x128xbf16>
    %cst_51 = arith.constant 0.000000e+00 : f32
    %162 = vector.broadcast %cst_51 : f32 to vector<2x128xf32>
    %c0_i32_52 = arith.constant 0 : i32
    %163 = arith.index_cast %c0_i32_52 : i32 to index
    %c0_53 = arith.constant 0 : index
    %c0_54 = arith.constant 0 : index
    %164 = vector.load %arg9[%163, %c0_53, %c0_54] : memref<16x2x128xf32, #tpu.memory_space<vmem>>, vector<1x2x128xf32>
    %165 = vector.shape_cast %164 : vector<1x2x128xf32> to vector<2x128xf32>
    %166 = arith.truncf %162 : vector<2x128xf32> to vector<2x128xbf16>
    %cst_55 = arith.constant dense<0.000000e+00> : vector<2x128xf32>
    %167 = tpu.matmul %166, %161, %cst_55 {dimension_numbers = #tpu.dot_dimension_numbers<[1], [0], [0], [1], [0, 0, 1, 1], [], []>} : vector<2x128xbf16>, vector<128x128xbf16>, vector<2x128xf32> -> vector<2x128xf32>
    %168 = arith.addf %165, %167 : vector<2x128xf32>
    %169 = arith.mulf %168, %157 : vector<2x128xf32>
    %170 = math.tanh %169 : vector<2x128xf32>
    %171 = arith.mulf %157, %170 : vector<2x128xf32>
    %172 = arith.addf %171, %160 : vector<2x128xf32>
    %c96_i32_56 = arith.constant 96 : i32
    %173 = tpu.dynamic_rotate %172 by %c96_i32_56 dim 1 : vector<2x128xf32>, i32 -> vector<2x128xf32>
    %c64_i32_57 = arith.constant 64 : i32
    %174 = tpu.dynamic_rotate %172 by %c64_i32_57 dim 1 : vector<2x128xf32>, i32 -> vector<2x128xf32>
    %c32_i32 = arith.constant 32 : i32
    %175 = tpu.dynamic_rotate %172 by %c32_i32 dim 1 : vector<2x128xf32>, i32 -> vector<2x128xf32>
    %176 = arith.mulf %173, %162 : vector<2x128xf32>
    %177 = arith.mulf %172, %174 : vector<2x128xf32>
    %178 = arith.addf %176, %177 : vector<2x128xf32>
    %179 = math.tanh %178 : vector<2x128xf32>
    %180 = arith.mulf %175, %179 : vector<2x128xf32>
    %c1_i32_58 = arith.constant 1 : i32
    %181 = arith.index_cast %c1_i32_58 : i32 to index
    %c0_59 = arith.constant 0 : index
    %c0_60 = arith.constant 0 : index
    %182 = vector.load %arg9[%181, %c0_59, %c0_60] : memref<16x2x128xf32, #tpu.memory_space<vmem>>, vector<1x2x128xf32>
    %183 = vector.shape_cast %182 : vector<1x2x128xf32> to vector<2x128xf32>
    %184 = arith.truncf %180 : vector<2x128xf32> to vector<2x128xbf16>
    %cst_61 = arith.constant dense<0.000000e+00> : vector<2x128xf32>
    %185 = tpu.matmul %184, %161, %cst_61 {dimension_numbers = #tpu.dot_dimension_numbers<[1], [0], [0], [1], [0, 0, 1, 1], [], []>} : vector<2x128xbf16>, vector<128x128xbf16>, vector<2x128xf32> -> vector<2x128xf32>
    %186 = arith.addf %183, %185 : vector<2x128xf32>
    %187 = arith.mulf %186, %157 : vector<2x128xf32>
    %188 = math.tanh %187 : vector<2x128xf32>
    %189 = arith.mulf %157, %188 : vector<2x128xf32>
    %190 = arith.addf %189, %160 : vector<2x128xf32>
    %c96_i32_62 = arith.constant 96 : i32
    %191 = tpu.dynamic_rotate %190 by %c96_i32_62 dim 1 : vector<2x128xf32>, i32 -> vector<2x128xf32>
    %c64_i32_63 = arith.constant 64 : i32
    %192 = tpu.dynamic_rotate %190 by %c64_i32_63 dim 1 : vector<2x128xf32>, i32 -> vector<2x128xf32>
    %c32_i32_64 = arith.constant 32 : i32
    %193 = tpu.dynamic_rotate %190 by %c32_i32_64 dim 1 : vector<2x128xf32>, i32 -> vector<2x128xf32>
    %194 = arith.mulf %191, %178 : vector<2x128xf32>
    %195 = arith.mulf %190, %192 : vector<2x128xf32>
    %196 = arith.addf %194, %195 : vector<2x128xf32>
    %197 = math.tanh %196 : vector<2x128xf32>
    %198 = arith.mulf %193, %197 : vector<2x128xf32>
    %c2_i32 = arith.constant 2 : i32
    %199 = arith.index_cast %c2_i32 : i32 to index
    %c0_65 = arith.constant 0 : index
    %c0_66 = arith.constant 0 : index
    %200 = vector.load %arg9[%199, %c0_65, %c0_66] : memref<16x2x128xf32, #tpu.memory_space<vmem>>, vector<1x2x128xf32>
    %201 = vector.shape_cast %200 : vector<1x2x128xf32> to vector<2x128xf32>
    %202 = arith.truncf %198 : vector<2x128xf32> to vector<2x128xbf16>
    %cst_67 = arith.constant dense<0.000000e+00> : vector<2x128xf32>
    %203 = tpu.matmul %202, %161, %cst_67 {dimension_numbers = #tpu.dot_dimension_numbers<[1], [0], [0], [1], [0, 0, 1, 1], [], []>} : vector<2x128xbf16>, vector<128x128xbf16>, vector<2x128xf32> -> vector<2x128xf32>
    %204 = arith.addf %201, %203 : vector<2x128xf32>
    %205 = arith.mulf %204, %157 : vector<2x128xf32>
    %206 = math.tanh %205 : vector<2x128xf32>
    %207 = arith.mulf %157, %206 : vector<2x128xf32>
    %208 = arith.addf %207, %160 : vector<2x128xf32>
    %c96_i32_68 = arith.constant 96 : i32
    %209 = tpu.dynamic_rotate %208 by %c96_i32_68 dim 1 : vector<2x128xf32>, i32 -> vector<2x128xf32>
    %c64_i32_69 = arith.constant 64 : i32
    %210 = tpu.dynamic_rotate %208 by %c64_i32_69 dim 1 : vector<2x128xf32>, i32 -> vector<2x128xf32>
    %c32_i32_70 = arith.constant 32 : i32
    %211 = tpu.dynamic_rotate %208 by %c32_i32_70 dim 1 : vector<2x128xf32>, i32 -> vector<2x128xf32>
    %212 = arith.mulf %209, %196 : vector<2x128xf32>
    %213 = arith.mulf %208, %210 : vector<2x128xf32>
    %214 = arith.addf %212, %213 : vector<2x128xf32>
    %215 = math.tanh %214 : vector<2x128xf32>
    %216 = arith.mulf %211, %215 : vector<2x128xf32>
    %c3_i32 = arith.constant 3 : i32
    %217 = arith.index_cast %c3_i32 : i32 to index
    %c0_71 = arith.constant 0 : index
    %c0_72 = arith.constant 0 : index
    %218 = vector.load %arg9[%217, %c0_71, %c0_72] : memref<16x2x128xf32, #tpu.memory_space<vmem>>, vector<1x2x128xf32>
    %219 = vector.shape_cast %218 : vector<1x2x128xf32> to vector<2x128xf32>
    %220 = arith.truncf %216 : vector<2x128xf32> to vector<2x128xbf16>
    %cst_73 = arith.constant dense<0.000000e+00> : vector<2x128xf32>
    %221 = tpu.matmul %220, %161, %cst_73 {dimension_numbers = #tpu.dot_dimension_numbers<[1], [0], [0], [1], [0, 0, 1, 1], [], []>} : vector<2x128xbf16>, vector<128x128xbf16>, vector<2x128xf32> -> vector<2x128xf32>
    %222 = arith.addf %219, %221 : vector<2x128xf32>
    %223 = arith.mulf %222, %157 : vector<2x128xf32>
    %224 = math.tanh %223 : vector<2x128xf32>
    %225 = arith.mulf %157, %224 : vector<2x128xf32>
    %226 = arith.addf %225, %160 : vector<2x128xf32>
    %c96_i32_74 = arith.constant 96 : i32
    %227 = tpu.dynamic_rotate %226 by %c96_i32_74 dim 1 : vector<2x128xf32>, i32 -> vector<2x128xf32>
    %c64_i32_75 = arith.constant 64 : i32
    %228 = tpu.dynamic_rotate %226 by %c64_i32_75 dim 1 : vector<2x128xf32>, i32 -> vector<2x128xf32>
    %c32_i32_76 = arith.constant 32 : i32
    %229 = tpu.dynamic_rotate %226 by %c32_i32_76 dim 1 : vector<2x128xf32>, i32 -> vector<2x128xf32>
    %230 = arith.mulf %227, %214 : vector<2x128xf32>
    %231 = arith.mulf %226, %228 : vector<2x128xf32>
    %232 = arith.addf %230, %231 : vector<2x128xf32>
    %233 = math.tanh %232 : vector<2x128xf32>
    %234 = arith.mulf %229, %233 : vector<2x128xf32>
    %c4_i32 = arith.constant 4 : i32
    %235 = arith.index_cast %c4_i32 : i32 to index
    %c0_77 = arith.constant 0 : index
    %c0_78 = arith.constant 0 : index
    %236 = vector.load %arg9[%235, %c0_77, %c0_78] : memref<16x2x128xf32, #tpu.memory_space<vmem>>, vector<1x2x128xf32>
    %237 = vector.shape_cast %236 : vector<1x2x128xf32> to vector<2x128xf32>
    %238 = arith.truncf %234 : vector<2x128xf32> to vector<2x128xbf16>
    %cst_79 = arith.constant dense<0.000000e+00> : vector<2x128xf32>
    %239 = tpu.matmul %238, %161, %cst_79 {dimension_numbers = #tpu.dot_dimension_numbers<[1], [0], [0], [1], [0, 0, 1, 1], [], []>} : vector<2x128xbf16>, vector<128x128xbf16>, vector<2x128xf32> -> vector<2x128xf32>
    %240 = arith.addf %237, %239 : vector<2x128xf32>
    %241 = arith.mulf %240, %157 : vector<2x128xf32>
    %242 = math.tanh %241 : vector<2x128xf32>
    %243 = arith.mulf %157, %242 : vector<2x128xf32>
    %244 = arith.addf %243, %160 : vector<2x128xf32>
    %c96_i32_80 = arith.constant 96 : i32
    %245 = tpu.dynamic_rotate %244 by %c96_i32_80 dim 1 : vector<2x128xf32>, i32 -> vector<2x128xf32>
    %c64_i32_81 = arith.constant 64 : i32
    %246 = tpu.dynamic_rotate %244 by %c64_i32_81 dim 1 : vector<2x128xf32>, i32 -> vector<2x128xf32>
    %c32_i32_82 = arith.constant 32 : i32
    %247 = tpu.dynamic_rotate %244 by %c32_i32_82 dim 1 : vector<2x128xf32>, i32 -> vector<2x128xf32>
    %248 = arith.mulf %245, %232 : vector<2x128xf32>
    %249 = arith.mulf %244, %246 : vector<2x128xf32>
    %250 = arith.addf %248, %249 : vector<2x128xf32>
    %251 = math.tanh %250 : vector<2x128xf32>
    %252 = arith.mulf %247, %251 : vector<2x128xf32>
    %c5_i32 = arith.constant 5 : i32
    %253 = arith.index_cast %c5_i32 : i32 to index
    %c0_83 = arith.constant 0 : index
    %c0_84 = arith.constant 0 : index
    %254 = vector.load %arg9[%253, %c0_83, %c0_84] : memref<16x2x128xf32, #tpu.memory_space<vmem>>, vector<1x2x128xf32>
    %255 = vector.shape_cast %254 : vector<1x2x128xf32> to vector<2x128xf32>
    %256 = arith.truncf %252 : vector<2x128xf32> to vector<2x128xbf16>
    %cst_85 = arith.constant dense<0.000000e+00> : vector<2x128xf32>
    %257 = tpu.matmul %256, %161, %cst_85 {dimension_numbers = #tpu.dot_dimension_numbers<[1], [0], [0], [1], [0, 0, 1, 1], [], []>} : vector<2x128xbf16>, vector<128x128xbf16>, vector<2x128xf32> -> vector<2x128xf32>
    %258 = arith.addf %255, %257 : vector<2x128xf32>
    %259 = arith.mulf %258, %157 : vector<2x128xf32>
    %260 = math.tanh %259 : vector<2x128xf32>
    %261 = arith.mulf %157, %260 : vector<2x128xf32>
    %262 = arith.addf %261, %160 : vector<2x128xf32>
    %c96_i32_86 = arith.constant 96 : i32
    %263 = tpu.dynamic_rotate %262 by %c96_i32_86 dim 1 : vector<2x128xf32>, i32 -> vector<2x128xf32>
    %c64_i32_87 = arith.constant 64 : i32
    %264 = tpu.dynamic_rotate %262 by %c64_i32_87 dim 1 : vector<2x128xf32>, i32 -> vector<2x128xf32>
    %c32_i32_88 = arith.constant 32 : i32
    %265 = tpu.dynamic_rotate %262 by %c32_i32_88 dim 1 : vector<2x128xf32>, i32 -> vector<2x128xf32>
    %266 = arith.mulf %263, %250 : vector<2x128xf32>
    %267 = arith.mulf %262, %264 : vector<2x128xf32>
    %268 = arith.addf %266, %267 : vector<2x128xf32>
    %269 = math.tanh %268 : vector<2x128xf32>
    %270 = arith.mulf %265, %269 : vector<2x128xf32>
    %c6_i32 = arith.constant 6 : i32
    %271 = arith.index_cast %c6_i32 : i32 to index
    %c0_89 = arith.constant 0 : index
    %c0_90 = arith.constant 0 : index
    %272 = vector.load %arg9[%271, %c0_89, %c0_90] : memref<16x2x128xf32, #tpu.memory_space<vmem>>, vector<1x2x128xf32>
    %273 = vector.shape_cast %272 : vector<1x2x128xf32> to vector<2x128xf32>
    %274 = arith.truncf %270 : vector<2x128xf32> to vector<2x128xbf16>
    %cst_91 = arith.constant dense<0.000000e+00> : vector<2x128xf32>
    %275 = tpu.matmul %274, %161, %cst_91 {dimension_numbers = #tpu.dot_dimension_numbers<[1], [0], [0], [1], [0, 0, 1, 1], [], []>} : vector<2x128xbf16>, vector<128x128xbf16>, vector<2x128xf32> -> vector<2x128xf32>
    %276 = arith.addf %273, %275 : vector<2x128xf32>
    %277 = arith.mulf %276, %157 : vector<2x128xf32>
    %278 = math.tanh %277 : vector<2x128xf32>
    %279 = arith.mulf %157, %278 : vector<2x128xf32>
    %280 = arith.addf %279, %160 : vector<2x128xf32>
    %c96_i32_92 = arith.constant 96 : i32
    %281 = tpu.dynamic_rotate %280 by %c96_i32_92 dim 1 : vector<2x128xf32>, i32 -> vector<2x128xf32>
    %c64_i32_93 = arith.constant 64 : i32
    %282 = tpu.dynamic_rotate %280 by %c64_i32_93 dim 1 : vector<2x128xf32>, i32 -> vector<2x128xf32>
    %c32_i32_94 = arith.constant 32 : i32
    %283 = tpu.dynamic_rotate %280 by %c32_i32_94 dim 1 : vector<2x128xf32>, i32 -> vector<2x128xf32>
    %284 = arith.mulf %281, %268 : vector<2x128xf32>
    %285 = arith.mulf %280, %282 : vector<2x128xf32>
    %286 = arith.addf %284, %285 : vector<2x128xf32>
    %287 = math.tanh %286 : vector<2x128xf32>
    %288 = arith.mulf %283, %287 : vector<2x128xf32>
    %c7_i32 = arith.constant 7 : i32
    %289 = arith.index_cast %c7_i32 : i32 to index
    %c0_95 = arith.constant 0 : index
    %c0_96 = arith.constant 0 : index
    %290 = vector.load %arg9[%289, %c0_95, %c0_96] : memref<16x2x128xf32, #tpu.memory_space<vmem>>, vector<1x2x128xf32>
    %291 = vector.shape_cast %290 : vector<1x2x128xf32> to vector<2x128xf32>
    %292 = arith.truncf %288 : vector<2x128xf32> to vector<2x128xbf16>
    %cst_97 = arith.constant dense<0.000000e+00> : vector<2x128xf32>
    %293 = tpu.matmul %292, %161, %cst_97 {dimension_numbers = #tpu.dot_dimension_numbers<[1], [0], [0], [1], [0, 0, 1, 1], [], []>} : vector<2x128xbf16>, vector<128x128xbf16>, vector<2x128xf32> -> vector<2x128xf32>
    %294 = arith.addf %291, %293 : vector<2x128xf32>
    %295 = arith.mulf %294, %157 : vector<2x128xf32>
    %296 = math.tanh %295 : vector<2x128xf32>
    %297 = arith.mulf %157, %296 : vector<2x128xf32>
    %298 = arith.addf %297, %160 : vector<2x128xf32>
    %c96_i32_98 = arith.constant 96 : i32
    %299 = tpu.dynamic_rotate %298 by %c96_i32_98 dim 1 : vector<2x128xf32>, i32 -> vector<2x128xf32>
    %c64_i32_99 = arith.constant 64 : i32
    %300 = tpu.dynamic_rotate %298 by %c64_i32_99 dim 1 : vector<2x128xf32>, i32 -> vector<2x128xf32>
    %c32_i32_100 = arith.constant 32 : i32
    %301 = tpu.dynamic_rotate %298 by %c32_i32_100 dim 1 : vector<2x128xf32>, i32 -> vector<2x128xf32>
    %302 = arith.mulf %299, %286 : vector<2x128xf32>
    %303 = arith.mulf %298, %300 : vector<2x128xf32>
    %304 = arith.addf %302, %303 : vector<2x128xf32>
    %305 = math.tanh %304 : vector<2x128xf32>
    %306 = arith.mulf %301, %305 : vector<2x128xf32>
    %c8_i32 = arith.constant 8 : i32
    %307 = arith.index_cast %c8_i32 : i32 to index
    %c0_101 = arith.constant 0 : index
    %c0_102 = arith.constant 0 : index
    %308 = vector.load %arg9[%307, %c0_101, %c0_102] : memref<16x2x128xf32, #tpu.memory_space<vmem>>, vector<1x2x128xf32>
    %309 = vector.shape_cast %308 : vector<1x2x128xf32> to vector<2x128xf32>
    %310 = arith.truncf %306 : vector<2x128xf32> to vector<2x128xbf16>
    %cst_103 = arith.constant dense<0.000000e+00> : vector<2x128xf32>
    %311 = tpu.matmul %310, %161, %cst_103 {dimension_numbers = #tpu.dot_dimension_numbers<[1], [0], [0], [1], [0, 0, 1, 1], [], []>} : vector<2x128xbf16>, vector<128x128xbf16>, vector<2x128xf32> -> vector<2x128xf32>
    %312 = arith.addf %309, %311 : vector<2x128xf32>
    %313 = arith.mulf %312, %157 : vector<2x128xf32>
    %314 = math.tanh %313 : vector<2x128xf32>
    %315 = arith.mulf %157, %314 : vector<2x128xf32>
    %316 = arith.addf %315, %160 : vector<2x128xf32>
    %c96_i32_104 = arith.constant 96 : i32
    %317 = tpu.dynamic_rotate %316 by %c96_i32_104 dim 1 : vector<2x128xf32>, i32 -> vector<2x128xf32>
    %c64_i32_105 = arith.constant 64 : i32
    %318 = tpu.dynamic_rotate %316 by %c64_i32_105 dim 1 : vector<2x128xf32>, i32 -> vector<2x128xf32>
    %c32_i32_106 = arith.constant 32 : i32
    %319 = tpu.dynamic_rotate %316 by %c32_i32_106 dim 1 : vector<2x128xf32>, i32 -> vector<2x128xf32>
    %320 = arith.mulf %317, %304 : vector<2x128xf32>
    %321 = arith.mulf %316, %318 : vector<2x128xf32>
    %322 = arith.addf %320, %321 : vector<2x128xf32>
    %323 = math.tanh %322 : vector<2x128xf32>
    %324 = arith.mulf %319, %323 : vector<2x128xf32>
    %c9_i32 = arith.constant 9 : i32
    %325 = arith.index_cast %c9_i32 : i32 to index
    %c0_107 = arith.constant 0 : index
    %c0_108 = arith.constant 0 : index
    %326 = vector.load %arg9[%325, %c0_107, %c0_108] : memref<16x2x128xf32, #tpu.memory_space<vmem>>, vector<1x2x128xf32>
    %327 = vector.shape_cast %326 : vector<1x2x128xf32> to vector<2x128xf32>
    %328 = arith.truncf %324 : vector<2x128xf32> to vector<2x128xbf16>
    %cst_109 = arith.constant dense<0.000000e+00> : vector<2x128xf32>
    %329 = tpu.matmul %328, %161, %cst_109 {dimension_numbers = #tpu.dot_dimension_numbers<[1], [0], [0], [1], [0, 0, 1, 1], [], []>} : vector<2x128xbf16>, vector<128x128xbf16>, vector<2x128xf32> -> vector<2x128xf32>
    %330 = arith.addf %327, %329 : vector<2x128xf32>
    %331 = arith.mulf %330, %157 : vector<2x128xf32>
    %332 = math.tanh %331 : vector<2x128xf32>
    %333 = arith.mulf %157, %332 : vector<2x128xf32>
    %334 = arith.addf %333, %160 : vector<2x128xf32>
    %c96_i32_110 = arith.constant 96 : i32
    %335 = tpu.dynamic_rotate %334 by %c96_i32_110 dim 1 : vector<2x128xf32>, i32 -> vector<2x128xf32>
    %c64_i32_111 = arith.constant 64 : i32
    %336 = tpu.dynamic_rotate %334 by %c64_i32_111 dim 1 : vector<2x128xf32>, i32 -> vector<2x128xf32>
    %c32_i32_112 = arith.constant 32 : i32
    %337 = tpu.dynamic_rotate %334 by %c32_i32_112 dim 1 : vector<2x128xf32>, i32 -> vector<2x128xf32>
    %338 = arith.mulf %335, %322 : vector<2x128xf32>
    %339 = arith.mulf %334, %336 : vector<2x128xf32>
    %340 = arith.addf %338, %339 : vector<2x128xf32>
    %341 = math.tanh %340 : vector<2x128xf32>
    %342 = arith.mulf %337, %341 : vector<2x128xf32>
    %c10_i32 = arith.constant 10 : i32
    %343 = arith.index_cast %c10_i32 : i32 to index
    %c0_113 = arith.constant 0 : index
    %c0_114 = arith.constant 0 : index
    %344 = vector.load %arg9[%343, %c0_113, %c0_114] : memref<16x2x128xf32, #tpu.memory_space<vmem>>, vector<1x2x128xf32>
    %345 = vector.shape_cast %344 : vector<1x2x128xf32> to vector<2x128xf32>
    %346 = arith.truncf %342 : vector<2x128xf32> to vector<2x128xbf16>
    %cst_115 = arith.constant dense<0.000000e+00> : vector<2x128xf32>
    %347 = tpu.matmul %346, %161, %cst_115 {dimension_numbers = #tpu.dot_dimension_numbers<[1], [0], [0], [1], [0, 0, 1, 1], [], []>} : vector<2x128xbf16>, vector<128x128xbf16>, vector<2x128xf32> -> vector<2x128xf32>
    %348 = arith.addf %345, %347 : vector<2x128xf32>
    %349 = arith.mulf %348, %157 : vector<2x128xf32>
    %350 = math.tanh %349 : vector<2x128xf32>
    %351 = arith.mulf %157, %350 : vector<2x128xf32>
    %352 = arith.addf %351, %160 : vector<2x128xf32>
    %c96_i32_116 = arith.constant 96 : i32
    %353 = tpu.dynamic_rotate %352 by %c96_i32_116 dim 1 : vector<2x128xf32>, i32 -> vector<2x128xf32>
    %c64_i32_117 = arith.constant 64 : i32
    %354 = tpu.dynamic_rotate %352 by %c64_i32_117 dim 1 : vector<2x128xf32>, i32 -> vector<2x128xf32>
    %c32_i32_118 = arith.constant 32 : i32
    %355 = tpu.dynamic_rotate %352 by %c32_i32_118 dim 1 : vector<2x128xf32>, i32 -> vector<2x128xf32>
    %356 = arith.mulf %353, %340 : vector<2x128xf32>
    %357 = arith.mulf %352, %354 : vector<2x128xf32>
    %358 = arith.addf %356, %357 : vector<2x128xf32>
    %359 = math.tanh %358 : vector<2x128xf32>
    %360 = arith.mulf %355, %359 : vector<2x128xf32>
    %c11_i32 = arith.constant 11 : i32
    %361 = arith.index_cast %c11_i32 : i32 to index
    %c0_119 = arith.constant 0 : index
    %c0_120 = arith.constant 0 : index
    %362 = vector.load %arg9[%361, %c0_119, %c0_120] : memref<16x2x128xf32, #tpu.memory_space<vmem>>, vector<1x2x128xf32>
    %363 = vector.shape_cast %362 : vector<1x2x128xf32> to vector<2x128xf32>
    %364 = arith.truncf %360 : vector<2x128xf32> to vector<2x128xbf16>
    %cst_121 = arith.constant dense<0.000000e+00> : vector<2x128xf32>
    %365 = tpu.matmul %364, %161, %cst_121 {dimension_numbers = #tpu.dot_dimension_numbers<[1], [0], [0], [1], [0, 0, 1, 1], [], []>} : vector<2x128xbf16>, vector<128x128xbf16>, vector<2x128xf32> -> vector<2x128xf32>
    %366 = arith.addf %363, %365 : vector<2x128xf32>
    %367 = arith.mulf %366, %157 : vector<2x128xf32>
    %368 = math.tanh %367 : vector<2x128xf32>
    %369 = arith.mulf %157, %368 : vector<2x128xf32>
    %370 = arith.addf %369, %160 : vector<2x128xf32>
    %c96_i32_122 = arith.constant 96 : i32
    %371 = tpu.dynamic_rotate %370 by %c96_i32_122 dim 1 : vector<2x128xf32>, i32 -> vector<2x128xf32>
    %c64_i32_123 = arith.constant 64 : i32
    %372 = tpu.dynamic_rotate %370 by %c64_i32_123 dim 1 : vector<2x128xf32>, i32 -> vector<2x128xf32>
    %c32_i32_124 = arith.constant 32 : i32
    %373 = tpu.dynamic_rotate %370 by %c32_i32_124 dim 1 : vector<2x128xf32>, i32 -> vector<2x128xf32>
    %374 = arith.mulf %371, %358 : vector<2x128xf32>
    %375 = arith.mulf %370, %372 : vector<2x128xf32>
    %376 = arith.addf %374, %375 : vector<2x128xf32>
    %377 = math.tanh %376 : vector<2x128xf32>
    %378 = arith.mulf %373, %377 : vector<2x128xf32>
    %c12_i32 = arith.constant 12 : i32
    %379 = arith.index_cast %c12_i32 : i32 to index
    %c0_125 = arith.constant 0 : index
    %c0_126 = arith.constant 0 : index
    %380 = vector.load %arg9[%379, %c0_125, %c0_126] : memref<16x2x128xf32, #tpu.memory_space<vmem>>, vector<1x2x128xf32>
    %381 = vector.shape_cast %380 : vector<1x2x128xf32> to vector<2x128xf32>
    %382 = arith.truncf %378 : vector<2x128xf32> to vector<2x128xbf16>
    %cst_127 = arith.constant dense<0.000000e+00> : vector<2x128xf32>
    %383 = tpu.matmul %382, %161, %cst_127 {dimension_numbers = #tpu.dot_dimension_numbers<[1], [0], [0], [1], [0, 0, 1, 1], [], []>} : vector<2x128xbf16>, vector<128x128xbf16>, vector<2x128xf32> -> vector<2x128xf32>
    %384 = arith.addf %381, %383 : vector<2x128xf32>
    %385 = arith.mulf %384, %157 : vector<2x128xf32>
    %386 = math.tanh %385 : vector<2x128xf32>
    %387 = arith.mulf %157, %386 : vector<2x128xf32>
    %388 = arith.addf %387, %160 : vector<2x128xf32>
    %c96_i32_128 = arith.constant 96 : i32
    %389 = tpu.dynamic_rotate %388 by %c96_i32_128 dim 1 : vector<2x128xf32>, i32 -> vector<2x128xf32>
    %c64_i32_129 = arith.constant 64 : i32
    %390 = tpu.dynamic_rotate %388 by %c64_i32_129 dim 1 : vector<2x128xf32>, i32 -> vector<2x128xf32>
    %c32_i32_130 = arith.constant 32 : i32
    %391 = tpu.dynamic_rotate %388 by %c32_i32_130 dim 1 : vector<2x128xf32>, i32 -> vector<2x128xf32>
    %392 = arith.mulf %389, %376 : vector<2x128xf32>
    %393 = arith.mulf %388, %390 : vector<2x128xf32>
    %394 = arith.addf %392, %393 : vector<2x128xf32>
    %395 = math.tanh %394 : vector<2x128xf32>
    %396 = arith.mulf %391, %395 : vector<2x128xf32>
    %c13_i32 = arith.constant 13 : i32
    %397 = arith.index_cast %c13_i32 : i32 to index
    %c0_131 = arith.constant 0 : index
    %c0_132 = arith.constant 0 : index
    %398 = vector.load %arg9[%397, %c0_131, %c0_132] : memref<16x2x128xf32, #tpu.memory_space<vmem>>, vector<1x2x128xf32>
    %399 = vector.shape_cast %398 : vector<1x2x128xf32> to vector<2x128xf32>
    %400 = arith.truncf %396 : vector<2x128xf32> to vector<2x128xbf16>
    %cst_133 = arith.constant dense<0.000000e+00> : vector<2x128xf32>
    %401 = tpu.matmul %400, %161, %cst_133 {dimension_numbers = #tpu.dot_dimension_numbers<[1], [0], [0], [1], [0, 0, 1, 1], [], []>} : vector<2x128xbf16>, vector<128x128xbf16>, vector<2x128xf32> -> vector<2x128xf32>
    %402 = arith.addf %399, %401 : vector<2x128xf32>
    %403 = arith.mulf %402, %157 : vector<2x128xf32>
    %404 = math.tanh %403 : vector<2x128xf32>
    %405 = arith.mulf %157, %404 : vector<2x128xf32>
    %406 = arith.addf %405, %160 : vector<2x128xf32>
    %c96_i32_134 = arith.constant 96 : i32
    %407 = tpu.dynamic_rotate %406 by %c96_i32_134 dim 1 : vector<2x128xf32>, i32 -> vector<2x128xf32>
    %c64_i32_135 = arith.constant 64 : i32
    %408 = tpu.dynamic_rotate %406 by %c64_i32_135 dim 1 : vector<2x128xf32>, i32 -> vector<2x128xf32>
    %c32_i32_136 = arith.constant 32 : i32
    %409 = tpu.dynamic_rotate %406 by %c32_i32_136 dim 1 : vector<2x128xf32>, i32 -> vector<2x128xf32>
    %410 = arith.mulf %407, %394 : vector<2x128xf32>
    %411 = arith.mulf %406, %408 : vector<2x128xf32>
    %412 = arith.addf %410, %411 : vector<2x128xf32>
    %413 = math.tanh %412 : vector<2x128xf32>
    %414 = arith.mulf %409, %413 : vector<2x128xf32>
    %c14_i32 = arith.constant 14 : i32
    %415 = arith.index_cast %c14_i32 : i32 to index
    %c0_137 = arith.constant 0 : index
    %c0_138 = arith.constant 0 : index
    %416 = vector.load %arg9[%415, %c0_137, %c0_138] : memref<16x2x128xf32, #tpu.memory_space<vmem>>, vector<1x2x128xf32>
    %417 = vector.shape_cast %416 : vector<1x2x128xf32> to vector<2x128xf32>
    %418 = arith.truncf %414 : vector<2x128xf32> to vector<2x128xbf16>
    %cst_139 = arith.constant dense<0.000000e+00> : vector<2x128xf32>
    %419 = tpu.matmul %418, %161, %cst_139 {dimension_numbers = #tpu.dot_dimension_numbers<[1], [0], [0], [1], [0, 0, 1, 1], [], []>} : vector<2x128xbf16>, vector<128x128xbf16>, vector<2x128xf32> -> vector<2x128xf32>
    %420 = arith.addf %417, %419 : vector<2x128xf32>
    %421 = arith.mulf %420, %157 : vector<2x128xf32>
    %422 = math.tanh %421 : vector<2x128xf32>
    %423 = arith.mulf %157, %422 : vector<2x128xf32>
    %424 = arith.addf %423, %160 : vector<2x128xf32>
    %c96_i32_140 = arith.constant 96 : i32
    %425 = tpu.dynamic_rotate %424 by %c96_i32_140 dim 1 : vector<2x128xf32>, i32 -> vector<2x128xf32>
    %c64_i32_141 = arith.constant 64 : i32
    %426 = tpu.dynamic_rotate %424 by %c64_i32_141 dim 1 : vector<2x128xf32>, i32 -> vector<2x128xf32>
    %c32_i32_142 = arith.constant 32 : i32
    %427 = tpu.dynamic_rotate %424 by %c32_i32_142 dim 1 : vector<2x128xf32>, i32 -> vector<2x128xf32>
    %428 = arith.mulf %425, %412 : vector<2x128xf32>
    %429 = arith.mulf %424, %426 : vector<2x128xf32>
    %430 = arith.addf %428, %429 : vector<2x128xf32>
    %431 = math.tanh %430 : vector<2x128xf32>
    %432 = arith.mulf %427, %431 : vector<2x128xf32>
    %c15_i32 = arith.constant 15 : i32
    %433 = arith.index_cast %c15_i32 : i32 to index
    %c0_143 = arith.constant 0 : index
    %c0_144 = arith.constant 0 : index
    %434 = vector.load %arg9[%433, %c0_143, %c0_144] : memref<16x2x128xf32, #tpu.memory_space<vmem>>, vector<1x2x128xf32>
    %435 = vector.shape_cast %434 : vector<1x2x128xf32> to vector<2x128xf32>
    %436 = arith.truncf %432 : vector<2x128xf32> to vector<2x128xbf16>
    %cst_145 = arith.constant dense<0.000000e+00> : vector<2x128xf32>
    %437 = tpu.matmul %436, %161, %cst_145 {dimension_numbers = #tpu.dot_dimension_numbers<[1], [0], [0], [1], [0, 0, 1, 1], [], []>} : vector<2x128xbf16>, vector<128x128xbf16>, vector<2x128xf32> -> vector<2x128xf32>
    %438 = arith.addf %435, %437 : vector<2x128xf32>
    %439 = arith.mulf %438, %157 : vector<2x128xf32>
    %440 = math.tanh %439 : vector<2x128xf32>
    %441 = arith.mulf %157, %440 : vector<2x128xf32>
    %442 = arith.addf %441, %160 : vector<2x128xf32>
    %c96_i32_146 = arith.constant 96 : i32
    %443 = tpu.dynamic_rotate %442 by %c96_i32_146 dim 1 : vector<2x128xf32>, i32 -> vector<2x128xf32>
    %c64_i32_147 = arith.constant 64 : i32
    %444 = tpu.dynamic_rotate %442 by %c64_i32_147 dim 1 : vector<2x128xf32>, i32 -> vector<2x128xf32>
    %c32_i32_148 = arith.constant 32 : i32
    %445 = tpu.dynamic_rotate %442 by %c32_i32_148 dim 1 : vector<2x128xf32>, i32 -> vector<2x128xf32>
    %446 = arith.mulf %443, %430 : vector<2x128xf32>
    %447 = arith.mulf %442, %444 : vector<2x128xf32>
    %448 = arith.addf %446, %447 : vector<2x128xf32>
    %449 = math.tanh %448 : vector<2x128xf32>
    %450 = arith.mulf %445, %449 : vector<2x128xf32>
    %c16_i32 = arith.constant 16 : i32
    %451 = tpu.concatenate %148, %450 in 1 : vector<2x128xf32>, vector<2x128xf32> -> vector<2x256xf32>
    %452 = arith.truncf %451 : vector<2x256xf32> to vector<2x256xbf16>
    %c0_149 = arith.constant 0 : index
    %c0_150 = arith.constant 0 : index
    %453 = vector.load %arg7[%c0_149, %c0_150] : memref<256x3xbf16, #tpu.memory_space<vmem>>, vector<256x3xbf16>
    %cst_151 = arith.constant dense<0.000000e+00> : vector<2x3xf32>
    %454 = tpu.matmul %452, %453, %cst_151 {dimension_numbers = #tpu.dot_dimension_numbers<[1], [0], [0], [1], [0, 0, 1, 1], [], []>} : vector<2x256xbf16>, vector<256x3xbf16>, vector<2x3xf32> -> vector<2x3xf32>
    %455 = vector.broadcast %16 : vector<1x3xf32> to vector<2x3xf32>
    %456 = arith.addf %454, %455 : vector<2x3xf32>
    %c0_152 = arith.constant 0 : index
    %c0_153 = arith.constant 0 : index
    %457 = vector.load %arg8[%c0_152, %c0_153] : memref<2x3xf32, #tpu.memory_space<vmem>>, vector<2x3xf32>
    tpu.vector_store %arg8[%c0_152, %c0_153], %456 {strides = array<i32>} : memref<2x3xf32, #tpu.memory_space<vmem>>, vector<2x3xf32>,
    return
  }
}

</mosaic_0001>

<bundles_post_ra>
// kernel: lstmfcn_forward.1
= control target key start
LH: loop header
LB: loop body
LE: loop exit
PB: predicated region body
PF: predicated region fallthrough
CT: control target
= control target key end

     0   :  { %13 = vsyncpa [#allocation7], 0  ;;  %s5105_s0 = inlined_call_operand.vmem [shape: f32[32,8], index: 0, kind: input, shape index: {}]   ;;  %s5106_s1 = inlined_call_operand.vmem [shape: f32[16,2], index: 1, kind: input, shape index: {}]   ;;  %s5107_s2 = inlined_call_operand.vmem [shape: bf16[8,128], index: 2, kind: input, shape index: {}]   ;;  %s5108_s3 = inlined_call_operand.vmem [shape: bf16[640,256], index: 3, kind: input, shape index: {}]   ;;  %s5109_s4 = inlined_call_operand.vmem [shape: bf16[768,128], index: 4, kind: input, shape index: {}]   ;;  %s5110_s5 = inlined_call_operand.vmem [shape: f32[12,256], index: 5, kind: input, shape index: {}]   ;;  %s5111_s6 = inlined_call_operand.vmem [shape: bf16[128,128], index: 6, kind: input, shape index: {}]   ;;  %s5112_s7 = inlined_call_operand.vmem [shape: bf16[256,3], index: 7, kind: input, shape index: {}]   ;;  %s5113_s8 = inlined_call_operand.hbm [shape: f32[2,3], index: 8, kind: output, shape index: {}]  }
   0x1   :  { %v37_v0 = vld [vmem:[%s5108_s3] sm:$0xff]  ;;  %v39_v1 = vld [vmem:[%s5108_s3 + $0x8] sm:$0xff]  ;;  %v41_v2 = vld [vmem:[%s5108_s3 + $0x10] sm:$0xff] }
   0x2   :  { %38 = vst [vmem:[#allocation3] sm:$0xff] %v37_v0  ;;  %v43_v3 = vld [vmem:[%s5108_s3 + $0x18] sm:$0xff]  ;;  %v45_v4 = vld [vmem:[%s5108_s3 + $0x20] sm:$0xff]  ;;  %v47_v5 = vld [vmem:[%s5108_s3 + $0x28] sm:$0xff] }
   0x3   :  { %40 = vst [vmem:[#allocation3 + $0x8] sm:$0xff] %v39_v1  ;;  %v49_v6 = vld [vmem:[%s5108_s3 + $0x30] sm:$0xff]  ;;  %v51_v7 = vld [vmem:[%s5108_s3 + $0x38] sm:$0xff]  ;;  %v53_v8 = vld [vmem:[%s5108_s3 + $0x40] sm:$0xff] }
   0x4   :  { %42 = vst [vmem:[#allocation3 + $0x10] sm:$0xff] %v41_v2  ;;  %v55_v9 = vld [vmem:[%s5108_s3 + $0x48] sm:$0xff]  ;;  %v57_v10 = vld [vmem:[%s5108_s3 + $0x50] sm:$0xff]  ;;  %v59_v11 = vld [vmem:[%s5108_s3 + $0x58] sm:$0xff] }
   0x5   :  { %44 = vst [vmem:[#allocation3 + $0x18] sm:$0xff] %v43_v3  ;;  %v61_v12 = vld [vmem:[%s5108_s3 + $0x60] sm:$0xff]  ;;  %v63_v13 = vld [vmem:[%s5108_s3 + $0x68] sm:$0xff]  ;;  %v65_v14 = vld [vmem:[%s5108_s3 + $0x70] sm:$0xff] }
   0x6   :  { %46 = vst [vmem:[#allocation3 + $0x20] sm:$0xff] %v45_v4  ;;  %v67_v15 = vld [vmem:[%s5108_s3 + $0x78] sm:$0xff]  ;;  %v69_v16 = vld [vmem:[%s5108_s3 + $0x80] sm:$0xff]  ;;  %v71_v17 = vld [vmem:[%s5108_s3 + $0x88] sm:$0xff] }
   0x7   :  { %48 = vst [vmem:[#allocation3 + $0x28] sm:$0xff] %v47_v5  ;;  %v73_v18 = vld [vmem:[%s5108_s3 + $0x90] sm:$0xff]  ;;  %v75_v19 = vld [vmem:[%s5108_s3 + $0x98] sm:$0xff]  ;;  %v77_v20 = vld [vmem:[%s5108_s3 + $0xa0] sm:$0xff] }
   0x8   :  { %50 = vst [vmem:[#allocation3 + $0x30] sm:$0xff] %v49_v6  ;;  %v79_v21 = vld [vmem:[%s5108_s3 + $0xa8] sm:$0xff]  ;;  %v81_v22 = vld [vmem:[%s5108_s3 + $0xb0] sm:$0xff]  ;;  %v83_v23 = vld [vmem:[%s5108_s3 + $0xb8] sm:$0xff] }
   0x9   :  { %52 = vst [vmem:[#allocation3 + $0x38] sm:$0xff] %v51_v7  ;;  %v85_v24 = vld [vmem:[%s5108_s3 + $0xc0] sm:$0xff]  ;;  %v87_v25 = vld [vmem:[%s5108_s3 + $0xc8] sm:$0xff]  ;;  %v89_v26 = vld [vmem:[%s5108_s3 + $0xd0] sm:$0xff] }
   0xa   :  { %54 = vst [vmem:[#allocation3 + $0x40] sm:$0xff] %v53_v8  ;;  %v91_v27 = vld [vmem:[%s5108_s3 + $0xd8] sm:$0xff]  ;;  %v93_v28 = vld [vmem:[%s5108_s3 + $0xe0] sm:$0xff]  ;;  %v95_v29 = vld [vmem:[%s5108_s3 + $0xe8] sm:$0xff] }
   0xb   :  { %56 = vst [vmem:[#allocation3 + $0x48] sm:$0xff] %v55_v9  ;;  %v97_v30 = vld [vmem:[%s5108_s3 + $0xf0] sm:$0xff]  ;;  %v99_v31 = vld [vmem:[%s5108_s3 + $0xf8] sm:$0xff]  ;;  %v101_v32 = vld [vmem:[%s5108_s3 + $0x100] sm:$0xff] }
   0xc   :  { %58 = vst [vmem:[#allocation3 + $0x50] sm:$0xff] %v57_v10  ;;  %v103_v33 = vld [vmem:[%s5108_s3 + $0x108] sm:$0xff]  ;;  %v105_v34 = vld [vmem:[%s5108_s3 + $0x110] sm:$0xff]  ;;  %v107_v35 = vld [vmem:[%s5108_s3 + $0x118] sm:$0xff] }
   0xd   :  { %60 = vst [vmem:[#allocation3 + $0x58] sm:$0xff] %v59_v11  ;;  %v109_v36 = vld [vmem:[%s5108_s3 + $0x120] sm:$0xff]  ;;  %v111_v37 = vld [vmem:[%s5108_s3 + $0x128] sm:$0xff]  ;;  %v113_v38 = vld [vmem:[%s5108_s3 + $0x130] sm:$0xff] }
   0xe   :  { %62 = vst [vmem:[#allocation3 + $0x60] sm:$0xff] %v61_v12  ;;  %v115_v39 = vld [vmem:[%s5108_s3 + $0x138] sm:$0xff]  ;;  %v117_v40 = vld [vmem:[%s5108_s3 + $0x140] sm:$0xff]  ;;  %v119_v41 = vld [vmem:[%s5108_s3 + $0x148] sm:$0xff] }
   0xf   :  { %64 = vst [vmem:[#allocation3 + $0x68] sm:$0xff] %v63_v13  ;;  %v121_v42 = vld [vmem:[%s5108_s3 + $0x150] sm:$0xff]  ;;  %v123_v43 = vld [vmem:[%s5108_s3 + $0x158] sm:$0xff]  ;;  %v125_v44 = vld [vmem:[%s5108_s3 + $0x160] sm:$0xff] }
  0x10   :  { %66 = vst [vmem:[#allocation3 + $0x70] sm:$0xff] %v65_v14  ;;  %v127_v45 = vld [vmem:[%s5108_s3 + $0x168] sm:$0xff]  ;;  %v129_v46 = vld [vmem:[%s5108_s3 + $0x170] sm:$0xff]  ;;  %v131_v47 = vld [vmem:[%s5108_s3 + $0x178] sm:$0xff] }
  0x11   :  { %68 = vst [vmem:[#allocation3 + $0x78] sm:$0xff] %v67_v15  ;;  %v133_v48 = vld [vmem:[%s5108_s3 + $0x180] sm:$0xff]  ;;  %v135_v49 = vld [vmem:[%s5108_s3 + $0x188] sm:$0xff]  ;;  %v137_v50 = vld [vmem:[%s5108_s3 + $0x190] sm:$0xff] }
  0x12   :  { %70 = vst [vmem:[#allocation3 + $0x80] sm:$0xff] %v69_v16  ;;  %v139_v51 = vld [vmem:[%s5108_s3 + $0x198] sm:$0xff]  ;;  %v141_v52 = vld [vmem:[%s5108_s3 + $0x1a0] sm:$0xff]  ;;  %v143_v53 = vld [vmem:[%s5108_s3 + $0x1a8] sm:$0xff] }
  0x13   :  { %72 = vst [vmem:[#allocation3 + $0x88] sm:$0xff] %v71_v17  ;;  %v145_v54 = vld [vmem:[%s5108_s3 + $0x1b0] sm:$0xff]  ;;  %v147_v55 = vld [vmem:[%s5108_s3 + $0x1b8] sm:$0xff]  ;;  %v149_v56 = vld [vmem:[%s5108_s3 + $0x1c0] sm:$0xff] }
  0x14   :  { %74 = vst [vmem:[#allocation3 + $0x90] sm:$0xff] %v73_v18  ;;  %v151_v57 = vld [vmem:[%s5108_s3 + $0x1c8] sm:$0xff]  ;;  %v153_v58 = vld [vmem:[%s5108_s3 + $0x1d0] sm:$0xff]  ;;  %v155_v59 = vld [vmem:[%s5108_s3 + $0x1d8] sm:$0xff] }
  0x15   :  { %76 = vst [vmem:[#allocation3 + $0x98] sm:$0xff] %v75_v19  ;;  %v157_v60 = vld [vmem:[%s5108_s3 + $0x1e0] sm:$0xff]  ;;  %v159_v61 = vld [vmem:[%s5108_s3 + $0x1e8] sm:$0xff]  ;;  %v161_v62 = vld [vmem:[%s5108_s3 + $0x1f0] sm:$0xff] }
  0x16   :  { %78 = vst [vmem:[#allocation3 + $0xa0] sm:$0xff] %v77_v20  ;;  %v163_v63 = vld [vmem:[%s5108_s3 + $0x1f8] sm:$0xff]  ;;  %v165_v0 = vld [vmem:[%s5108_s3 + $0x200] sm:$0xff]  ;;  %v167_v1 = vld [vmem:[%s5108_s3 + $0x208] sm:$0xff] }
  0x17   :  { %80 = vst [vmem:[#allocation3 + $0xa8] sm:$0xff] %v79_v21  ;;  %v169_v2 = vld [vmem:[%s5108_s3 + $0x210] sm:$0xff]  ;;  %v171_v3 = vld [vmem:[%s5108_s3 + $0x218] sm:$0xff]  ;;  %v173_v4 = vld [vmem:[%s5108_s3 + $0x220] sm:$0xff] }
  0x18   :  { %82 = vst [vmem:[#allocation3 + $0xb0] sm:$0xff] %v81_v22  ;;  %v175_v5 = vld [vmem:[%s5108_s3 + $0x228] sm:$0xff]  ;;  %v177_v6 = vld [vmem:[%s5108_s3 + $0x230] sm:$0xff]  ;;  %v179_v7 = vld [vmem:[%s5108_s3 + $0x238] sm:$0xff] }
  0x19   :  { %84 = vst [vmem:[#allocation3 + $0xb8] sm:$0xff] %v83_v23  ;;  %v181_v8 = vld [vmem:[%s5108_s3 + $0x240] sm:$0xff]  ;;  %v183_v9 = vld [vmem:[%s5108_s3 + $0x248] sm:$0xff]  ;;  %v185_v10 = vld [vmem:[%s5108_s3 + $0x250] sm:$0xff] }
  0x1a   :  { %86 = vst [vmem:[#allocation3 + $0xc0] sm:$0xff] %v85_v24  ;;  %v187_v11 = vld [vmem:[%s5108_s3 + $0x258] sm:$0xff]  ;;  %v189_v12 = vld [vmem:[%s5108_s3 + $0x260] sm:$0xff]  ;;  %v191_v13 = vld [vmem:[%s5108_s3 + $0x268] sm:$0xff] }
  0x1b   :  { %88 = vst [vmem:[#allocation3 + $0xc8] sm:$0xff] %v87_v25  ;;  %v193_v14 = vld [vmem:[%s5108_s3 + $0x270] sm:$0xff]  ;;  %v195_v15 = vld [vmem:[%s5108_s3 + $0x278] sm:$0xff] }
  0x1c   :  { %90 = vst [vmem:[#allocation3 + $0xd0] sm:$0xff] %v89_v26 }
  0x1d   :  { %92 = vst [vmem:[#allocation3 + $0xd8] sm:$0xff] %v91_v27 }
  0x1e   :  { %94 = vst [vmem:[#allocation3 + $0xe0] sm:$0xff] %v93_v28 }
  0x1f   :  { %96 = vst [vmem:[#allocation3 + $0xe8] sm:$0xff] %v95_v29 }
  0x20   :  { %98 = vst [vmem:[#allocation3 + $0xf0] sm:$0xff] %v97_v30 }
  0x21   :  { %100 = vst [vmem:[#allocation3 + $0xf8] sm:$0xff] %v99_v31 }
  0x22   :  { %102 = vst [vmem:[#allocation3 + $0x100] sm:$0xff] %v101_v32 }
  0x23   :  { %104 = vst [vmem:[#allocation3 + $0x108] sm:$0xff] %v103_v33 }
  0x24   :  { %106 = vst [vmem:[#allocation3 + $0x110] sm:$0xff] %v105_v34 }
  0x25   :  { %108 = vst [vmem:[#allocation3 + $0x118] sm:$0xff] %v107_v35 }
  0x26   :  { %110 = vst [vmem:[#allocation3 + $0x120] sm:$0xff] %v109_v36 }
  0x27   :  { %112 = vst [vmem:[#allocation3 + $0x128] sm:$0xff] %v111_v37 }
  0x28   :  { %114 = vst [vmem:[#allocation3 + $0x130] sm:$0xff] %v113_v38 }
  0x29   :  { %116 = vst [vmem:[#allocation3 + $0x138] sm:$0xff] %v115_v39 }
  0x2a   :  { %118 = vst [vmem:[#allocation3 + $0x140] sm:$0xff] %v117_v40 }
  0x2b   :  { %120 = vst [vmem:[#allocation3 + $0x148] sm:$0xff] %v119_v41 }
  0x2c   :  { %122 = vst [vmem:[#allocation3 + $0x150] sm:$0xff] %v121_v42 }
  0x2d   :  { %124 = vst [vmem:[#allocation3 + $0x158] sm:$0xff] %v123_v43 }
  0x2e   :  { %126 = vst [vmem:[#allocation3 + $0x160] sm:$0xff] %v125_v44 }
  0x2f   :  { %128 = vst [vmem:[#allocation3 + $0x168] sm:$0xff] %v127_v45 }
  0x30   :  { %130 = vst [vmem:[#allocation3 + $0x170] sm:$0xff] %v129_v46 }
  0x31   :  { %132 = vst [vmem:[#allocation3 + $0x178] sm:$0xff] %v131_v47 }
  0x32   :  { %134 = vst [vmem:[#allocation3 + $0x180] sm:$0xff] %v133_v48 }
  0x33   :  { %136 = vst [vmem:[#allocation3 + $0x188] sm:$0xff] %v135_v49 }
  0x34   :  { %138 = vst [vmem:[#allocation3 + $0x190] sm:$0xff] %v137_v50 }
  0x35   :  { %140 = vst [vmem:[#allocation3 + $0x198] sm:$0xff] %v139_v51 }
  0x36   :  { %142 = vst [vmem:[#allocation3 + $0x1a0] sm:$0xff] %v141_v52 }
  0x37   :  { %144 = vst [vmem:[#allocation3 + $0x1a8] sm:$0xff] %v143_v53 }
  0x38   :  { %146 = vst [vmem:[#allocation3 + $0x1b0] sm:$0xff] %v145_v54 }
  0x39   :  { %148 = vst [vmem:[#allocation3 + $0x1b8] sm:$0xff] %v147_v55 }
  0x3a   :  { %150 = vst [vmem:[#allocation3 + $0x1c0] sm:$0xff] %v149_v56 }
  0x3b   :  { %152 = vst [vmem:[#allocation3 + $0x1c8] sm:$0xff] %v151_v57 }
  0x3c   :  { %154 = vst [vmem:[#allocation3 + $0x1d0] sm:$0xff] %v153_v58 }
  0x3d   :  { %156 = vst [vmem:[#allocation3 + $0x1d8] sm:$0xff] %v155_v59 }
  0x3e   :  { %158 = vst [vmem:[#allocation3 + $0x1e0] sm:$0xff] %v157_v60 }
  0x3f   :  { %160 = vst [vmem:[#allocation3 + $0x1e8] sm:$0xff] %v159_v61 }
  0x40   :  { %162 = vst [vmem:[#allocation3 + $0x1f0] sm:$0xff] %v161_v62 }
  0x41   :  { %164 = vst [vmem:[#allocation3 + $0x1f8] sm:$0xff] %v163_v63 }
  0x42   :  { %166 = vst [vmem:[#allocation3 + $0x200] sm:$0xff] %v165_v0 }
  0x43   :  { %168 = vst [vmem:[#allocation3 + $0x208] sm:$0xff] %v167_v1 }
  0x44   :  { %170 = vst [vmem:[#allocation3 + $0x210] sm:$0xff] %v169_v2 }
  0x45   :  { %172 = vst [vmem:[#allocation3 + $0x218] sm:$0xff] %v171_v3 }
  0x46   :  { %174 = vst [vmem:[#allocation3 + $0x220] sm:$0xff] %v173_v4 }
  0x47   :  { %176 = vst [vmem:[#allocation3 + $0x228] sm:$0xff] %v175_v5 }
  0x48   :  { %178 = vst [vmem:[#allocation3 + $0x230] sm:$0xff] %v177_v6 }
  0x49   :  { %180 = vst [vmem:[#allocation3 + $0x238] sm:$0xff] %v179_v7 }
  0x4a   :  { %182 = vst [vmem:[#allocation3 + $0x240] sm:$0xff] %v181_v8 }
  0x4b   :  { %184 = vst [vmem:[#allocation3 + $0x248] sm:$0xff] %v183_v9 }
  0x4c   :  { %186 = vst [vmem:[#allocation3 + $0x250] sm:$0xff] %v185_v10 }
  0x4d   :  { %188 = vst [vmem:[#allocation3 + $0x258] sm:$0xff] %v187_v11 }
  0x4e   :  { %190 = vst [vmem:[#allocation3 + $0x260] sm:$0xff] %v189_v12 }
  0x4f   :  { %192 = vst [vmem:[#allocation3 + $0x268] sm:$0xff] %v191_v13 }
  0x50   :  { %194 = vst [vmem:[#allocation3 + $0x270] sm:$0xff] %v193_v14 }
  0x51   :  { %196 = vst [vmem:[#allocation3 + $0x278] sm:$0xff] %v195_v15 }
  0x52   :  { %202 = vsyncadd [#allocation5], 10240  ;;  %v214_v16 = vld [vmem:[%s5109_s4] sm:$0xff]  ;;  %v216_v17 = vld [vmem:[%s5109_s4 + $0x8] sm:$0xff] }
  0x53   :  { %215 = vst [vmem:[#allocation4 + $0xb0] sm:$0xff] %v214_v16  ;;  %v218_v18 = vld [vmem:[%s5109_s4 + $0x10] sm:$0xff]  ;;  %v220_v19 = vld [vmem:[%s5109_s4 + $0x18] sm:$0xff]  ;;  %v222_v20 = vld [vmem:[%s5109_s4 + $0x20] sm:$0xff] }
  0x54   :  { %217 = vst [vmem:[#allocation4 + $0xd0] sm:$0xff] %v216_v17  ;;  %v224_v21 = vld [vmem:[%s5109_s4 + $0x28] sm:$0xff]  ;;  %v226_v22 = vld [vmem:[%s5109_s4 + $0x30] sm:$0xff]  ;;  %v228_v23 = vld [vmem:[%s5109_s4 + $0x38] sm:$0xff] }
  0x55   :  { %219 = vst [vmem:[#allocation4 + $0x10] sm:$0xff] %v218_v18  ;;  %v230_v24 = vld [vmem:[%s5109_s4 + $0x40] sm:$0xff]  ;;  %v232_v25 = vld [vmem:[%s5109_s4 + $0x48] sm:$0xff]  ;;  %v234_v26 = vld [vmem:[%s5109_s4 + $0x50] sm:$0xff] }
  0x56   :  { %221 = vst [vmem:[#allocation4 + $0x48] sm:$0xff] %v220_v19  ;;  %v236_v27 = vld [vmem:[%s5109_s4 + $0x58] sm:$0xff]  ;;  %v238_v28 = vld [vmem:[%s5109_s4 + $0x60] sm:$0xff]  ;;  %v240_v29 = vld [vmem:[%s5109_s4 + $0x68] sm:$0xff] }
  0x57   :  { %223 = vst [vmem:[#allocation4 + $0x160] sm:$0xff] %v222_v20  ;;  %v242_v30 = vld [vmem:[%s5109_s4 + $0x70] sm:$0xff]  ;;  %v244_v31 = vld [vmem:[%s5109_s4 + $0x78] sm:$0xff]  ;;  %v246_v32 = vld [vmem:[%s5109_s4 + $0x80] sm:$0xff] }
  0x58   :  { %225 = vst [vmem:[#allocation4 + $0x128] sm:$0xff] %v224_v21  ;;  %v248_v33 = vld [vmem:[%s5109_s4 + $0x88] sm:$0xff]  ;;  %v250_v34 = vld [vmem:[%s5109_s4 + $0x90] sm:$0xff]  ;;  %v252_v35 = vld [vmem:[%s5109_s4 + $0x98] sm:$0xff] }
  0x59   :  { %227 = vst [vmem:[#allocation4 + $0x40] sm:$0xff] %v226_v22  ;;  %v254_v36 = vld [vmem:[%s5109_s4 + $0xa0] sm:$0xff]  ;;  %v256_v37 = vld [vmem:[%s5109_s4 + $0xa8] sm:$0xff]  ;;  %v258_v38 = vld [vmem:[%s5109_s4 + $0xb0] sm:$0xff] }
  0x5a   :  { %229 = vst [vmem:[#allocation4 + $0x178] sm:$0xff] %v228_v23  ;;  %v260_v39 = vld [vmem:[%s5109_s4 + $0xb8] sm:$0xff]  ;;  %v262_v40 = vld [vmem:[%s5109_s4 + $0xc0] sm:$0xff]  ;;  %v264_v41 = vld [vmem:[%s5109_s4 + $0xc8] sm:$0xff] }
  0x5b   :  { %231 = vst [vmem:[#allocation4 + $0x108] sm:$0xff] %v230_v24  ;;  %v266_v42 = vld [vmem:[%s5109_s4 + $0xd0] sm:$0xff]  ;;  %v268_v43 = vld [vmem:[%s5109_s4 + $0xd8] sm:$0xff]  ;;  %v270_v44 = vld [vmem:[%s5109_s4 + $0xe0] sm:$0xff] }
  0x5c   :  { %233 = vst [vmem:[#allocation4 + $0x110] sm:$0xff] %v232_v25  ;;  %v272_v45 = vld [vmem:[%s5109_s4 + $0xe8] sm:$0xff]  ;;  %v274_v46 = vld [vmem:[%s5109_s4 + $0xf0] sm:$0xff]  ;;  %v276_v47 = vld [vmem:[%s5109_s4 + $0xf8] sm:$0xff] }
  0x5d   :  { %235 = vst [vmem:[#allocation4 + $0x90] sm:$0xff] %v234_v26  ;;  %v278_v48 = vld [vmem:[%s5109_s4 + $0x100] sm:$0xff]  ;;  %v280_v49 = vld [vmem:[%s5109_s4 + $0x108] sm:$0xff]  ;;  %v282_v50 = vld [vmem:[%s5109_s4 + $0x110] sm:$0xff] }
  0x5e   :  { %237 = vst [vmem:[#allocation4 + $0x118] sm:$0xff] %v236_v27  ;;  %v284_v51 = vld [vmem:[%s5109_s4 + $0x118] sm:$0xff]  ;;  %v286_v52 = vld [vmem:[%s5109_s4 + $0x120] sm:$0xff]  ;;  %v288_v53 = vld [vmem:[%s5109_s4 + $0x128] sm:$0xff] }
  0x5f   :  { %239 = vst [vmem:[#allocation4 + $0x148] sm:$0xff] %v238_v28  ;;  %v290_v54 = vld [vmem:[%s5109_s4 + $0x130] sm:$0xff]  ;;  %v292_v55 = vld [vmem:[%s5109_s4 + $0x138] sm:$0xff]  ;;  %v294_v56 = vld [vmem:[%s5109_s4 + $0x140] sm:$0xff] }
  0x60   :  { %241 = vst [vmem:[#allocation4 + $0x100] sm:$0xff] %v240_v29  ;;  %v296_v57 = vld [vmem:[%s5109_s4 + $0x148] sm:$0xff]  ;;  %v298_v58 = vld [vmem:[%s5109_s4 + $0x150] sm:$0xff]  ;;  %v300_v59 = vld [vmem:[%s5109_s4 + $0x158] sm:$0xff] }
  0x61   :  { %243 = vst [vmem:[#allocation4 + $0x58] sm:$0xff] %v242_v30  ;;  %v302_v60 = vld [vmem:[%s5109_s4 + $0x160] sm:$0xff]  ;;  %v304_v61 = vld [vmem:[%s5109_s4 + $0x168] sm:$0xff]  ;;  %v306_v62 = vld [vmem:[%s5109_s4 + $0x170] sm:$0xff] }
  0x62   :  { %245 = vst [vmem:[#allocation4 + $0xd8] sm:$0xff] %v244_v31  ;;  %v308_v63 = vld [vmem:[%s5109_s4 + $0x178] sm:$0xff] }
  0x63   :  { %247 = vst [vmem:[#allocation4 + $0x80] sm:$0xff] %v246_v32 }
  0x64   :  { %249 = vst [vmem:[#allocation4 + $0x130] sm:$0xff] %v248_v33 }
  0x65   :  { %251 = vst [vmem:[#allocation4 + $0x138] sm:$0xff] %v250_v34 }
  0x66   :  { %253 = vst [vmem:[#allocation4 + $0x120] sm:$0xff] %v252_v35 }
  0x67   :  { %255 = vst [vmem:[#allocation4 + $0xe0] sm:$0xff] %v254_v36 }
  0x68   :  { %257 = vst [vmem:[#allocation4 + $0xa8] sm:$0xff] %v256_v37 }
  0x69   :  { %259 = vst [vmem:[#allocation4 + $0xb8] sm:$0xff] %v258_v38 }
  0x6a   :  { %261 = vst [vmem:[#allocation4 + $0x168] sm:$0xff] %v260_v39 }
  0x6b   :  { %263 = vst [vmem:[#allocation4 + $0xe8] sm:$0xff] %v262_v40 }
  0x6c   :  { %265 = vst [vmem:[#allocation4 + $0xf8] sm:$0xff] %v264_v41 }
  0x6d   :  { %267 = vst [vmem:[#allocation4 + $0x20] sm:$0xff] %v266_v42 }
  0x6e   :  { %269 = vst [vmem:[#allocation4 + $0x88] sm:$0xff] %v268_v43 }
  0x6f   :  { %271 = vst [vmem:[#allocation4 + $0xa0] sm:$0xff] %v270_v44 }
  0x70   :  { %273 = vst [vmem:[#allocation4 + $0x170] sm:$0xff] %v272_v45 }
  0x71   :  { %275 = vst [vmem:[#allocation4 + $0xf0] sm:$0xff] %v274_v46 }
  0x72   :  { %277 = vst [vmem:[#allocation4 + $0x140] sm:$0xff] %v276_v47 }
  0x73   :  { %279 = vst [vmem:[#allocation4 + $0x60] sm:$0xff] %v278_v48 }
  0x74   :  { %281 = vst [vmem:[#allocation4 + $0xc8] sm:$0xff] %v280_v49 }
  0x75   :  { %283 = vst [vmem:[#allocation4 + $0x28] sm:$0xff] %v282_v50 }
  0x76   :  { %285 = vst [vmem:[#allocation4 + $0x38] sm:$0xff] %v284_v51 }
  0x77   :  { %287 = vst [vmem:[#allocation4 + $0xc0] sm:$0xff] %v286_v52 }
  0x78   :  { %289 = vst [vmem:[#allocation4 + $0x18] sm:$0xff] %v288_v53 }
  0x79   :  { %291 = vst [vmem:[#allocation4 + $0x98] sm:$0xff] %v290_v54 }
  0x7a   :  { %293 = vst [vmem:[#allocation4 + $0x8] sm:$0xff] %v292_v55 }
  0x7b   :  { %295 = vst [vmem:[#allocation4] sm:$0xff] %v294_v56 }
  0x7c   :  { %297 = vst [vmem:[#allocation4 + $0x78] sm:$0xff] %v296_v57 }
  0x7d   :  { %299 = vst [vmem:[#allocation4 + $0x50] sm:$0xff] %v298_v58 }
  0x7e   :  { %301 = vst [vmem:[#allocation4 + $0x68] sm:$0xff] %v300_v59 }
  0x7f   :  { %303 = vst [vmem:[#allocation4 + $0x70] sm:$0xff] %v302_v60 }
  0x80   :  { %305 = vst [vmem:[#allocation4 + $0x30] sm:$0xff] %v304_v61 }
  0x81   :  { %307 = vst [vmem:[#allocation4 + $0x158] sm:$0xff] %v306_v62 }
  0x82   :  { %309 = vst [vmem:[#allocation4 + $0x150] sm:$0xff] %v308_v63 }
  0x83   :  { %315 = vsyncadd [#allocation5 + $0x1], 6144  ;;  %v4310_v0 = vld [vmem:[%s5110_s5 + $0x8] sm:$0xff]  ;;  %v323_v1 = vld [vmem:[%s5107_s2] sm:$0xf]  ;;  %vm334_vm0 = vcmask 1043456   ;;  %v420_v2 = vlaneseq }
  0x84   :  { %v336_v3 = vsel %vm334_vm0, %v323_v1, 0  ;;  %v319_v4 = vld [vmem:[%s5105_s0] sm:$0xff]  ;;  %v320_v5 = vld [vmem:[%s5105_s0 + $0x8] sm:$0xff]  ;;  %vm327_vm1 = vcmask 64512   ;;  %v321_v12 = vld [vmem:[%s5105_s0 + $0x10] sm:$0xff] }
  0x85   :  { %345 = vmatpush.bf16.msra.mxu0 %v336_v3  ;;  %v421_v6 = vshrl.u32 %v420_v2, 7  ;;  %v324_v7 = vpack.c.bf16 %v320_v5, %v319_v4  ;;  %v417_v8 = vld [vmem:[%s5106_s1] sm:$0xff]  ;;  %v322_v13 = vld [vmem:[%s5105_s0 + $0x18] sm:$0xff]  ;;  %v418_v20 = vld [vmem:[%s5106_s1 + $0x8] sm:$0xff] }
  0x86   :  { %v419_v9 = vperm.slane %v417_v8, 0  ;;  %v433_v10 = vperm.slane %v417_v8, 2  ;;  %v447_v11 = vperm.slane %v417_v8, 4  ;;  %v426_v14 = vperm.slane %v417_v8, 1  ;;  %v4340_v29 = vld [vmem:[%s5110_s5 + $0x10] sm:$0xf] }
  0x87   :  { %3760 = vset.pattern.permute.xlu0 %v421_v6  ;;  %3761 = vset.pattern.permute.xlu1 %v421_v6  ;;  %v440_v15 = vperm.slane %v417_v8, 3  ;;  %v325_v16 = vpack.c.bf16 %v322_v13, %v321_v12  ;;  %v454_v17 = vperm.slane %v417_v8, 5  ;;  %v461_v18 = vperm.slane %v417_v8, 6  ;;  %v4369_v61 = vld [vmem:[%s5110_s5] sm:$0xff] }
  0x88   :  { %2956 = vmatmul.msk.bf16.vlgmr.msra.gmra.mxu0 %vm327_vm1, %v324_v7  ;;  %3762 = vset.pattern.permute.xlu2 %v421_v6  ;;  %v468_v19 = vperm.slane %v417_v8, 7  ;;  %v475_v21 = vperm.slane %v418_v20, 0  ;;  %v482_v22 = vperm.slane %v418_v20, 1  ;;  %v489_v23 = vperm.slane %v418_v20, 2 }
  0x89   :  { %v496_v24 = vperm.slane %v418_v20, 3  ;;  %v503_v25 = vperm.slane %v418_v20, 4  ;;  %v510_v26 = vperm.slane %v418_v20, 5  ;;  %v517_v27 = vperm.slane %v418_v20, 6 }
  0x8a   :  { %v524_v28 = vperm.slane %v418_v20, 7  ;;  %v4343_v31 = vperm.slane %v4340_v29, 2  ;;  %v4346_v32 = vperm.slane %v4340_v29, 1  ;;  %v326_v4 = vperm.slane %v4369_v61, 0 }
  0x8f   :  { %424 = vperm.xlu0 %3760, %v419_v9   ;;  %438 = vperm.xlu1 %3761, %v433_v10  }
  0x90   :  { %452 = vperm.xlu2 %3762, %v447_v11  }
  0x97   :  { %431 = vperm.xlu0 %3760, %v426_v14   ;;  %445 = vperm.xlu1 %3761, %v440_v15  }
  0x98   :  { %2957 = vmatmul.msk.bf16.gmra.mxu0 %vm327_vm1, %v325_v16  ;;  %459 = vperm.xlu2 %3762, %v454_v17  }
  0x9f   :  { %466 = vperm.xlu0 %3760, %v461_v18   ;;  %473 = vperm.xlu1 %3761, %v468_v19  }
  0xa0   :  { %480 = vperm.xlu2 %3762, %v475_v21  }
  0xa7   :  { %487 = vperm.xlu0 %3760, %v482_v22   ;;  %494 = vperm.xlu1 %3761, %v489_v23  }
  0xa8   :  { %501 = vperm.xlu2 %3762, %v496_v24  }
  0xaf   :  { %508 = vperm.xlu0 %3760, %v503_v25   ;;  %515 = vperm.xlu1 %3761, %v510_v26  }
  0xb0   :  { %522 = vperm.xlu2 %3762, %v517_v27  }
  0xb7   :  { %529 = vperm.xlu0 %3760, %v524_v28  }
  0xea   :  { %v453_v30 = vpop.permute.xlu2 %452 }
  0xeb   :  { %v536_v33 = vmul.f32 %v4343_v31, %v453_v30 }
  0xed   :  { %v553_v34 = vadd.f32 %v4346_v32, %v536_v33 }
  0xef   :  { %569 = vst [vmem:[#allocation2 + $0x8] sm:$0x3] %v553_v34 }
  0xf2   :  { %v460_v35 = vpop.permute.xlu2 %459 }
  0xf3   :  { %v537_v36 = vmul.f32 %v4343_v31, %v460_v35 }
  0xf5   :  { %v554_v37 = vadd.f32 %v4346_v32, %v537_v36 }
  0xf7   :  { %570 = vst [vmem:[#allocation2 + $0xa] sm:$0x3] %v554_v37 }
  0xfa   :  { %v481_v38 = vpop.permute.xlu2 %480 }
  0xfb   :  { %v540_v39 = vmul.f32 %v4343_v31, %v481_v38 }
  0xfd   :  { %v557_v40 = vadd.f32 %v4346_v32, %v540_v39 }
  0xff   :  { %573 = vst [vmem:[#allocation2 + $0x10] sm:$0x3] %v557_v40 }
 0x101   :  { %v425_v41 = vpop.permute.xlu0 %424  ;;  %v439_v42 = vpop.permute.xlu1 %438 }
 0x102   :  { %v532_v43 = vmul.f32 %v4343_v31, %v425_v41  ;;  %v534_v44 = vmul.f32 %v4343_v31, %v439_v42  ;;  %v502_v47 = vpop.permute.xlu2 %501 }
 0x103   :  { %v543_v57 = vmul.f32 %v4343_v31, %v502_v47 }
 0x104   :  { %v549_v45 = vadd.f32 %v4346_v32, %v532_v43  ;;  %v551_v46 = vadd.f32 %v4346_v32, %v534_v44 }
 0x105   :  { %v347_v48 = vpop.f32.mrf.mxu0  ;;  %v560_v59 = vadd.f32 %v4346_v32, %v543_v57 }
 0x106   :  { %565 = vst [vmem:[#allocation2] sm:$0x3] %v549_v45  ;;  %v4378_v9 = vadd.f32 %v347_v48, %v326_v4 }
 0x107   :  { %567 = vst [vmem:[#allocation2 + $0x4] sm:$0x3] %v551_v46 }
 0x108   :  { %576 = vst [vmem:[#allocation2 + $0x16] sm:$0x3] %v560_v59  ;;  %v367_v16 = vmul.f32 %v4378_v9, %v4378_v9 }
 0x109   :  { %v432_v49 = vpop.permute.xlu0 %431  ;;  %v446_v50 = vpop.permute.xlu1 %445 }
 0x10a   :  { %v533_v51 = vmul.f32 %v4343_v31, %v432_v49  ;;  %v535_v52 = vmul.f32 %v4343_v31, %v446_v50  ;;  %v523_v55 = vpop.permute.xlu2 %522 }
 0x10b   :  { %v546_v58 = vmul.f32 %v4343_v31, %v523_v55 }
 0x10c   :  { %v550_v53 = vadd.f32 %v4346_v32, %v533_v51  ;;  %v552_v54 = vadd.f32 %v4346_v32, %v535_v52 }
 0x10d   :  { %v349_v56 = vpop.f32.mrf.mxu0  ;;  %v563_v60 = vadd.f32 %v4346_v32, %v546_v58 }
 0x10e   :  { %566 = vst [vmem:[#allocation2 + $0x2] sm:$0x3] %v550_v53  ;;  %v4376_v8 = vadd.f32 %v349_v56, %v326_v4 }
 0x10f   :  { %568 = vst [vmem:[#allocation2 + $0x6] sm:$0x3] %v552_v54 }
 0x110   :  { %579 = vst [vmem:[#allocation2 + $0x1c] sm:$0x3] %v563_v60  ;;  %v368_v13 = vmul.f32 %v4376_v8, %v4376_v8  ;;  %v357_v17 = vadd.f32 %v4376_v8, %v4378_v9 }
 0x111   :  { %v467_v62 = vpop.permute.xlu0 %466  ;;  %v474_v63 = vpop.permute.xlu1 %473 }
 0x112   :  { %v538_v1 = vmul.f32 %v4343_v31, %v467_v62  ;;  %v539_v3 = vmul.f32 %v4343_v31, %v474_v63  ;;  %v371_v22 = vadd.f32 %v368_v13, %v367_v16 }
 0x114   :  { %v555_v5 = vadd.f32 %v4346_v32, %v538_v1  ;;  %v556_v6 = vadd.f32 %v4346_v32, %v539_v3 }
 0x115   :  { %v352_v7 = vpop.f32.mrf.mxu0 }
 0x116   :  { %571 = vst [vmem:[#allocation2 + $0xc] sm:$0x3] %v555_v5  ;;  %v4380_v10 = vadd.f32 %v352_v7, %v326_v4  ;;  %v408_v7 = vperm.slane %v4369_v61, 2 }
 0x117   :  { %572 = vst [vmem:[#allocation2 + $0xe] sm:$0x3] %v556_v6 }
 0x118   :  { %v369_v18 = vmul.f32 %v4380_v10, %v4380_v10  ;;  %v358_v23 = vadd.f32 %v357_v17, %v4380_v10 }
 0x119   :  { %v488_v11 = vpop.permute.xlu0 %487  ;;  %v495_v12 = vpop.permute.xlu1 %494 }
 0x11a   :  { %v541_v14 = vmul.f32 %v4343_v31, %v488_v11  ;;  %v542_v15 = vmul.f32 %v4343_v31, %v495_v12  ;;  %v372_v25 = vadd.f32 %v371_v22, %v369_v18 }
 0x11c   :  { %v558_v19 = vadd.f32 %v4346_v32, %v541_v14  ;;  %v559_v20 = vadd.f32 %v4346_v32, %v542_v15 }
 0x11d   :  { %v354_v21 = vpop.f32.mrf.mxu0 }
 0x11e   :  { %574 = vst [vmem:[#allocation2 + $0x12] sm:$0x3] %v558_v19  ;;  %v355_v24 = vadd.f32 %v354_v21, %v326_v4 }
 0x11f   :  { %575 = vst [vmem:[#allocation2 + $0x14] sm:$0x3] %v559_v20 }
 0x120   :  { %v359_v26 = vadd.f32 %v358_v23, %v355_v24  ;;  %v370_v27 = vmul.f32 %v355_v24, %v355_v24 }
 0x121   :  { %v509_v28 = vpop.permute.xlu0 %508  ;;  %v516_v30 = vpop.permute.xlu1 %515 }
 0x122   :  { %v360_v33 = vrot.slane %v359_v26, 4  ;;  %v373_v34 = vadd.f32 %v372_v25, %v370_v27  ;;  %v544_v35 = vmul.f32 %v4343_v31, %v509_v28  ;;  %v545_v36 = vmul.f32 %v4343_v31, %v516_v30 }
 0x124   :  { %v361_v37 = vadd.f32 %v360_v33, %v359_v26  ;;  %v374_v38 = vrot.slane %v373_v34, 4  ;;  %v561_v39 = vadd.f32 %v4346_v32, %v544_v35  ;;  %v562_v40 = vadd.f32 %v4346_v32, %v545_v36 }
 0x126   :  { %v362_v41 = vrot.slane %v361_v37, 2  ;;  %v375_v42 = vadd.f32 %v374_v38, %v373_v34  ;;  %577 = vst [vmem:[#allocation2 + $0x18] sm:$0x3] %v561_v39 }
 0x127   :  { %578 = vst [vmem:[#allocation2 + $0x1a] sm:$0x3] %v562_v40 }
 0x128   :  { %v363_v43 = vadd.f32 %v362_v41, %v361_v37  ;;  %v376_v44 = vrot.slane %v375_v42, 2 }
 0x129   :  { %v530_v45 = vpop.permute.xlu0 %529 }
 0x12a   :  { %v364_v46 = vrot.slane %v363_v43, 1  ;;  %v377_v47 = vadd.f32 %v376_v44, %v375_v42  ;;  %v547_v48 = vmul.f32 %v4343_v31, %v530_v45  ;;  %v403_v31 = vperm.slane %v4369_v61, 1 }
 0x12c   :  { %v365_v49 = vadd.f32 %v364_v46, %v363_v43  ;;  %v378_v50 = vrot.slane %v377_v47, 1  ;;  %v564_v51 = vadd.f32 %v4346_v32, %v547_v48 }
 0x12e   :  { %v366_v52 = vmul.f32 0.03125, %v365_v49  ;;  %v379_v53 = vadd.f32 %v378_v50, %v377_v47  ;;  %580 = vst [vmem:[#allocation2 + $0x1e] sm:$0x3] %v564_v51 }
 0x130   :  { %v380_v54 = vmul.f32 0.03125, %v379_v53  ;;  %v381_v55 = vmul.f32 %v366_v52, %v366_v52  ;;  %v384_v32 = vsub.f32 %v4378_v9, %v366_v52  ;;  %v385_v4 = vsub.f32 %v4376_v8, %v366_v52 }
 0x131   :  { %v386_v5 = vsub.f32 %v4380_v10, %v366_v52  ;;  %v387_v6 = vsub.f32 %v355_v24, %v366_v52 }
 0x132   :  { %v382_v56 = vsub.f32 %v380_v54, %v381_v55 }
 0x134   :  { %v383_v57 = vmax.f32 %v382_v56, 0.0 }
 0x136   :  { %v388_v58 = vadd.f32 1e-05, %v383_v57 }
 0x138   :  { %3763 = vrsqrt.f32 %v388_v58  ;;  %vm395_vm3 = vweird.f32 %v388_v58 }
 0x13e   :  { %v3764_v59 = vpop.eup %3763 }
 0x13f   :  { %v390_v60 = vmul.f32 %v3764_v59, %v388_v58  ;;  %vm396_vm2 = vweird.f32 %v3764_v59 }
 0x140   :  { %vm397_vm4 = vmor %vm395_vm3, %vm396_vm2 }
 0x141   :  { %v391_v62 = vmul.f32 %v3764_v59, %v390_v60 }
 0x143   :  { %v392_v63 = vmul.f32 0.5, %v391_v62 }
 0x145   :  { %v393_v1 = vsub.f32 1.5, %v392_v63 }
 0x147   :  { %v394_v3 = vmul.f32 %v3764_v59, %v393_v1 }
 0x149   :  { %v398_v11 = vsel %vm397_vm4, %v3764_v59, %v394_v3 }
 0x14a   :  { %v399_v12 = vmul.f32 %v398_v11, %v384_v32  ;;  %v400_v13 = vmul.f32 %v398_v11, %v385_v4  ;;  %v401_v14 = vmul.f32 %v398_v11, %v386_v5  ;;  %v402_v15 = vmul.f32 %v398_v11, %v387_v6 }
 0x14c   :  { %v404_v16 = vmul.f32 %v403_v31, %v399_v12  ;;  %v405_v17 = vmul.f32 %v403_v31, %v400_v13  ;;  %v406_v18 = vmul.f32 %v403_v31, %v401_v14  ;;  %v407_v19 = vmul.f32 %v403_v31, %v402_v15 }
 0x14e   :  { %v409_v20 = vadd.f32 %v408_v7, %v404_v16  ;;  %v410_v21 = vadd.f32 %v408_v7, %v405_v17  ;;  %v4406_v9 = vadd.f32 %v408_v7, %v406_v18  ;;  %v4408_v8 = vadd.f32 %v408_v7, %v407_v19 }
 0x150   :  { %v413_v10 = vmax.f32 %v409_v20, 0.0  ;;  %v414_v22 = vmax.f32 %v410_v21, 0.0  ;;  %v415_v23 = vmax.f32 %v4406_v9, 0.0  ;;  %v416_v24 = vmax.f32 %v4408_v8, 0.0 }
 0x151   :  { %3864 = dma.done.wait [#allocation5], 10240 }
 0x152   :  { %3865 = vsyncadd [#allocation5], 4294957056  ;;  %v3016_v25 = vld [vmem:[#allocation3 + $0x70] sm:$0xf]  ;;  %v3615_v26 = vld [vmem:[#allocation3 + $0x74] sm:$0xf0] }
 0x153   :  { %v3080_v27 = vld [vmem:[#allocation3 + $0xf0] sm:$0xf]  ;;  %v3017_v28 = vor.u32 %v3615_v26, %v3016_v25  ;;  %v3631_v30 = vld [vmem:[#allocation3 + $0xf4] sm:$0xf0]  ;;  %v3008_v37 = vld [vmem:[#allocation3 + $0x60] sm:$0xf] }
 0x154   :  { %v3144_v33 = vld [vmem:[#allocation3 + $0x170] sm:$0xf]  ;;  %v3647_v34 = vld [vmem:[#allocation3 + $0x174] sm:$0xf0]  ;;  %v3081_v35 = vor.u32 %v3631_v30, %v3080_v27  ;;  %v3613_v38 = vld [vmem:[#allocation3 + $0x64] sm:$0xf0] }
 0x155   :  { %v3145_v36 = vor.u32 %v3647_v34, %v3144_v33  ;;  %v3072_v39 = vld [vmem:[#allocation3 + $0xe0] sm:$0xf]  ;;  %1161 = vmatpush.bf16.msra.mxu1 %v3017_v28  ;;  %v3009_v40 = vor.u32 %v3613_v38, %v3008_v37  ;;  %v3629_v41 = vld [vmem:[#allocation3 + $0xe4] sm:$0xf0]  ;;  %v3000_v46 = vld [vmem:[#allocation3 + $0x50] sm:$0xf] }
 0x156   :  { %v3136_v42 = vld [vmem:[#allocation3 + $0x160] sm:$0xf]  ;;  %v3645_v43 = vld [vmem:[#allocation3 + $0x164] sm:$0xf0]  ;;  %1180 = vmatpush.bf16.msra.mxu2 %v3081_v35  ;;  %v3073_v44 = vor.u32 %v3629_v41, %v3072_v39  ;;  %v3611_v47 = vld [vmem:[#allocation3 + $0x54] sm:$0xf0] }
 0x157   :  { %1199 = vmatpush.bf16.msra.mxu3 %v3145_v36  ;;  %v3137_v45 = vor.u32 %v3645_v43, %v3136_v42  ;;  %v3064_v48 = vld [vmem:[#allocation3 + $0xd0] sm:$0xf]  ;;  %v3627_v49 = vld [vmem:[#allocation3 + $0xd4] sm:$0xf0]  ;;  %v3001_v54 = vor.u32 %v3611_v47, %v3000_v46  ;;  %v2992_v56 = vld [vmem:[#allocation3 + $0x40] sm:$0xf] }
 0x158   :  { %v3128_v50 = vld [vmem:[#allocation3 + $0x150] sm:$0xf]  ;;  %v3643_v51 = vld [vmem:[#allocation3 + $0x154] sm:$0xf0]  ;;  %v3609_v57 = vld [vmem:[#allocation3 + $0x44] sm:$0xf0]  ;;  %v3065_v58 = vor.u32 %v3627_v49, %v3064_v48 }
 0x159   :  { %v3208_v52 = vld [vmem:[#allocation3 + $0x1f0] sm:$0xf]  ;;  %v3663_v53 = vld [vmem:[#allocation3 + $0x1f4] sm:$0xf0]  ;;  %1162 = vmatpush.bf16.msra.mxu1 %v3009_v40  ;;  %v3129_v59 = vor.u32 %v3643_v51, %v3128_v50  ;;  %v3056_v60 = vld [vmem:[#allocation3 + $0xc0] sm:$0xf]  ;;  %v2993_v5 = vor.u32 %v3609_v57, %v2992_v56 }
 0x15a   :  { %v3209_v55 = vor.u32 %v3663_v53, %v3208_v52  ;;  %1181 = vmatpush.bf16.msra.mxu2 %v3073_v44  ;;  %v3625_v62 = vld [vmem:[#allocation3 + $0xc4] sm:$0xf0]  ;;  %v3200_v63 = vld [vmem:[#allocation3 + $0x1e0] sm:$0xf]  ;;  %v4412_v4 = vrot.slane %v413_v10, 6  ;;  %vm589_vm5 = vcmask 1041408  }
 0x15b   :  { %1200 = vmatpush.bf16.msra.mxu3 %v3137_v45  ;;  %v3120_v1 = vld [vmem:[#allocation3 + $0x140] sm:$0xf]  ;;  %v3641_v31 = vld [vmem:[#allocation3 + $0x144] sm:$0xf0]  ;;  %v3192_v6 = vld [vmem:[#allocation3 + $0x1d0] sm:$0xf]  ;;  %v3057_v12 = vor.u32 %v3625_v62, %v3056_v60 }
 0x15c   :  { %1218 = vmatpush.bf16.msrb.mxu0 %v3209_v55  ;;  %v3661_v3 = vld [vmem:[#allocation3 + $0x1e4] sm:$0xf0]  ;;  %v3659_v7 = vld [vmem:[#allocation3 + $0x1d4] sm:$0xf0]  ;;  %v591_v11 = vrot.slane %v414_v22, 6  ;;  %v3121_v13 = vor.u32 %v3641_v31, %v3120_v1  ;;  %v4416_v26 = vsel %vm589_vm5, 0.0, %v4412_v4  ;;  %vm4434_vm8 = vmneg %vm589_vm5 }
 0x15d   :  { %v3201_v32 = vor.u32 %v3661_v3, %v3200_v63  ;;  %1163 = vmatpush.bf16.msra.mxu1 %v3001_v54  ;;  %v2984_v14 = vld [vmem:[#allocation3 + $0x30] sm:$0xf]  ;;  %v3607_v15 = vld [vmem:[#allocation3 + $0x34] sm:$0xf0]  ;;  %v3193_v20 = vor.u32 %v3659_v7, %v3192_v6  ;;  %v3184_v21 = vld [vmem:[#allocation3 + $0x1c0] sm:$0xf] }
 0x15e   :  { %1182 = vmatpush.bf16.msra.mxu2 %v3065_v58  ;;  %v3048_v16 = vld [vmem:[#allocation3 + $0xb0] sm:$0xf]  ;;  %v3623_v17 = vld [vmem:[#allocation3 + $0xb4] sm:$0xf0]  ;;  %v3657_v10 = vld [vmem:[#allocation3 + $0x1c4] sm:$0xf0]  ;;  %v2985_v25 = vor.u32 %v3607_v15, %v2984_v14  ;;  %v4420_v34 = vsel %vm589_vm5, %v4412_v4, %v591_v11 }
 0x15f   :  { %1201 = vmatpush.bf16.msra.mxu3 %v3129_v59  ;;  %v3112_v18 = vld [vmem:[#allocation3 + $0x130] sm:$0xf]  ;;  %v3639_v19 = vld [vmem:[#allocation3 + $0x134] sm:$0xf0]  ;;  %v3049_v22 = vor.u32 %v3623_v17, %v3048_v16  ;;  %v2976_v28 = vld [vmem:[#allocation3 + $0x20] sm:$0xf]  ;;  %v3185_v38 = vor.u32 %v3657_v10, %v3184_v21 }
 0x160   :  { %1219 = vmatpush.bf16.msrb.mxu0 %v3201_v32  ;;  %v3113_v27 = vor.u32 %v3639_v19, %v3112_v18  ;;  %v3605_v30 = vld [vmem:[#allocation3 + $0x24] sm:$0xf0]  ;;  %v3040_v33 = vld [vmem:[#allocation3 + $0xa0] sm:$0xf]  ;;  %v3176_v39 = vld [vmem:[#allocation3 + $0x1b0] sm:$0xf] }
 0x161   :  { %1164 = vmatpush.bf16.msra.mxu1 %v2993_v5  ;;  %v3621_v35 = vld [vmem:[#allocation3 + $0xa4] sm:$0xf0]  ;;  %v3104_v36 = vld [vmem:[#allocation3 + $0x120] sm:$0xf]  ;;  %v3655_v40 = vld [vmem:[#allocation3 + $0x1b4] sm:$0xf0]  ;;  %v2977_v42 = vor.u32 %v3605_v30, %v2976_v28 }
 0x162   :  { %1183 = vmatpush.bf16.msra.mxu2 %v3057_v12  ;;  %v3637_v37 = vld [vmem:[#allocation3 + $0x124] sm:$0xf0]  ;;  %v4423_v41 = vsel %vm589_vm5, %v591_v11, 0.0  ;;  %v2968_v43 = vld [vmem:[#allocation3 + $0x10] sm:$0xf]  ;;  %v611_v44 = vrot.slane %v4416_v26, 1  ;;  %v3041_v46 = vor.u32 %v3621_v35, %v3040_v33  ;;  %v3177_v53 = vor.u32 %v3655_v40, %v3176_v39 }
 0x163   :  { %1202 = vmatpush.bf16.msra.mxu3 %v3121_v13  ;;  %v612_v45 = vrot.slane %v4420_v34, 1  ;;  %v3105_v47 = vor.u32 %v3637_v37, %v3104_v36  ;;  %v3603_v48 = vld [vmem:[#allocation3 + $0x14] sm:$0xf0]  ;;  %v3032_v49 = vld [vmem:[#allocation3 + $0x90] sm:$0xf]  ;;  %vm610_vm6 = vcmask 1046528   ;;  %v4442_v37 = vpack.c.bf16 %v4420_v34, %v4412_v4 }
 0x164   :  { %1220 = vmatpush.bf16.msrb.mxu0 %v3193_v20  ;;  %v3619_v50 = vld [vmem:[#allocation3 + $0x94] sm:$0xf0]  ;;  %v3096_v51 = vld [vmem:[#allocation3 + $0x110] sm:$0xf]  ;;  %v614_v54 = vrot.slane %v4423_v41, 1  ;;  %v2969_v59 = vor.u32 %v3603_v48, %v2968_v43  ;;  %v626_v32 = vrot.slane %v4416_v26, 2 }
 0x165   :  { %1165 = vmatpush.bf16.msra.mxu1 %v2985_v25  ;;  %v3635_v52 = vld [vmem:[#allocation3 + $0x114] sm:$0xf0]  ;;  %v2960_v55 = vld [vmem:[#allocation3] sm:$0xf]  ;;  %v3601_v56 = vld [vmem:[#allocation3 + $0x4] sm:$0xf0]  ;;  %v3033_v60 = vor.u32 %v3619_v50, %v3032_v49  ;;  %v613_v12 = vsel %vm610_vm6, %v611_v44, %v612_v45 }
 0x166   :  { %1184 = vmatpush.bf16.msra.mxu2 %v3049_v22  ;;  %v3168_v57 = vld [vmem:[#allocation3 + $0x1a0] sm:$0xf]  ;;  %v3653_v58 = vld [vmem:[#allocation3 + $0x1a4] sm:$0xf0]  ;;  %v3097_v31 = vor.u32 %v3635_v52, %v3096_v51  ;;  %v627_v5 = vrot.slane %v4420_v34, 2  ;;  %v629_v6 = vrot.slane %v4423_v41, 2  ;;  %v2961_v16 = vor.u32 %v3601_v56, %v2960_v55 }
 0x167   :  { %1203 = vmatpush.bf16.msra.mxu3 %v3113_v27  ;;  %v3024_v62 = vld [vmem:[#allocation3 + $0x80] sm:$0xf]  ;;  %v3617_v63 = vld [vmem:[#allocation3 + $0x84] sm:$0xf0]  ;;  %v3169_v7 = vor.u32 %v3653_v58, %v3168_v57  ;;  %v3614_v11 = vld [vmem:[#allocation3 + $0x74] sm:$0xf]  ;;  %v615_v19 = vsel %vm610_vm6, %v612_v45, %v614_v54 }
 0x168   :  { %1221 = vmatpush.bf16.msrb.mxu0 %v3185_v38  ;;  %v3088_v1 = vld [vmem:[#allocation3 + $0x100] sm:$0xf]  ;;  %v3633_v3 = vld [vmem:[#allocation3 + $0x104] sm:$0xf0]  ;;  %vm625_vm7 = vcmask 1045504   ;;  %v3025_v17 = vor.u32 %v3617_v63, %v3024_v62  ;;  %vm640_vm9 = vcmask 1044480   ;;  %v4444_v38 = vpack.c.bf16 %v615_v19, %v613_v12 }
 0x169   :  { %1166 = vmatpush.bf16.msra.mxu1 %v2977_v42  ;;  %v3018_v13 = vld [vmem:[#allocation3 + $0x78] sm:$0xf0]  ;;  %v3272_v14 = vld [vmem:[#allocation3 + $0x270] sm:$0xf]  ;;  %v3679_v15 = vld [vmem:[#allocation3 + $0x274] sm:$0xf0]  ;;  %v3089_v18 = vor.u32 %v3633_v3, %v3088_v1  ;;  %v628_v25 = vsel %vm625_vm7, %v626_v32, %v627_v5  ;;  %v630_v22 = vsel %vm625_vm7, %v627_v5, %v629_v6 }
 0x16a   :  { %1185 = vmatpush.bf16.msra.mxu2 %v3041_v46  ;;  %v3160_v20 = vld [vmem:[#allocation3 + $0x190] sm:$0xf]  ;;  %v3651_v21 = vld [vmem:[#allocation3 + $0x194] sm:$0xf0]  ;;  %v3630_v27 = vld [vmem:[#allocation3 + $0xf4] sm:$0xf]  ;;  %v3021_v28 = vor.u32 %v3614_v11, %v3018_v13  ;;  %v3273_v30 = vor.u32 %v3679_v15, %v3272_v14  ;;  %v4453_v45 = vpack.c.bf16 %v630_v22, %v628_v25 }
 0x16b   :  { %1204 = vmatpush.bf16.msra.mxu3 %v3105_v47  ;;  %v3082_v33 = vld [vmem:[#allocation3 + $0xf8] sm:$0xf0]  ;;  %v3612_v35 = vld [vmem:[#allocation3 + $0x64] sm:$0xf]  ;;  %v3010_v36 = vld [vmem:[#allocation3 + $0x68] sm:$0xf0]  ;;  %v3161_v39 = vor.u32 %v3651_v21, %v3160_v20 }
 0x16c   :  { %1222 = vmatpush.bf16.msrb.mxu0 %v3177_v53  ;;  %v3264_v40 = vld [vmem:[#allocation3 + $0x260] sm:$0xf]  ;;  %v3677_v42 = vld [vmem:[#allocation3 + $0x264] sm:$0xf0]  ;;  %vm3870_vm10 = vmmov 1   ;;  %v641_v4 = vrot.slane %v4416_v26, 3  ;;  %v3085_v49 = vor.u32 %v3630_v27, %v3082_v33  ;;  %v3013_v54 = vor.u32 %v3612_v35, %v3010_v36 }
 0x16d   :  { %1167 = vmatpush.bf16.msra.mxu1 %v2969_v59  ;;  %v3152_v43 = vld [vmem:[#allocation3 + $0x180] sm:$0xf]  ;;  %vm4449_vm11 = vmpackc.low %vm3870_vm10, %vm4434_vm8  ;;  %v3649_v46 = vld [vmem:[#allocation3 + $0x184] sm:$0xf0]  ;;  %v642_v47 = vrot.slane %v4420_v34, 3  ;;  %v644_v48 = vrot.slane %v4423_v41, 3  ;;  %v3265_v55 = vor.u32 %v3677_v42, %v3264_v40 }
 0x16e   :  { %1186 = vmatpush.bf16.msra.mxu2 %v3033_v60  ;;  %v3646_v50 = vld [vmem:[#allocation3 + $0x174] sm:$0xf]  ;;  %v3146_v51 = vld [vmem:[#allocation3 + $0x178] sm:$0xf0]  ;;  %v4460_v52 = vrot.slane %v415_v23, 6  ;;  %v594_v53 = vrot.slane %v416_v24, 6  ;;  %v3153_v59 = vor.u32 %v3649_v46, %v3152_v43 }
 0x16f   :  { %1205 = vmatpush.bf16.msra.mxu3 %v3097_v31  ;;  %v3628_v56 = vld [vmem:[#allocation3 + $0xe4] sm:$0xf]  ;;  %v3074_v57 = vld [vmem:[#allocation3 + $0xe8] sm:$0xf0]  ;;  %v3610_v58 = vld [vmem:[#allocation3 + $0x54] sm:$0xf]  ;;  %v643_v8 = vsel %vm640_vm9, %v641_v4, %v642_v47  ;;  %v645_v24 = vsel %vm640_vm9, %v642_v47, %v644_v48  ;;  %v3149_v62 = vor.u32 %v3646_v50, %v3146_v51 }
 0x170   :  { %1223 = vmatpush.bf16.msrb.mxu0 %v3169_v7  ;;  %v3002_v60 = vld [vmem:[#allocation3 + $0x58] sm:$0xf0]  ;;  %v3256_v9 = vld [vmem:[#allocation3 + $0x250] sm:$0xf]  ;;  %v3675_v23 = vld [vmem:[#allocation3 + $0x254] sm:$0xf0]  ;;  %v3077_v31 = vor.u32 %v3628_v56, %v3074_v57  ;;  %v4473_v32 = vsel %vm589_vm5, %v4460_v52, %v594_v53  ;;  %v4482_v15 = vpack.c.bf16 %v645_v24, %v643_v8 }
 0x171   :  { %1168 = vmatpush.bf16.msra.mxu1 %v2961_v16  ;;  %v3644_v63 = vld [vmem:[#allocation3 + $0x164] sm:$0xf]  ;;  %v3138_v1 = vld [vmem:[#allocation3 + $0x168] sm:$0xf0]  ;;  %v3626_v3 = vld [vmem:[#allocation3 + $0xd4] sm:$0xf]  ;;  %v3005_v7 = vor.u32 %v3610_v58, %v3002_v60  ;;  %v3257_v11 = vor.u32 %v3675_v23, %v3256_v9  ;;  %v4498_v9 = vpack.c.bf16 %v4473_v32, %v4460_v52 }
 0x172   :  { %1187 = vmatpush.bf16.msra.mxu2 %v3025_v17  ;;  %v4477_v5 = vsel %vm589_vm5, 0.0, %v4460_v52  ;;  %v4480_v6 = vsel %vm589_vm5, %v594_v53, 0.0  ;;  %v3066_v12 = vld [vmem:[#allocation3 + $0xd8] sm:$0xf0]  ;;  %v3608_v13 = vld [vmem:[#allocation3 + $0x44] sm:$0xf]  ;;  %v3141_v19 = vor.u32 %v3644_v63, %v3138_v1 }
 0x173   :  { %1206 = vmatpush.bf16.msra.mxu3 %v3089_v18  ;;  %v2994_v14 = vld [vmem:[#allocation3 + $0x48] sm:$0xf0]  ;;  %v3248_v16 = vld [vmem:[#allocation3 + $0x240] sm:$0xf]  ;;  %v3673_v17 = vld [vmem:[#allocation3 + $0x244] sm:$0xf0]  ;;  %v3069_v27 = vor.u32 %v3626_v3, %v3066_v12 }
 0x174   :  { %3281 = vmatmul.msk.bf16.vlgmr.msra.gmra.mxu1 %vm4449_vm11, %v4442_v37  ;;  %1224 = vmatpush.bf16.msrb.mxu0 %v3161_v39  ;;  %v3624_v18 = vld [vmem:[#allocation3 + $0xc4] sm:$0xf]  ;;  %v3058_v20 = vld [vmem:[#allocation3 + $0xc8] sm:$0xf0]  ;;  %v616_v21 = vrot.slane %v4477_v5, 1  ;;  %v617_v10 = vrot.slane %v4473_v32, 1  ;;  %v2997_v36 = vor.u32 %v3608_v13, %v2994_v14  ;;  %v3249_v39 = vor.u32 %v3673_v17, %v3248_v16 }
 0x175   :  { %1237 = vmatpush.bf16.msrb.mxu1 %v3273_v30  ;;  %1188 = vmatmul.bf16.vlgmr.msra.gmra.mxu2 %v4444_v38  ;;  %v619_v25 = vrot.slane %v4480_v6, 1  ;;  %v631_v22 = vrot.slane %v4477_v5, 2  ;;  %v634_v30 = vrot.slane %v4480_v6, 2  ;;  %v3642_v33 = vld [vmem:[#allocation3 + $0x154] sm:$0xf]  ;;  %v3061_v4 = vor.u32 %v3624_v18, %v3058_v20 }
 0x176   :  { %1256 = vmatpush.bf16.msrb.mxu2 %v3021_v28  ;;  %1207 = vmatmul.bf16.vlgmr.msra.gmra.mxu3 %v4453_v45  ;;  %v632_v28 = vrot.slane %v4473_v32, 2  ;;  %v3130_v35 = vld [vmem:[#allocation3 + $0x158] sm:$0xf0]  ;;  %v3606_v40 = vld [vmem:[#allocation3 + $0x34] sm:$0xf]  ;;  %v646_v48 = vrot.slane %v4477_v5, 3 }
 0x177   :  { %1275 = vmatpush.bf16.msrb.mxu3 %v3085_v49  ;;  %v2986_v42 = vld [vmem:[#allocation3 + $0x38] sm:$0xf0]  ;;  %v3240_v43 = vld [vmem:[#allocation3 + $0x230] sm:$0xf]  ;;  %v3671_v46 = vld [vmem:[#allocation3 + $0x234] sm:$0xf0]  ;;  %v3133_v47 = vor.u32 %v3642_v33, %v3130_v35  ;;  %v618_v49 = vsel %vm610_vm6, %v616_v21, %v617_v10  ;;  %v620_v50 = vsel %vm610_vm6, %v617_v10, %v619_v25 }
 0x178   :  { %1225 = vmatpush.bf16.msrb.mxu0 %v3153_v59  ;;  %v633_v51 = vsel %vm625_vm7, %v631_v22, %v632_v28  ;;  %v635_v53 = vsel %vm625_vm7, %v632_v28, %v634_v30  ;;  %v2989_v56 = vor.u32 %v3606_v40, %v2986_v42  ;;  %v3241_v57 = vor.u32 %v3671_v46, %v3240_v43  ;;  %v3604_v58 = vld [vmem:[#allocation3 + $0x24] sm:$0xf]  ;;  %v3122_v60 = vld [vmem:[#allocation3 + $0x148] sm:$0xf0]  ;;  %v3232_v8 = vld [vmem:[#allocation3 + $0x220] sm:$0xf] }
 0x179   :  { %1238 = vmatpush.bf16.msrb.mxu1 %v3265_v55  ;;  %v3050_v55 = vld [vmem:[#allocation3 + $0xb8] sm:$0xf0]  ;;  %v3640_v59 = vld [vmem:[#allocation3 + $0x144] sm:$0xf]  ;;  %v2978_v23 = vld [vmem:[#allocation3 + $0x28] sm:$0xf0]  ;;  %v4502_v63 = vpack.c.bf16 %v635_v53, %v633_v51 }
 0x17a   :  { %1257 = vmatpush.bf16.msrb.mxu2 %v3013_v54  ;;  %v3622_v54 = vld [vmem:[#allocation3 + $0xb4] sm:$0xf]  ;;  %v3669_v24 = vld [vmem:[#allocation3 + $0x224] sm:$0xf0]  ;;  %v647_v1 = vrot.slane %v4473_v32, 3  ;;  %v3125_v12 = vor.u32 %v3640_v59, %v3122_v60  ;;  %v2981_v52 = vor.u32 %v3604_v58, %v2978_v23  ;;  %v759_v44 = vperm.slane %v4369_v61, 3 }
 0x17b   :  { %1276 = vmatpush.bf16.msrb.mxu3 %v3077_v31  ;;  %1226 = vmatmul.bf16.vlgmr.msrb.gmra.mxu0 %v4482_v15  ;;  %v649_v31 = vrot.slane %v4480_v6, 3  ;;  %v3053_v3 = vor.u32 %v3622_v54, %v3050_v55  ;;  %v3233_v13 = vor.u32 %v3669_v24, %v3232_v8  ;;  %v3602_v14 = vld [vmem:[#allocation3 + $0x14] sm:$0xf]  ;;  %v3114_v17 = vld [vmem:[#allocation3 + $0x138] sm:$0xf0] }
 0x17c   :  { %1294 = vmatpush.bf16.msra.mxu0 %v3149_v62  ;;  %v4500_v62 = vpack.c.bf16 %v620_v50, %v618_v49  ;;  %v3638_v16 = vld [vmem:[#allocation3 + $0x134] sm:$0xf]  ;;  %v2970_v18 = vld [vmem:[#allocation3 + $0x18] sm:$0xf0]  ;;  %v3667_v20 = vld [vmem:[#allocation3 + $0x214] sm:$0xf0]  ;;  %v648_v21 = vsel %vm640_vm9, %v646_v48, %v647_v1 }
 0x17d   :  { %1239 = vmatpush.bf16.msrb.mxu1 %v3257_v11  ;;  %v3042_v11 = vld [vmem:[#allocation3 + $0xa8] sm:$0xf0]  ;;  %v650_v10 = vsel %vm640_vm9, %v647_v1, %v649_v31  ;;  %v3618_v25 = vld [vmem:[#allocation3 + $0x94] sm:$0xf]  ;;  %v3034_v22 = vld [vmem:[#allocation3 + $0x98] sm:$0xf0]  ;;  %v3117_v28 = vor.u32 %v3638_v16, %v3114_v17 }
 0x17e   :  { %1258 = vmatpush.bf16.msrb.mxu2 %v3005_v7  ;;  %v3620_v7 = vld [vmem:[#allocation3 + $0xa4] sm:$0xf]  ;;  %v2962_v33 = vld [vmem:[#allocation3 + $0x8] sm:$0xf0]  ;;  %v3216_v35 = vld [vmem:[#allocation3 + $0x200] sm:$0xf]  ;;  %v4513_v46 = vpack.c.bf16 %v650_v10, %v648_v21  ;;  %v3037_v54 = vor.u32 %v3618_v25, %v3034_v22 }
 0x17f   :  { %1277 = vmatpush.bf16.msrb.mxu3 %v3069_v27  ;;  %v3045_v27 = vor.u32 %v3620_v7, %v3042_v11  ;;  %v3600_v30 = vld [vmem:[#allocation3 + $0x4] sm:$0xf]  ;;  %v3665_v40 = vld [vmem:[#allocation3 + $0x204] sm:$0xf0]  ;;  %v3106_v43 = vld [vmem:[#allocation3 + $0x128] sm:$0xf0] }
 0x180   :  { %1295 = vmatpush.bf16.msra.mxu0 %v3141_v19  ;;  %v3224_v19 = vld [vmem:[#allocation3 + $0x210] sm:$0xf]  ;;  %v3636_v42 = vld [vmem:[#allocation3 + $0x124] sm:$0xf]  ;;  %v3274_v48 = vld [vmem:[#allocation3 + $0x278] sm:$0xf0]  ;;  %v3217_v58 = vor.u32 %v3665_v40, %v3216_v35 }
 0x181   :  { %1240 = vmatpush.bf16.msrb.mxu1 %v3249_v39  ;;  %v3225_v39 = vor.u32 %v3667_v20, %v3224_v19  ;;  %v656_v49 = vrot.slane %v4420_v34, 4  ;;  %v658_v50 = vrot.slane %v4423_v41, 4  ;;  %v3662_v51 = vld [vmem:[#allocation3 + $0x1f4] sm:$0xf]  ;;  %v3210_v53 = vld [vmem:[#allocation3 + $0x1f8] sm:$0xf0] }
 0x182   :  { %1259 = vmatpush.bf16.msrb.mxu2 %v2997_v36  ;;  %v2973_v36 = vor.u32 %v3602_v14, %v2970_v18  ;;  %v3616_v55 = vld [vmem:[#allocation3 + $0x84] sm:$0xf]  ;;  %v3026_v59 = vld [vmem:[#allocation3 + $0x88] sm:$0xf0]  ;;  %v3634_v60 = vld [vmem:[#allocation3 + $0x114] sm:$0xf]  ;;  %v3213_v34 = vor.u32 %v3662_v51, %v3210_v53 }
 0x183   :  { %1278 = vmatpush.bf16.msrb.mxu3 %v3061_v4  ;;  %v655_v4 = vrot.slane %v4416_v26, 4  ;;  %v3098_v26 = vld [vmem:[#allocation3 + $0x118] sm:$0xf0]  ;;  %v659_v8 = vsel %vm334_vm0, %v656_v49, %v658_v50  ;;  %v3676_v24 = vld [vmem:[#allocation3 + $0x264] sm:$0xf]  ;;  %v3029_v31 = vor.u32 %v3616_v55, %v3026_v59  ;;  %v660_v35 = vrot.slane %v4477_v5, 4 }
 0x184   :  { %1296 = vmatpush.bf16.msra.mxu0 %v3133_v47  ;;  %3285 = vmatmul.msk.bf16.gmra.mxu1 %vm4449_vm11, %v4498_v9  ;;  %v3678_v47 = vld [vmem:[#allocation3 + $0x274] sm:$0xf]  ;;  %v3266_v1 = vld [vmem:[#allocation3 + $0x268] sm:$0xf0]  ;;  %v3660_v7 = vld [vmem:[#allocation3 + $0x1e4] sm:$0xf] }
 0x185   :  { %1241 = vmatpush.bf16.msrb.mxu1 %v3241_v57  ;;  %1193 = vmatmul.bf16.gmra.mxu2 %v4500_v62  ;;  %v2965_v57 = vor.u32 %v3600_v30, %v2962_v33  ;;  %v3277_v23 = vor.u32 %v3678_v47, %v3274_v48  ;;  %v657_v41 = vsel %vm334_vm0, %v655_v4, %v656_v49  ;;  %v3202_v11 = vld [vmem:[#allocation3 + $0x1e8] sm:$0xf0]  ;;  %v3674_v16 = vld [vmem:[#allocation3 + $0x254] sm:$0xf]  ;;  %v3258_v17 = vld [vmem:[#allocation3 + $0x258] sm:$0xf0] }
 0x186   :  { %1260 = vmatpush.bf16.msrb.mxu2 %v2989_v56  ;;  %1212 = vmatmul.bf16.gmra.mxu3 %v4502_v63  ;;  %v3109_v56 = vor.u32 %v3636_v42, %v3106_v43  ;;  %v3269_v14 = vor.u32 %v3676_v24, %v3266_v1  ;;  %v3205_v18 = vor.u32 %v3660_v7, %v3202_v11  ;;  %v3658_v20 = vld [vmem:[#allocation3 + $0x1d4] sm:$0xf]  ;;  %v3194_v21 = vld [vmem:[#allocation3 + $0x1d8] sm:$0xf0]  ;;  %v3672_v25 = vld [vmem:[#allocation3 + $0x244] sm:$0xf] }
 0x187   :  { %1279 = vmatpush.bf16.msrb.mxu3 %v3053_v3  ;;  %v3101_v3 = vor.u32 %v3634_v60, %v3098_v26  ;;  %v3261_v10 = vor.u32 %v3674_v16, %v3258_v17  ;;  %v3250_v22 = vld [vmem:[#allocation3 + $0x248] sm:$0xf0]  ;;  %v3670_v40 = vld [vmem:[#allocation3 + $0x234] sm:$0xf]  ;;  %v3242_v42 = vld [vmem:[#allocation3 + $0x238] sm:$0xf0] }
 0x188   :  { %1297 = vmatpush.bf16.msra.mxu0 %v3125_v12  ;;  %v3632_v12 = vld [vmem:[#allocation3 + $0x104] sm:$0xf]  ;;  %v3186_v30 = vld [vmem:[#allocation3 + $0x1c8] sm:$0xf0]  ;;  %v3253_v33 = vor.u32 %v3672_v25, %v3250_v22  ;;  %v3178_v43 = vld [vmem:[#allocation3 + $0x1b8] sm:$0xf0]  ;;  %v3245_v4 = vor.u32 %v3670_v40, %v3242_v42 }
 0x189   :  { %1242 = vmatpush.bf16.msrb.mxu1 %v3233_v13  ;;  %v4521_v13 = vpack.c.bf16 %v659_v8, %v657_v41  ;;  %v3668_v49 = vld [vmem:[#allocation3 + $0x224] sm:$0xf]  ;;  %v3234_v5 = vld [vmem:[#allocation3 + $0x228] sm:$0xf0]  ;;  %v3226_v55 = vld [vmem:[#allocation3 + $0x218] sm:$0xf0] }
 0x18a   :  { %1261 = vmatpush.bf16.msrb.mxu2 %v2981_v52  ;;  %v3090_v52 = vld [vmem:[#allocation3 + $0x108] sm:$0xf0]  ;;  %v3652_v50 = vld [vmem:[#allocation3 + $0x1a4] sm:$0xf]  ;;  %v3237_v53 = vor.u32 %v3668_v49, %v3234_v5 }
 0x18b   :  { %1280 = vmatpush.bf16.msrb.mxu3 %v3045_v27  ;;  %1231 = vmatmul.bf16.gmra.mxu0 %v4513_v46  ;;  %v3093_v19 = vor.u32 %v3632_v12, %v3090_v52  ;;  %v3197_v27 = vor.u32 %v3658_v20, %v3194_v21  ;;  %v3664_v59 = vld [vmem:[#allocation3 + $0x204] sm:$0xf]  ;;  %v3218_v60 = vld [vmem:[#allocation3 + $0x208] sm:$0xf0] }
 0x18c   :  { %1298 = vmatpush.bf16.msra.mxu0 %v3117_v28  ;;  %v3656_v28 = vld [vmem:[#allocation3 + $0x1c4] sm:$0xf]  ;;  %v3221_v41 = vor.u32 %v3664_v59, %v3218_v60 }
 0x18d   :  { %1243 = vmatpush.bf16.msrb.mxu1 %v3225_v39  ;;  %v663_v39 = vrot.slane %v4480_v6, 4  ;;  %v3170_v6 = vld [vmem:[#allocation3 + $0x1a8] sm:$0xf0] }
 0x18e   :  { %1262 = vmatpush.bf16.msrb.mxu2 %v2973_v36  ;;  %v661_v36 = vrot.slane %v4473_v32, 4 }
 0x18f   :  { %1281 = vmatpush.bf16.msrb.mxu3 %v3037_v54  ;;  %v3666_v54 = vld [vmem:[#allocation3 + $0x214] sm:$0xf] }
 0x190   :  { %1299 = vmatpush.bf16.msra.mxu0 %v3109_v56  ;;  %v662_v47 = vsel %vm334_vm0, %v660_v35, %v661_v36  ;;  %v664_v48 = vsel %vm334_vm0, %v661_v36, %v663_v39  ;;  %v3173_v56 = vor.u32 %v3652_v50, %v3170_v6 }
 0x191   :  { %1244 = vmatpush.bf16.msrb.mxu1 %v3217_v58  ;;  %v758_v51 = vpack.c.bf16 %v664_v48, %v662_v47  ;;  %v3229_v58 = vor.u32 %v3666_v54, %v3226_v55 }
 0x192   :  { %1263 = vmatpush.bf16.msrb.mxu2 %v2965_v57  ;;  %v3162_v57 = vld [vmem:[#allocation3 + $0x198] sm:$0xf0] }
 0x193   :  { %1282 = vmatpush.bf16.msrb.mxu3 %v3029_v31 }
 0x194   :  { %1300 = vmatpush.bf16.msra.mxu0 %v3101_v3  ;;  %1245 = vmatmul.bf16.vlgmr.msrb.gmra.mxu1 %v4521_v13 }
 0x195   :  { %1313 = vmatpush.bf16.msra.mxu1 %v3213_v34  ;;  %3289 = vmatmul.msk.bf16.vlgmr.msrb.gmra.mxu2 %vm4449_vm11, %v4442_v37  ;;  %v3189_v37 = vor.u32 %v3656_v28, %v3186_v30  ;;  %v3154_v34 = vld [vmem:[#allocation3 + $0x188] sm:$0xf0] }
 0x196   :  { %1332 = vmatpush.bf16.msra.mxu2 %v3277_v23  ;;  %1283 = vmatmul.bf16.vlgmr.msrb.gmra.mxu3 %v4444_v38  ;;  %v3654_v38 = vld [vmem:[#allocation3 + $0x1b4] sm:$0xf]  ;;  %v3648_v23 = vld [vmem:[#allocation3 + $0x184] sm:$0xf] }
 0x197   :  { %v3181_v32 = vor.u32 %v3654_v38, %v3178_v43  ;;  %v3157_v8 = vor.u32 %v3648_v23, %v3154_v34 }
 0x198   :  { %1301 = vmatpush.bf16.msra.mxu0 %v3093_v19 }
 0x199   :  { %1314 = vmatpush.bf16.msra.mxu1 %v3205_v18 }
 0x19a   :  { %1333 = vmatpush.bf16.msra.mxu2 %v3269_v14 }
 0x19b   :  { %1302 = vmatmul.bf16.vlgmr.msra.gmra.mxu0 %v4453_v45  ;;  %v3650_v45 = vld [vmem:[#allocation3 + $0x194] sm:$0xf] }
 0x19c   :  { %v3165_v26 = vor.u32 %v3650_v45, %v3162_v57 }
 0x19d   :  { %1315 = vmatpush.bf16.msra.mxu1 %v3197_v27 }
 0x19e   :  { %1334 = vmatpush.bf16.msra.mxu2 %v3261_v10 }
 0x1a1   :  { %1316 = vmatpush.bf16.msra.mxu1 %v3189_v37 }
 0x1a2   :  { %1335 = vmatpush.bf16.msra.mxu2 %v3253_v33 }
 0x1a4   :  { %1250 = vmatmul.bf16.gmra.mxu1 %v758_v51 }
 0x1a5   :  { %1317 = vmatpush.bf16.msra.mxu1 %v3181_v32  ;;  %3293 = vmatmul.msk.bf16.gmra.mxu2 %vm4449_vm11, %v4498_v9 }
 0x1a6   :  { %1336 = vmatpush.bf16.msra.mxu2 %v3245_v4  ;;  %1288 = vmatmul.bf16.gmra.mxu3 %v4500_v62 }
 0x1a9   :  { %1318 = vmatpush.bf16.msra.mxu1 %v3173_v56 }
 0x1aa   :  { %1337 = vmatpush.bf16.msra.mxu2 %v3237_v53 }
 0x1ab   :  { %1307 = vmatmul.bf16.gmra.mxu0 %v4502_v63 }
 0x1ad   :  { %1319 = vmatpush.bf16.msra.mxu1 %v3165_v26 }
 0x1ae   :  { %1338 = vmatpush.bf16.msra.mxu2 %v3229_v58 }
 0x1b1   :  { %1320 = vmatpush.bf16.msra.mxu1 %v3157_v8 }
 0x1b2   :  { %1339 = vmatpush.bf16.msra.mxu2 %v3221_v41 }
 0x1b4   :  { %1321 = vmatmul.bf16.vlgmr.msra.gmra.mxu1 %v4482_v15 }
 0x1b5   :  { %1340 = vmatmul.bf16.vlgmr.msra.gmra.mxu2 %v4521_v13 }
 0x1c4   :  { %1326 = vmatmul.bf16.gmra.mxu1 %v4513_v46 }
 0x1c5   :  { %1345 = vmatmul.bf16.gmra.mxu2 %v758_v51 }
 0x1f1   :  { %v1170_v9 = vpop.f32.mrf.mxu1 }
 0x1f2   :  { %v1171_v62 = vadd.f32 %v1170_v9, %v759_v44 }
 0x1f8   :  { %v1189_v24 = vpop.f32.mrf.mxu2  ;;  %v1227_v52 = vpop.f32.mrf.mxu0 }
 0x1f9   :  { %v1190_v1 = vadd.f32 %v1189_v24, %v1171_v62  ;;  %v1172_v31 = vpop.f32.mrf.mxu1  ;;  %v1208_v7 = vpop.f32.mrf.mxu3 }
 0x1fa   :  { %v1173_v3 = vadd.f32 %v1172_v31, %v759_v44 }
 0x1fb   :  { %v1209_v20 = vadd.f32 %v1208_v7, %v1190_v1 }
 0x1fd   :  { %v1228_v25 = vadd.f32 %v1227_v52, %v1209_v20 }
 0x200   :  { %v1191_v11 = vpop.f32.mrf.mxu2  ;;  %v1229_v46 = vpop.f32.mrf.mxu0 }
 0x201   :  { %v1192_v63 = vadd.f32 %v1191_v11, %v1173_v3  ;;  %v1175_v12 = vpop.f32.mrf.mxu1  ;;  %v1210_v17 = vpop.f32.mrf.mxu3 }
 0x202   :  { %v1176_v14 = vadd.f32 %v1175_v12, %v759_v44 }
 0x203   :  { %v1211_v21 = vadd.f32 %v1210_v17, %v1192_v63 }
 0x205   :  { %v1230_v22 = vadd.f32 %v1229_v46, %v1211_v21 }
 0x208   :  { %v1194_v15 = vpop.f32.mrf.mxu2  ;;  %v1232_v27 = vpop.f32.mrf.mxu0 }
 0x209   :  { %v1195_v16 = vadd.f32 %v1194_v15, %v1176_v14  ;;  %v1177_v13 = vpop.f32.mrf.mxu1  ;;  %v1213_v10 = vpop.f32.mrf.mxu3  ;;  %v760_v14 = vperm.slane %v4310_v0, 3 }
 0x20a   :  { %v1178_v37 = vadd.f32 %v1177_v13, %v759_v44 }
 0x20b   :  { %v1214_v36 = vadd.f32 %v1213_v10, %v1195_v16 }
 0x20d   :  { %v1233_v4 = vadd.f32 %v1232_v27, %v1214_v36 }
 0x210   :  { %v1196_v18 = vpop.f32.mrf.mxu2  ;;  %v1234_v5 = vpop.f32.mrf.mxu0 }
 0x211   :  { %v1246_v19 = vpop.f32.mrf.mxu1  ;;  %v1215_v38 = vpop.f32.mrf.mxu3  ;;  %v1197_v47 = vadd.f32 %v1196_v18, %v1178_v37 }
 0x212   :  { %v4543_v28 = vadd.f32 %v1246_v19, %v1228_v25 }
 0x213   :  { %v1216_v50 = vadd.f32 %v1215_v38, %v1197_v47 }
 0x214   :  { %v1371_v39 = vmul.f32 %v4543_v28, %v4543_v28 }
 0x215   :  { %v1235_v54 = vadd.f32 %v1234_v5, %v1216_v50 }
 0x218   :  { %v1265_v30 = vpop.f32.mrf.mxu2  ;;  %v1303_v58 = vpop.f32.mrf.mxu0 }
 0x219   :  { %v1248_v33 = vpop.f32.mrf.mxu1  ;;  %v1284_v55 = vpop.f32.mrf.mxu3  ;;  %v1266_v25 = vadd.f32 %v1265_v30, %v760_v14 }
 0x21a   :  { %v4545_v35 = vadd.f32 %v1248_v33, %v1230_v22 }
 0x21c   :  { %v1351_v40 = vadd.f32 %v4545_v35, %v4543_v28  ;;  %v1373_v42 = vmul.f32 %v4545_v35, %v4545_v35 }
 0x21e   :  { %v1379_v43 = vadd.f32 %v1373_v42, %v1371_v39  ;;  %v1285_v42 = vadd.f32 %v1284_v55, %v1266_v25 }
 0x220   :  { %v1267_v48 = vpop.f32.mrf.mxu2  ;;  %v1305_v3 = vpop.f32.mrf.mxu0  ;;  %v1304_v47 = vadd.f32 %v1303_v58, %v1285_v42 }
 0x221   :  { %v1251_v49 = vpop.f32.mrf.mxu1  ;;  %v1286_v9 = vpop.f32.mrf.mxu3  ;;  %v1268_v17 = vadd.f32 %v1267_v48, %v760_v14 }
 0x222   :  { %v4553_v32 = vadd.f32 %v1251_v49, %v1233_v4 }
 0x223   :  { %v1287_v33 = vadd.f32 %v1286_v9, %v1268_v17 }
 0x224   :  { %v1352_v6 = vadd.f32 %v1351_v40, %v4553_v32  ;;  %v1375_v51 = vmul.f32 %v4553_v32, %v4553_v32 }
 0x225   :  { %v1306_v4 = vadd.f32 %v1305_v3, %v1287_v33 }
 0x226   :  { %v1380_v53 = vadd.f32 %v1379_v43, %v1375_v51 }
 0x228   :  { %v1270_v56 = vpop.f32.mrf.mxu2  ;;  %v1308_v39 = vpop.f32.mrf.mxu0 }
 0x229   :  { %v1253_v45 = vpop.f32.mrf.mxu1  ;;  %v1289_v21 = vpop.f32.mrf.mxu3  ;;  %v1271_v27 = vadd.f32 %v1270_v56, %v760_v14 }
 0x22a   :  { %v4558_v57 = vadd.f32 %v1253_v45, %v1235_v54 }
 0x22b   :  { %v1290_v43 = vadd.f32 %v1289_v21, %v1271_v27 }
 0x22c   :  { %v1353_v59 = vadd.f32 %v1352_v6, %v4558_v57  ;;  %v1377_v60 = vmul.f32 %v4558_v57, %v4558_v57 }
 0x22d   :  { %v1309_v49 = vadd.f32 %v1308_v39, %v1290_v43 }
 0x22e   :  { %v1354_v26 = vrot.slane %v1353_v59, 4  ;;  %v1381_v23 = vadd.f32 %v1380_v53, %v1377_v60 }
 0x230   :  { %v1355_v34 = vadd.f32 %v1354_v26, %v1353_v59  ;;  %v1382_v41 = vrot.slane %v1381_v23, 4  ;;  %v1272_v8 = vpop.f32.mrf.mxu2  ;;  %v1310_v53 = vpop.f32.mrf.mxu0 }
 0x231   :  { %v1322_v44 = vpop.f32.mrf.mxu1 }
 0x232   :  { %v1356_v62 = vrot.slane %v1355_v34, 2  ;;  %v1383_v24 = vadd.f32 %v1382_v41, %v1381_v23  ;;  %v1323_v5 = vadd.f32 %v1322_v44, %v1304_v47 }
 0x234   :  { %v1357_v1 = vadd.f32 %v1356_v62, %v1355_v34  ;;  %v1384_v31 = vrot.slane %v1383_v24, 2 }
 0x236   :  { %v1358_v7 = vrot.slane %v1357_v1, 1  ;;  %v1385_v11 = vadd.f32 %v1384_v31, %v1383_v24 }
 0x238   :  { %v1359_v63 = vadd.f32 %v1358_v7, %v1357_v1  ;;  %v1386_v12 = vrot.slane %v1385_v11, 1  ;;  %v1341_v52 = vpop.f32.mrf.mxu2 }
 0x239   :  { %v1324_v15 = vpop.f32.mrf.mxu1  ;;  %v4576_v54 = vadd.f32 %v1341_v52, %v1323_v5 }
 0x23a   :  { %v4564_v16 = vmul.f32 0.03125, %v1359_v63  ;;  %v1387_v13 = vadd.f32 %v1386_v12, %v1385_v11  ;;  %v1325_v48 = vadd.f32 %v1324_v15, %v1306_v4  ;;  %v1443_v12 = vperm.slane %v4369_v61, 4 }
 0x23b   :  { %v1372_v26 = vmul.f32 %v4576_v54, %v4576_v54 }
 0x23c   :  { %v1397_v46 = vmul.f32 0.03125, %v1387_v13  ;;  %v1399_v18 = vmul.f32 %v4564_v16, %v4564_v16  ;;  %v1405_v19 = vsub.f32 %v4543_v28, %v4564_v16  ;;  %v1407_v20 = vsub.f32 %v4545_v35, %v4564_v16  ;;  %v1291_v35 = vpop.f32.mrf.mxu3 }
 0x23d   :  { %v1409_v10 = vsub.f32 %v4553_v32, %v4564_v16  ;;  %v1273_v28 = vadd.f32 %v1272_v8, %v760_v14  ;;  %v1411_v63 = vsub.f32 %v4558_v57, %v4564_v16  ;;  %v1453_v14 = vperm.slane %v4369_v61, 5 }
 0x23e   :  { %v1401_v22 = vsub.f32 %v1397_v46, %v1399_v18 }
 0x23f   :  { %v1292_v50 = vadd.f32 %v1291_v35, %v1273_v28 }
 0x240   :  { %v1403_v36 = vmax.f32 %v1401_v22, 0.0  ;;  %v1343_v40 = vpop.f32.mrf.mxu2 }
 0x241   :  { %v1327_v38 = vpop.f32.mrf.mxu1  ;;  %v4574_v32 = vadd.f32 %v1343_v40, %v1325_v48  ;;  %v1311_v60 = vadd.f32 %v1310_v53, %v1292_v50 }
 0x242   :  { %v1413_v37 = vadd.f32 1e-05, %v1403_v36  ;;  %v1328_v6 = vadd.f32 %v1327_v38, %v1309_v49 }
 0x243   :  { %v1374_v45 = vmul.f32 %v4574_v32, %v4574_v32  ;;  %v1360_v34 = vadd.f32 %v4574_v32, %v4576_v54 }
 0x244   :  { %3765 = vrsqrt.f32 %v1413_v37  ;;  %vm1421_vm13 = vweird.f32 %v1413_v37 }
 0x245   :  { %v1388_v44 = vadd.f32 %v1374_v45, %v1372_v26 }
 0x248   :  { %v1346_v30 = vpop.f32.mrf.mxu2 }
 0x249   :  { %v4578_v56 = vadd.f32 %v1346_v30, %v1328_v6  ;;  %v1329_v58 = vpop.f32.mrf.mxu1 }
 0x24a   :  { %v3766_v51 = vpop.eup %3765  ;;  %v1330_v8 = vadd.f32 %v1329_v58, %v1311_v60 }
 0x24b   :  { %v1416_v55 = vmul.f32 %v3766_v51, %v1413_v37  ;;  %v1376_v41 = vmul.f32 %v4578_v56, %v4578_v56  ;;  %vm1422_vm12 = vweird.f32 %v3766_v51  ;;  %v1361_v24 = vadd.f32 %v1360_v34, %v4578_v56 }
 0x24c   :  { %vm1423_vm14 = vmor %vm1421_vm13, %vm1422_vm12  ;;  %v1444_v34 = vperm.slane %v4310_v0, 4 }
 0x24d   :  { %v1417_v59 = vmul.f32 %v3766_v51, %v1416_v55  ;;  %v1389_v3 = vadd.f32 %v1388_v44, %v1376_v41 }
 0x24f   :  { %v1418_v23 = vmul.f32 0.5, %v1417_v59 }
 0x250   :  { %v1348_v9 = vpop.f32.mrf.mxu2 }
 0x251   :  { %v1419_v62 = vsub.f32 1.5, %v1418_v23  ;;  %v4589_v1 = vadd.f32 %v1348_v9, %v1330_v8 }
 0x253   :  { %v1420_v31 = vmul.f32 %v3766_v51, %v1419_v62  ;;  %v1362_v7 = vadd.f32 %v1361_v24, %v4589_v1  ;;  %v1378_v11 = vmul.f32 %v4589_v1, %v4589_v1  ;;  %v1454_v24 = vperm.slane %v4310_v0, 5 }
 0x255   :  { %v1424_v52 = vsel %vm1423_vm14, %v3766_v51, %v1420_v31  ;;  %v1363_v15 = vrot.slane %v1362_v7, 4  ;;  %v1390_v13 = vadd.f32 %v1389_v3, %v1378_v11 }
 0x256   :  { %v1435_v17 = vmul.f32 %v1424_v52, %v1405_v19  ;;  %v1437_v46 = vmul.f32 %v1424_v52, %v1407_v20  ;;  %v1439_v18 = vmul.f32 %v1424_v52, %v1409_v10  ;;  %v1441_v21 = vmul.f32 %v1424_v52, %v1411_v63 }
 0x257   :  { %v1364_v25 = vadd.f32 %v1363_v15, %v1362_v7  ;;  %v1391_v22 = vrot.slane %v1390_v13, 4 }
 0x258   :  { %v1445_v27 = vmul.f32 %v1443_v12, %v1435_v17  ;;  %v1447_v33 = vmul.f32 %v1443_v12, %v1437_v46  ;;  %v1449_v36 = vmul.f32 %v1443_v12, %v1439_v18  ;;  %v1451_v39 = vmul.f32 %v1443_v12, %v1441_v21 }
 0x259   :  { %v1365_v40 = vrot.slane %v1364_v25, 2  ;;  %v1392_v57 = vadd.f32 %v1391_v22, %v1390_v13 }
 0x25a   :  { %v4598_v16 = vadd.f32 %v1453_v14, %v1445_v27  ;;  %v4600_v42 = vadd.f32 %v1453_v14, %v1447_v33  ;;  %v4602_v37 = vadd.f32 %v1453_v14, %v1449_v36  ;;  %v4604_v38 = vadd.f32 %v1453_v14, %v1451_v39 }
 0x25b   :  { %v1366_v19 = vadd.f32 %v1365_v40, %v1364_v25  ;;  %v1393_v20 = vrot.slane %v1392_v57, 2 }
 0x25c   :  { %v1463_v10 = vmax.f32 %v4598_v16, 0.0  ;;  %v1465_v43 = vmax.f32 %v4600_v42, 0.0  ;;  %v1467_v4 = vmax.f32 %v4602_v37, 0.0  ;;  %v1469_v28 = vmax.f32 %v4604_v38, 0.0 }
 0x25d   :  { %v1367_v47 = vrot.slane %v1366_v19, 1  ;;  %v1394_v35 = vadd.f32 %v1393_v20, %v1392_v57 }
 0x25f   :  { %v1368_v48 = vadd.f32 %v1367_v47, %v1366_v19  ;;  %v1395_v49 = vrot.slane %v1394_v35, 1 }
 0x261   :  { %v1370_v5 = vmul.f32 0.03125, %v1368_v48  ;;  %v1396_v30 = vadd.f32 %v1395_v49, %v1394_v35 }
 0x263   :  { %v1398_v50 = vmul.f32 0.03125, %v1396_v30  ;;  %v1400_v6 = vmul.f32 %v1370_v5, %v1370_v5  ;;  %v1406_v41 = vsub.f32 %v4576_v54, %v1370_v5  ;;  %v1408_v8 = vsub.f32 %v4574_v32, %v1370_v5 }
 0x264   :  { %v1410_v44 = vsub.f32 %v4578_v56, %v1370_v5  ;;  %v1412_v9 = vsub.f32 %v4589_v1, %v1370_v5 }
 0x265   :  { %v1402_v51 = vsub.f32 %v1398_v50, %v1400_v6 }
 0x267   :  { %v1404_v53 = vmax.f32 %v1402_v51, 0.0 }
 0x269   :  { %v1414_v55 = vadd.f32 1e-05, %v1404_v53 }
 0x26b   :  { %3767 = vrsqrt.f32 %v1414_v55  ;;  %vm1431_vm0 = vweird.f32 %v1414_v55 }
 0x271   :  { %v3768_v45 = vpop.eup %3767 }
 0x272   :  { %v1426_v58 = vmul.f32 %v3768_v45, %v1414_v55  ;;  %vm1432_vm15 = vweird.f32 %v3768_v45 }
 0x273   :  { %vm1433_vm1 = vmor %vm1431_vm0, %vm1432_vm15 }
 0x274   :  { %v1427_v59 = vmul.f32 %v3768_v45, %v1426_v58 }
 0x276   :  { %v1428_v60 = vmul.f32 0.5, %v1427_v59 }
 0x278   :  { %v1429_v26 = vsub.f32 1.5, %v1428_v60 }
 0x27a   :  { %v1430_v23 = vmul.f32 %v3768_v45, %v1429_v26 }
 0x27c   :  { %v1434_v62 = vsel %vm1433_vm1, %v3768_v45, %v1430_v23 }
 0x27d   :  { %v1436_v31 = vmul.f32 %v1434_v62, %v1406_v41  ;;  %v1438_v3 = vmul.f32 %v1434_v62, %v1408_v8  ;;  %v1440_v7 = vmul.f32 %v1434_v62, %v1410_v44  ;;  %v1442_v11 = vmul.f32 %v1434_v62, %v1412_v9 }
 0x27f   :  { %v1446_v63 = vmul.f32 %v1444_v34, %v1436_v31  ;;  %v1448_v12 = vmul.f32 %v1444_v34, %v1438_v3  ;;  %v1450_v52 = vmul.f32 %v1444_v34, %v1440_v7  ;;  %v1452_v14 = vmul.f32 %v1444_v34, %v1442_v11 }
 0x281   :  { %v1456_v15 = vadd.f32 %v1454_v24, %v1446_v63  ;;  %v1458_v54 = vadd.f32 %v1454_v24, %v1448_v12  ;;  %v4616_v13 = vadd.f32 %v1454_v24, %v1450_v52  ;;  %v4618_v32 = vadd.f32 %v1454_v24, %v1452_v14 }
 0x283   :  { %v1464_v56 = vmax.f32 %v1456_v15, 0.0  ;;  %v1466_v1 = vmax.f32 %v1458_v54, 0.0  ;;  %v1468_v17 = vmax.f32 %v4616_v13, 0.0  ;;  %v1470_v0 = vmax.f32 %v4618_v32, 0.0 }
 0x284   :  { %3866 = dma.done.wait [#allocation5 + $0x1], 6144 }
 0x285   :  { %3867 = vsyncadd [#allocation5 + $0x1], 4294961152  ;;  %v3687_v46 = vld [vmem:[#allocation4 + $0x178] sm:$0xff]  ;;  %v3703_v18 = vld [vmem:[#allocation4 + $0x168] sm:$0xff]  ;;  %v4624_v30 = vrot.slane %v1463_v10, 7  ;;  %v1486_v50 = vrot.slane %v1465_v43, 7 }
 0x286   :  { %v3711_v21 = vld [vmem:[#allocation4 + $0x140] sm:$0xff]  ;;  %1977 = vmatpush.bf16.msra.mxu3 %v3687_v46  ;;  %2015 = vmatpush.bf16.msrb.mxu1 %v3703_v18  ;;  %v3702_v22 = vld [vmem:[#allocation4 + $0xb8] sm:$0xff]  ;;  %v3710_v33 = vld [vmem:[#allocation4 + $0xf0] sm:$0xff]  ;;  %vm1483_vm2 = vcmask 1040384   ;;  %v4636_v10 = vrot.slane %v1464_v56, 7  ;;  %v1488_v42 = vrot.slane %v1466_v1, 7 }
 0x287   :  { %v3686_v25 = vld [vmem:[#allocation4 + $0x40] sm:$0xff]  ;;  %v3695_v27 = vld [vmem:[#allocation4 + $0xd8] sm:$0xff]  ;;  %2034 = vmatpush.bf16.msrb.mxu2 %v3711_v21  ;;  %v3685_v39 = vld [vmem:[#allocation4 + $0x128] sm:$0xff]  ;;  %v4630_v45 = vsel %vm1483_vm2, %v4624_v30, %v1486_v50  ;;  %v4634_v16 = vsel %vm1483_vm2, 0.0, %v4624_v30  ;;  %v4639_v58 = vsel %vm1483_vm2, %v1486_v50, 0.0  ;;  %s3873_s2 = smov 32  }
 0x288   :  { %1996 = vmatpush.bf16.msrb.mxu0 %v3695_v27  ;;  %v3694_v36 = vld [vmem:[#allocation4 + $0x58] sm:$0xff]  ;;  %v3701_v40 = vld [vmem:[#allocation4 + $0xa8] sm:$0xff]  ;;  %v3709_v57 = vld [vmem:[#allocation4 + $0x170] sm:$0xff]  ;;  %v1524_v60 = vrot.slane %v4634_v16, 1  ;;  %v1525_v26 = vrot.slane %v4630_v45, 1  ;;  %v1530_v41 = vrot.slane %v4639_v58, 1  ;;  %v4646_v8 = vsel %vm1483_vm2, %v4636_v10, %v1488_v42 }
 0x289   :  { %v3693_v19 = vld [vmem:[#allocation4 + $0x100] sm:$0xff]  ;;  %v3692_v48 = vld [vmem:[#allocation4 + $0x148] sm:$0xff]  ;;  %v3691_v51 = vld [vmem:[#allocation4 + $0x118] sm:$0xff]  ;;  %v4650_v44 = vsel %vm1483_vm2, 0.0, %v4636_v10  ;;  %v4653_v9 = vsel %vm1483_vm2, %v1488_v42, 0.0  ;;  %v1528_v3 = vrot.slane %v4646_v8, 1  ;;  %v3488_v1 = vpack.c.bf16 %v4630_v45, %v4624_v30 }
 0x28a   :  { %1978 = vmatpush.bf16.msra.mxu3 %v3686_v25  ;;  %2016 = vmatpush.bf16.msrb.mxu1 %v3702_v22  ;;  %v3684_v20 = vld [vmem:[#allocation4 + $0x160] sm:$0xff]  ;;  %v3683_v49 = vld [vmem:[#allocation4 + $0x48] sm:$0xff]  ;;  %v3682_v53 = vld [vmem:[#allocation4 + $0x10] sm:$0xff]  ;;  %v1527_v31 = vrot.slane %v4650_v44, 1  ;;  %v1532_v7 = vrot.slane %v4653_v9, 1  ;;  %v1526_v12 = vsel %vm610_vm6, %v1524_v60, %v1525_v26  ;;  %v1531_v52 = vsel %vm610_vm6, %v1525_v26, %v1530_v41  ;;  %s3874_s21 = smov 96  }
 0x28b   :  { %2035 = vmatpush.bf16.msrb.mxu2 %v3710_v33  ;;  %v3700_v47 = vld [vmem:[#allocation4 + $0xe0] sm:$0xff]  ;;  %v3707_v6 = vld [vmem:[#allocation4 + $0x88] sm:$0xff]  ;;  %v3698_v55 = vld [vmem:[#allocation4 + $0x138] sm:$0xff]  ;;  %v1678_v46 = vpack.c.bf16 %v1531_v52, %v1526_v12  ;;  %v4677_v27 = vrot.slane %v1467_v4, 7  ;;  %v1492_v33 = vrot.slane %v1469_v28, 7  ;;  %v3496_v37 = vpack.c.bf16 %v4646_v8, %v4636_v10  ;;  %s3875_s22 = smov 64  }
 0x28c   :  { %1997 = vmatpush.bf16.msrb.mxu0 %v3694_v36  ;;  %v3708_v35 = vld [vmem:[#allocation4 + $0xa0] sm:$0xff]  ;;  %v3690_v59 = vld [vmem:[#allocation4 + $0x90] sm:$0xff]  ;;  %v3705_v62 = vld [vmem:[#allocation4 + $0xf8] sm:$0xff]  ;;  %v1529_v18 = vsel %vm610_vm6, %v1527_v31, %v1528_v3  ;;  %v1533_v21 = vsel %vm610_vm6, %v1528_v3, %v1532_v7  ;;  %v1552_v12 = vrot.slane %v4634_v16, 2  ;;  %v1558_v52 = vrot.slane %v4639_v58, 2  ;;  %s3877_s29 = smov [#allocation6]  }
 0x28d   :  { %v3699_v5 = vld [vmem:[#allocation4 + $0x120] sm:$0xff]  ;;  %v3681_v23 = vld [vmem:[#allocation4 + $0xd0] sm:$0xff]  ;;  %vm3486_vm3 = vmneg %vm1483_vm2  ;;  %v4693_v4 = vsel %vm1483_vm2, %v4677_v27, %v1492_v33  ;;  %v4697_v28 = vsel %vm1483_vm2, 0.0, %v4677_v27  ;;  %v1560_v16 = vrot.slane %v4653_v9, 2  ;;  %v1556_v58 = vrot.slane %v4646_v8, 2  ;;  %s2924_s5 = sshll.u32 %s3877_s29, 4  ;;  %s2925_s5 = int_to_ptr.vmem [resolvable:$true] %s2924_s5 }
 0x28e   :  { %1979 = vmatpush.bf16.msra.mxu3 %v3685_v39  ;;  %2017 = vmatpush.bf16.msrb.mxu1 %v3701_v40  ;;  %v3706_v43 = vld [vmem:[#allocation4 + $0x20] sm:$0xff]  ;;  %v3697_v34 = vld [vmem:[#allocation4 + $0x130] sm:$0xff]  ;;  %v4664_v14 = vld [vmem:[%s5111_s6 + $0x38] sm:$0xff]  ;;  %v1679_v40 = vpack.c.bf16 %v1533_v21, %v1529_v18  ;;  %v1534_v13 = vrot.slane %v4697_v28, 1  ;;  %v1535_v32 = vrot.slane %v4693_v4, 1  ;;  %v3492_v60 = vpack.c.bf16 %v4693_v4, %v4677_v27 }
 0x28f   :  { %2036 = vmatpush.bf16.msrb.mxu2 %v3709_v57  ;;  %v3689_v24 = vld [vmem:[#allocation4 + $0x110] sm:$0xff]  ;;  %v3696_v63 = vld [vmem:[#allocation4 + $0x80] sm:$0xff]  ;;  %v3719_v15 = vld [vmem:[#allocation4 + $0x8] sm:$0xff]  ;;  %v1491_v57 = vrot.slane %v1468_v17, 7  ;;  %v1561_v8 = vsel %vm625_vm7, %v1556_v58, %v1560_v16  ;;  %v1562_v27 = vrot.slane %v4697_v28, 2  ;;  %vm2757_vm12 = vcmask 1041409  }
 0x290   :  { %1998 = vmatpush.bf16.msrb.mxu0 %v3693_v19  ;;  %v3680_v11 = vld [vmem:[#allocation4 + $0xb0] sm:$0xff]  ;;  %v3704_v54 = vld [vmem:[#allocation4 + $0xe8] sm:$0xff]  ;;  %vm4671_vm4 = vmpackc.low %vm3870_vm10, %vm3486_vm3  ;;  %v1494_v19 = vrot.slane %v1470_v0, 7  ;;  %vm2917_vm13 = vcmask 17408  }
 0x291   :  { %v3688_v56 = vld [vmem:[#allocation4 + $0x108] sm:$0xff]  ;;  %v3727_v22 = vld [vmem:[#allocation4 + $0x150] sm:$0xff]  ;;  %v3718_v39 = vld [vmem:[#allocation4 + $0x98] sm:$0xff] }
 0x292   :  { %1980 = vmatpush.bf16.msra.mxu3 %v3684_v20  ;;  %2018 = vmatpush.bf16.msrb.mxu1 %v3700_v47  ;;  %v4685_v36 = vld [vmem:[%s5111_s6 + $0x30] sm:$0xff]  ;;  %v3726_v38 = vld [vmem:[#allocation4 + $0x158] sm:$0xff]  ;;  %v4708_v20 = vld [vmem:[%s5111_s6 + $0x28] sm:$0xff] }
 0x293   :  { %2037 = vmatpush.bf16.msrb.mxu2 %v3708_v35  ;;  %v3717_v47 = vld [vmem:[#allocation4 + $0x18] sm:$0xff]  ;;  %v4711_v35 = vsel %vm1483_vm2, %v1492_v33, 0.0  ;;  %v3725_v0 = vld [vmem:[#allocation4 + $0x30] sm:$0xff]  ;;  %v4732_v30 = vld [vmem:[%s5111_s6 + $0x20] sm:$0xff]  ;;  %v1563_v33 = vrot.slane %v4693_v4, 2 }
 0x294   :  { %1999 = vmatpush.bf16.msrb.mxu0 %v3692_v48  ;;  %v1540_v17 = vrot.slane %v4711_v35, 1  ;;  %v4719_v48 = vsel %vm1483_vm2, %v1491_v57, %v1494_v19  ;;  %v3716_v50 = vld [vmem:[#allocation4 + $0xc0] sm:$0xff]  ;;  %v3724_v42 = vld [vmem:[#allocation4 + $0x70] sm:$0xff]  ;;  %v3723_v41 = vld [vmem:[#allocation4 + $0x68] sm:$0xff] }
 0x295   :  { %v3500_v3 = vpack.c.bf16 %v4719_v48, %v1491_v57  ;;  %v3722_v7 = vld [vmem:[#allocation4 + $0x50] sm:$0xff]  ;;  %v3720_v21 = vld [vmem:[#allocation4] sm:$0xff]  ;;  %v1564_v28 = vsel %vm625_vm7, %v1562_v27, %v1563_v33 }
 0x296   :  { %1981 = vmatpush.bf16.msra.mxu3 %v3683_v49  ;;  %2019 = vmatpush.bf16.msrb.mxu1 %v3699_v5  ;;  %v4722_v49 = vsel %vm1483_vm2, 0.0, %v1491_v57  ;;  %v4725_v5 = vsel %vm1483_vm2, %v1494_v19, 0.0  ;;  %v1541_v10 = vsel %vm610_vm6, %v1535_v32, %v1540_v17 }
 0x297   :  { %2038 = vmatpush.bf16.msrb.mxu2 %v3707_v6  ;;  %v1537_v6 = vrot.slane %v4722_v49, 1 }
 0x298   :  { %2000 = vmatpush.bf16.msrb.mxu0 %v3691_v51  ;;  %v1538_v51 = vrot.slane %v4719_v48, 1 }
 0x29a   :  { %1982 = vmatpush.bf16.msra.mxu3 %v3682_v53  ;;  %2020 = vmatpush.bf16.msrb.mxu1 %v3698_v55  ;;  %v1542_v53 = vrot.slane %v4725_v5, 1  ;;  %v1536_v55 = vsel %vm610_vm6, %v1534_v13, %v1535_v32  ;;  %v1688_v32 = vperm.slane %v4369_v61, 6 }
 0x29b   :  { %2039 = vmatpush.bf16.msrb.mxu2 %v3706_v43  ;;  %v4744_v43 = vld [vmem:[%s5111_s6 + $0x18] sm:$0xff]  ;;  %v1684_v26 = vpack.c.bf16 %v1541_v10, %v1536_v55 }
 0x29c   :  { %2001 = vmatpush.bf16.msrb.mxu0 %v3690_v59  ;;  %v3715_v59 = vld [vmem:[#allocation4 + $0x38] sm:$0xff] }
 0x29e   :  { %1983 = vmatpush.bf16.msra.mxu3 %v3681_v23  ;;  %2021 = vmatpush.bf16.msrb.mxu1 %v3697_v34  ;;  %v1539_v23 = vsel %vm610_vm6, %v1537_v6, %v1538_v51  ;;  %v1543_v34 = vsel %vm610_vm6, %v1538_v51, %v1542_v53 }
 0x29f   :  { %2040 = vmatpush.bf16.msrb.mxu2 %v3705_v62  ;;  %v4755_v62 = vld [vmem:[%s5111_s6 + $0x10] sm:$0xff]  ;;  %v1685_v31 = vpack.c.bf16 %v1543_v34, %v1539_v23 }
 0x2a0   :  { %2002 = vmatpush.bf16.msrb.mxu0 %v3689_v24  ;;  %v3714_v24 = vld [vmem:[#allocation4 + $0x28] sm:$0xff] }
 0x2a2   :  { %1984 = vmatpush.bf16.msra.mxu3 %v3680_v11  ;;  %2022 = vmatpush.bf16.msrb.mxu1 %v3696_v63  ;;  %v4765_v11 = vld [vmem:[%s5111_s6 + $0x8] sm:$0xff] }
 0x2a3   :  { %2041 = vmatpush.bf16.msrb.mxu2 %v3704_v54  ;;  %v3713_v63 = vld [vmem:[#allocation4 + $0xc8] sm:$0xff]  ;;  %v3721_v54 = vld [vmem:[#allocation4 + $0x78] sm:$0xff] }
 0x2a4   :  { %2003 = vmatpush.bf16.msrb.mxu0 %v3688_v56  ;;  %v4777_v56 = vld [vmem:[%s5111_s6] sm:$0xff] }
 0x2a5   :  { %3489 = vmatmul.msk.bf16.vlgmr.msra.gmra.mxu3 %vm4671_vm4, %v3488_v1  ;;  %2023 = vmatmul.bf16.vlgmr.msrb.gmra.mxu1 %v1678_v46  ;;  %v3712_v1 = vld [vmem:[#allocation4 + $0x60] sm:$0xff]  ;;  %v1555_v46 = vrot.slane %v4650_v44, 2 }
 0x2a6   :  { %2246 = vmatpush.bf16.msra.mxu1 %v4664_v14  ;;  %2053 = vmatpush.bf16.msrb.mxu3 %v3719_v15  ;;  %v1553_v15 = vrot.slane %v4630_v45, 2 }
 0x2a7   :  { %2278 = vmatpush.bf16.msra.mxu2 %v4664_v14  ;;  %3497 = vmatmul.msk.bf16.vlgmr.msrb.gmra.mxu0 %vm4671_vm4, %v3496_v37  ;;  %v1557_v9 = vsel %vm625_vm7, %v1555_v46, %v1556_v58  ;;  %v1566_v37 = vrot.slane %v4719_v48, 2  ;;  %v2197_v46 = vld [vmem:[#allocation2] sm:$0x3]  ;;  %v3872_v58 = vmov 0.5  }
 0x2a8   :  { %2072 = vmatpush.bf16.msra.mxu0 %v3727_v22  ;;  %2042 = vmatmul.bf16.vlgmr.msrb.gmra.mxu2 %v1679_v40  ;;  %v1554_v45 = vsel %vm625_vm7, %v1552_v12, %v1553_v15  ;;  %v1559_v18 = vsel %vm625_vm7, %v1553_v15, %v1558_v52  ;;  %v1681_v25 = vpack.c.bf16 %v1561_v8, %v1557_v9  ;;  %v3871_v22 = vmov 0  }
 0x2a9   :  { %v1680_v44 = vpack.c.bf16 %v1559_v18, %v1554_v45  ;;  %v1565_v40 = vrot.slane %v4722_v49, 2 }
 0x2aa   :  { %2247 = vmatpush.bf16.msra.mxu1 %v4685_v36  ;;  %2054 = vmatpush.bf16.msrb.mxu3 %v3718_v39  ;;  %v1568_v39 = vrot.slane %v4711_v35, 2 }
 0x2ab   :  { %2279 = vmatpush.bf16.msra.mxu2 %v4685_v36  ;;  %v1567_v19 = vsel %vm625_vm7, %v1565_v40, %v1566_v37 }
 0x2ac   :  { %2073 = vmatpush.bf16.msra.mxu0 %v3726_v38  ;;  %v1570_v38 = vrot.slane %v4725_v5, 2  ;;  %v1569_v4 = vsel %vm625_vm7, %v1563_v33, %v1568_v39 }
 0x2ad   :  { %v1686_v57 = vpack.c.bf16 %v1569_v4, %v1564_v28 }
 0x2ae   :  { %2248 = vmatpush.bf16.msra.mxu1 %v4708_v20  ;;  %2055 = vmatpush.bf16.msrb.mxu3 %v3717_v47  ;;  %v1571_v47 = vsel %vm625_vm7, %v1566_v37, %v1570_v38 }
 0x2af   :  { %2280 = vmatpush.bf16.msra.mxu2 %v4708_v20  ;;  %v1687_v35 = vpack.c.bf16 %v1571_v47, %v1567_v19 }
 0x2b0   :  { %2074 = vmatpush.bf16.msra.mxu0 %v3725_v0 }
 0x2b2   :  { %2249 = vmatpush.bf16.msra.mxu1 %v4732_v30  ;;  %2056 = vmatpush.bf16.msrb.mxu3 %v3716_v50 }
 0x2b3   :  { %2281 = vmatpush.bf16.msra.mxu2 %v4732_v30 }
 0x2b4   :  { %2075 = vmatpush.bf16.msra.mxu0 %v3724_v42 }
 0x2b5   :  { %3493 = vmatmul.msk.bf16.gmra.mxu3 %vm4671_vm4, %v3492_v60  ;;  %2028 = vmatmul.bf16.gmra.mxu1 %v1684_v26 }
 0x2b6   :  { %2250 = vmatpush.bf16.msra.mxu1 %v4744_v43  ;;  %2057 = vmatpush.bf16.msrb.mxu3 %v3715_v59 }
 0x2b7   :  { %2282 = vmatpush.bf16.msra.mxu2 %v4744_v43  ;;  %3501 = vmatmul.msk.bf16.gmra.mxu0 %vm4671_vm4, %v3500_v3 }
 0x2b8   :  { %2076 = vmatpush.bf16.msra.mxu0 %v3723_v41  ;;  %2047 = vmatmul.bf16.gmra.mxu2 %v1685_v31 }
 0x2ba   :  { %2251 = vmatpush.bf16.msra.mxu1 %v4755_v62  ;;  %2058 = vmatpush.bf16.msrb.mxu3 %v3714_v24  ;;  %v2175_v24 = vand.u32 127, %v420_v2 }
 0x2bb   :  { %2283 = vmatpush.bf16.msra.mxu2 %v4755_v62 }
 0x2bc   :  { %2077 = vmatpush.bf16.msra.mxu0 %v3722_v7  ;;  %vm2176_vm5 = vcmp.ge.s32.totalorder %v2175_v24, 64  ;;  %vm2177_vm6 = vcmp.lt.s32.totalorder %v2175_v24, 96 }
 0x2bd   :  { %vm4857_vm7 = vmand %vm2176_vm5, %vm2177_vm6 }
 0x2be   :  { %2252 = vmatpush.bf16.msra.mxu1 %v4765_v11  ;;  %2059 = vmatpush.bf16.msrb.mxu3 %v3713_v63  ;;  %v4863_v2 = vsel %vm4857_vm7, 1.0, %v3872_v58  ;;  %v4870_v40 = vsel %vm4857_vm7, 0.0, %v3872_v58 }
 0x2bf   :  { %2284 = vmatpush.bf16.msra.mxu2 %v4765_v11 }
 0x2c0   :  { %2078 = vmatpush.bf16.msra.mxu0 %v3721_v54 }
 0x2c2   :  { %2253 = vmatpush.bf16.msra.mxu1 %v4777_v56  ;;  %2060 = vmatpush.bf16.msrb.mxu3 %v3712_v1 }
 0x2c3   :  { %2285 = vmatpush.bf16.msra.mxu2 %v4777_v56 }
 0x2c4   :  { %2079 = vmatpush.bf16.msra.mxu0 %v3720_v21 }
 0x2c5   :  { %2061 = vmatmul.bf16.vlgmr.msrb.gmra.mxu3 %v1680_v44  ;;  %2254 = vmatmul.bf16.vlgmr.msra.gmra.mxu1 %v3871_v22 }
 0x2c6   :  { %2310 = vmatpush.bf16.msra.mxu3 %v4664_v14  ;;  %2374 = vmatpush.bf16.msrb.mxu1 %v4664_v14 }
 0x2c7   :  { %2406 = vmatpush.bf16.msrb.mxu2 %v4664_v14  ;;  %2080 = vmatmul.bf16.vlgmr.msra.gmra.mxu0 %v1681_v25 }
 0x2c8   :  { %2342 = vmatpush.bf16.msrb.mxu0 %v4664_v14 }
 0x2ca   :  { %2311 = vmatpush.bf16.msra.mxu3 %v4685_v36  ;;  %2375 = vmatpush.bf16.msrb.mxu1 %v4685_v36 }
 0x2cb   :  { %2407 = vmatpush.bf16.msrb.mxu2 %v4685_v36 }
 0x2cc   :  { %2343 = vmatpush.bf16.msrb.mxu0 %v4685_v36 }
 0x2ce   :  { %2312 = vmatpush.bf16.msra.mxu3 %v4708_v20  ;;  %2376 = vmatpush.bf16.msrb.mxu1 %v4708_v20 }
 0x2cf   :  { %2408 = vmatpush.bf16.msrb.mxu2 %v4708_v20 }
 0x2d0   :  { %2344 = vmatpush.bf16.msrb.mxu0 %v4708_v20 }
 0x2d2   :  { %2313 = vmatpush.bf16.msra.mxu3 %v4732_v30  ;;  %2377 = vmatpush.bf16.msrb.mxu1 %v4732_v30 }
 0x2d3   :  { %2409 = vmatpush.bf16.msrb.mxu2 %v4732_v30 }
 0x2d4   :  { %2345 = vmatpush.bf16.msrb.mxu0 %v4732_v30 }
 0x2d5   :  { %2066 = vmatmul.bf16.gmra.mxu3 %v1686_v57 }
 0x2d6   :  { %2314 = vmatpush.bf16.msra.mxu3 %v4744_v43  ;;  %2378 = vmatpush.bf16.msrb.mxu1 %v4744_v43 }
 0x2d7   :  { %2410 = vmatpush.bf16.msrb.mxu2 %v4744_v43  ;;  %2085 = vmatmul.bf16.gmra.mxu0 %v1687_v35 }
 0x2d8   :  { %2346 = vmatpush.bf16.msrb.mxu0 %v4744_v43 }
 0x2da   :  { %2315 = vmatpush.bf16.msra.mxu3 %v4755_v62  ;;  %2379 = vmatpush.bf16.msrb.mxu1 %v4755_v62 }
 0x2db   :  { %2411 = vmatpush.bf16.msrb.mxu2 %v4755_v62 }
 0x2dc   :  { %2347 = vmatpush.bf16.msrb.mxu0 %v4755_v62 }
 0x2de   :  { %2316 = vmatpush.bf16.msra.mxu3 %v4765_v11  ;;  %2380 = vmatpush.bf16.msrb.mxu1 %v4765_v11 }
 0x2df   :  { %2412 = vmatpush.bf16.msrb.mxu2 %v4765_v11 }
 0x2e0   :  { %2348 = vmatpush.bf16.msrb.mxu0 %v4765_v11 }
 0x2e2   :  { %2317 = vmatpush.bf16.msra.mxu3 %v4777_v56  ;;  %2381 = vmatpush.bf16.msrb.mxu1 %v4777_v56 }
 0x2e3   :  { %2413 = vmatpush.bf16.msrb.mxu2 %v4777_v56 }
 0x2e4   :  { %2349 = vmatpush.bf16.msrb.mxu0 %v4777_v56 }
 0x2e6   :  { %2438 = vmatpush.bf16.msrb.mxu3 %v4664_v14  ;;  %2502 = vmatpush.bf16.msra.mxu1 %v4664_v14 }
 0x2e8   :  { %2470 = vmatpush.bf16.msra.mxu0 %v4664_v14 }
 0x2ea   :  { %2439 = vmatpush.bf16.msrb.mxu3 %v4685_v36  ;;  %2503 = vmatpush.bf16.msra.mxu1 %v4685_v36 }
 0x2ec   :  { %2471 = vmatpush.bf16.msra.mxu0 %v4685_v36 }
 0x2ee   :  { %2440 = vmatpush.bf16.msrb.mxu3 %v4708_v20  ;;  %2504 = vmatpush.bf16.msra.mxu1 %v4708_v20 }
 0x2f0   :  { %2472 = vmatpush.bf16.msra.mxu0 %v4708_v20 }
 0x2f2   :  { %2441 = vmatpush.bf16.msrb.mxu3 %v4732_v30  ;;  %2505 = vmatpush.bf16.msra.mxu1 %v4732_v30 }
 0x2f4   :  { %2473 = vmatpush.bf16.msra.mxu0 %v4732_v30 }
 0x2f6   :  { %2442 = vmatpush.bf16.msrb.mxu3 %v4744_v43  ;;  %2506 = vmatpush.bf16.msra.mxu1 %v4744_v43 }
 0x2f8   :  { %2474 = vmatpush.bf16.msra.mxu0 %v4744_v43 }
 0x2fa   :  { %2443 = vmatpush.bf16.msrb.mxu3 %v4755_v62  ;;  %2507 = vmatpush.bf16.msra.mxu1 %v4755_v62 }
 0x2fc   :  { %2475 = vmatpush.bf16.msra.mxu0 %v4755_v62 }
 0x2fe   :  { %2444 = vmatpush.bf16.msrb.mxu3 %v4765_v11  ;;  %2508 = vmatpush.bf16.msra.mxu1 %v4765_v11 }
 0x300   :  { %2476 = vmatpush.bf16.msra.mxu0 %v4765_v11 }
 0x302   :  { %2445 = vmatpush.bf16.msrb.mxu3 %v4777_v56  ;;  %2509 = vmatpush.bf16.msra.mxu1 %v4777_v56 }
 0x304   :  { %2477 = vmatpush.bf16.msra.mxu0 %v4777_v56 }
 0x322   :  { %v2024_v13 = vpop.f32.mrf.mxu1 }
 0x324   :  { %v2005_v17 = vpop.f32.mrf.mxu0 }
 0x328   :  { %v1986_v0 = vpop.f32.mrf.mxu3 }
 0x329   :  { %v1987_v48 = vadd.f32 %v1986_v0, %v1688_v32 }
 0x32a   :  { %v2026_v49 = vpop.f32.mrf.mxu1 }
 0x32b   :  { %v2006_v5 = vadd.f32 %v2005_v17, %v1987_v48  ;;  %v2043_v50 = vpop.f32.mrf.mxu2 }
 0x32c   :  { %v2007_v51 = vpop.f32.mrf.mxu0 }
 0x32d   :  { %v2025_v6 = vadd.f32 %v2024_v13, %v2006_v5 }
 0x32f   :  { %v2044_v53 = vadd.f32 %v2043_v50, %v2025_v6 }
 0x330   :  { %v1988_v55 = vpop.f32.mrf.mxu3 }
 0x331   :  { %v1989_v10 = vadd.f32 %v1988_v55, %v1688_v32 }
 0x332   :  { %v2029_v42 = vpop.f32.mrf.mxu1 }
 0x333   :  { %v2008_v59 = vadd.f32 %v2007_v51, %v1989_v10  ;;  %v2045_v60 = vpop.f32.mrf.mxu2 }
 0x334   :  { %v2010_v23 = vpop.f32.mrf.mxu0 }
 0x335   :  { %v2027_v26 = vadd.f32 %v2026_v49, %v2008_v59 }
 0x337   :  { %v2046_v34 = vadd.f32 %v2045_v60, %v2027_v26 }
 0x338   :  { %v1991_v41 = vpop.f32.mrf.mxu3 }
 0x339   :  { %v1992_v31 = vadd.f32 %v1991_v41, %v1688_v32 }
 0x33a   :  { %v2031_v3 = vpop.f32.mrf.mxu1 }
 0x33b   :  { %v2011_v7 = vadd.f32 %v2010_v23, %v1992_v31  ;;  %v2048_v63 = vpop.f32.mrf.mxu2 }
 0x33c   :  { %v2012_v52 = vpop.f32.mrf.mxu0 }
 0x33d   :  { %v2030_v12 = vadd.f32 %v2029_v42, %v2011_v7 }
 0x33f   :  { %v2049_v15 = vadd.f32 %v2048_v63, %v2030_v12 }
 0x340   :  { %v1993_v1 = vpop.f32.mrf.mxu3 }
 0x341   :  { %v1994_v16 = vadd.f32 %v1993_v1, %v1688_v32 }
 0x342   :  { %v2255_v45 = vpop.f32.mrf.mxu1 }
 0x343   :  { %v2013_v18 = vadd.f32 %v2012_v52, %v1994_v16  ;;  %v2259_v21 = vadd.f32 %v2255_v45, %v2197_v46  ;;  %v2050_v5 = vpop.f32.mrf.mxu2 }
 0x344   :  { %v2081_v8 = vpop.f32.mrf.mxu0 }
 0x345   :  { %v2260_v44 = vmul.f32 %v2259_v21, %v4863_v2  ;;  %v2032_v9 = vadd.f32 %v2031_v3, %v2013_v18 }
 0x347   :  { %3769 = vtanh.f32 %v2260_v44  ;;  %v2051_v51 = vadd.f32 %v2050_v5, %v2032_v9 }
 0x348   :  { %v2062_v25 = vpop.f32.mrf.mxu3 }
 0x349   :  { %v2063_v22 = vadd.f32 %v2062_v25, %v2044_v53 }
 0x34a   :  { %v2257_v27 = vpop.f32.mrf.mxu1 }
 0x34b   :  { %v4866_v33 = vadd.f32 %v2081_v8, %v2063_v22 }
 0x34c   :  { %v2083_v37 = vpop.f32.mrf.mxu0 }
 0x34d   :  { %v3770_v39 = vpop.eup %3769  ;;  %v2101_v47 = vmul.f32 %v4866_v33, %v4866_v33 }
 0x34e   :  { %v2262_v38 = vmul.f32 %v3770_v39, %v4863_v2 }
 0x350   :  { %v2064_v28 = vpop.f32.mrf.mxu3  ;;  %v4874_v4 = vadd.f32 %v2262_v38, %v4870_v40  ;;  %v3876_v38 = vmov 16.0  }
 0x351   :  { %v2065_v57 = vadd.f32 %v2064_v28, %v2046_v34 }
 0x352   :  { %2268 = vrot.lane.b32.xlu1 %v4874_v4, %s3873_s2  ;;  %2264 = vrot.lane.b32.xlu0 %v4874_v4, %s3874_s21 }
 0x353   :  { %v4880_v19 = vadd.f32 %v2083_v37, %v2065_v57 }
 0x354   :  { %v2086_v32 = vpop.f32.mrf.mxu0 }
 0x355   :  { %v2091_v35 = vadd.f32 %v4880_v19, %v4866_v33  ;;  %v2102_v13 = vmul.f32 %v4880_v19, %v4880_v19 }
 0x357   :  { %v2105_v17 = vadd.f32 %v2102_v13, %v2101_v47  ;;  %v2142_v47 = vperm.slane %v4340_v29, 0 }
 0x358   :  { %v2067_v0 = vpop.f32.mrf.mxu3 }
 0x359   :  { %v2068_v48 = vadd.f32 %v2067_v0, %v2049_v15 }
 0x35a   :  { %2266 = vrot.lane.b32.xlu0 %v4874_v4, %s3875_s22 }
 0x35b   :  { %v2087_v49 = vadd.f32 %v2086_v32, %v2068_v48 }
 0x35c   :  { %v2088_v10 = vpop.f32.mrf.mxu0 }
 0x35d   :  { %v2092_v50 = vadd.f32 %v2091_v35, %v2087_v49  ;;  %v2103_v6 = vmul.f32 %v2087_v49, %v2087_v49 }
 0x35f   :  { %v2106_v53 = vadd.f32 %v2105_v17, %v2103_v6 }
 0x360   :  { %v2069_v55 = vpop.f32.mrf.mxu3 }
 0x361   :  { %v2070_v42 = vadd.f32 %v2069_v55, %v2051_v51 }
 0x363   :  { %v2089_v59 = vadd.f32 %v2088_v10, %v2070_v42 }
 0x365   :  { %v2093_v60 = vadd.f32 %v2092_v50, %v2089_v59  ;;  %v2104_v26 = vmul.f32 %v2089_v59, %v2089_v59 }
 0x367   :  { %v2094_v23 = vrot.slane %v2093_v60, 4  ;;  %v2107_v34 = vadd.f32 %v2106_v53, %v2104_v26 }
 0x369   :  { %v2095_v41 = vadd.f32 %v2094_v23, %v2093_v60  ;;  %v2108_v24 = vrot.slane %v2107_v34, 4 }
 0x36b   :  { %v2096_v31 = vrot.slane %v2095_v41, 2  ;;  %v2109_v3 = vadd.f32 %v2108_v24, %v2107_v34 }
 0x36d   :  { %v2097_v7 = vadd.f32 %v2096_v31, %v2095_v41  ;;  %v2110_v63 = vrot.slane %v2109_v3, 2 }
 0x36f   :  { %v2098_v12 = vrot.slane %v2097_v7, 1  ;;  %v2111_v52 = vadd.f32 %v2110_v63, %v2109_v3 }
 0x371   :  { %v2099_v15 = vadd.f32 %v2098_v12, %v2097_v7  ;;  %v2112_v54 = vrot.slane %v2111_v52, 1 }
 0x373   :  { %v2100_v1 = vmul.f32 0.03125, %v2099_v15  ;;  %v2113_v46 = vadd.f32 %v2112_v54, %v2111_v52 }
 0x375   :  { %v2114_v16 = vmul.f32 0.03125, %v2113_v46  ;;  %v2115_v58 = vmul.f32 %v2100_v1, %v2100_v1  ;;  %v2118_v45 = vsub.f32 %v4866_v33, %v2100_v1  ;;  %v2119_v18 = vsub.f32 %v4880_v19, %v2100_v1 }
 0x376   :  { %v2120_v21 = vsub.f32 %v2087_v49, %v2100_v1  ;;  %v2121_v44 = vsub.f32 %v2089_v59, %v2100_v1  ;;  %v2137_v33 = vperm.slane %v4369_v61, 7 }
 0x377   :  { %v2116_v9 = vsub.f32 %v2114_v16, %v2115_v58 }
 0x379   :  { %v2117_v8 = vmax.f32 %v2116_v9, 0.0 }
 0x37b   :  { %v2122_v25 = vadd.f32 1e-05, %v2117_v8 }
 0x37d   :  { %3771 = vrsqrt.f32 %v2122_v25  ;;  %vm2129_vm9 = vweird.f32 %v2122_v25 }
 0x37e   :  { %3773 = vrcp.f32 %v3876_v38 }
 0x383   :  { %v3772_v22 = vpop.eup %3771 }
 0x384   :  { %v2124_v27 = vmul.f32 %v3772_v22, %v2122_v25  ;;  %vm2130_vm8 = vweird.f32 %v3772_v22  ;;  %v3774_v35 = vpop.eup %3773 }
 0x385   :  { %vm2131_vm10 = vmor %vm2129_vm9, %vm2130_vm8  ;;  %v2166_v6 = vmul.f32 16.0, %v3774_v35  ;;  %vm2170_vm11 = vweird.f32 %v3774_v35 }
 0x386   :  { %v2125_v39 = vmul.f32 %v3772_v22, %v2124_v27 }
 0x387   :  { %v2167_v26 = vsub.f32 1.0, %v2166_v6 }
 0x388   :  { %v2126_v37 = vmul.f32 0.5, %v2125_v39 }
 0x389   :  { %v2168_v31 = vmul.f32 %v3774_v35, %v2167_v26 }
 0x38a   :  { %v2127_v28 = vsub.f32 1.5, %v2126_v37 }
 0x38b   :  { %v2169_v52 = vadd.f32 %v3774_v35, %v2168_v31 }
 0x38c   :  { %v2128_v57 = vmul.f32 %v3772_v22, %v2127_v28 }
 0x38d   :  { %v2171_v16 = vsel %vm2170_vm11, %v3774_v35, %v2169_v52 }
 0x38e   :  { %v2132_v19 = vsel %vm2131_vm10, %v3772_v22, %v2128_v57 }
 0x38f   :  { %v2133_v13 = vmul.f32 %v2132_v19, %v2118_v45  ;;  %v2134_v32 = vmul.f32 %v2132_v19, %v2119_v18  ;;  %v2135_v17 = vmul.f32 %v2132_v19, %v2120_v21  ;;  %v2136_v0 = vmul.f32 %v2132_v19, %v2121_v44 }
 0x391   :  { %v2138_v48 = vmul.f32 %v2137_v33, %v2133_v13  ;;  %v2139_v49 = vmul.f32 %v2137_v33, %v2134_v32  ;;  %v2140_v5 = vmul.f32 %v2137_v33, %v2135_v17  ;;  %v2141_v50 = vmul.f32 %v2137_v33, %v2136_v0 }
 0x393   :  { %v2143_v51 = vadd.f32 %v2142_v47, %v2138_v48  ;;  %v2144_v53 = vadd.f32 %v2142_v47, %v2139_v49  ;;  %v2145_v55 = vadd.f32 %v2142_v47, %v2140_v5  ;;  %v2146_v10 = vadd.f32 %v2142_v47, %v2141_v50 }
 0x395   :  { %v2147_v42 = vmax.f32 %v2143_v51, 0.0  ;;  %v2148_v59 = vmax.f32 %v2144_v53, 0.0  ;;  %v2149_v61 = vmax.f32 %v2145_v55, 0.0  ;;  %v2150_v60 = vmax.f32 %v2146_v10, 0.0  ;;  %v2308_v55 = vld [vmem:[#allocation2 + $0x4] sm:$0x3] }
 0x397   :  { %v2158_v23 = vadd.f32 %v2150_v60, %v2149_v61  ;;  %v2151_v34 = vadd.f32 %v2148_v59, %v2147_v42 }
 0x399   :  { %v2159_v41 = vrot.slane %v2158_v23, 4  ;;  %v2152_v24 = vrot.slane %v2151_v34, 4 }
 0x39b   :  { %v2160_v3 = vadd.f32 %v2159_v41, %v2158_v23  ;;  %v2153_v7 = vadd.f32 %v2152_v24, %v2151_v34 }
 0x39d   :  { %v2161_v63 = vrot.slane %v2160_v3, 2  ;;  %v2154_v12 = vrot.slane %v2153_v7, 2 }
 0x39f   :  { %v2155_v15 = vadd.f32 %v2154_v12, %v2153_v7  ;;  %v2162_v54 = vadd.f32 %v2161_v63, %v2160_v3 }
 0x3a1   :  { %v2156_v1 = vrot.slane %v2155_v15, 1  ;;  %v2163_v46 = vrot.slane %v2162_v54, 1 }
 0x3a3   :  { %v2157_v58 = vadd.f32 %v2156_v1, %v2155_v15  ;;  %v2164_v45 = vadd.f32 %v2163_v46, %v2162_v54  ;;  %v2340_v15 = vld [vmem:[#allocation2 + $0x6] sm:$0x3] }
 0x3a5   :  { %v2172_v18 = vmul.f32 %v2171_v16, %v2157_v58  ;;  %v2173_v21 = vmul.f32 %v2171_v16, %v2164_v45 }
 0x3a7   :  { %v4894_v44 = vsel %vm2757_vm12, %v2173_v21, %v2172_v18 }
 0x3c4   :  { %v2265_v9 = vpop.permute.xlu0 %2264  ;;  %v2269_v37 = vpop.permute.xlu1 %2268 }
 0x3c5   :  { %v2270_v25 = vmul.f32 0.0, %v2265_v9 }
 0x3cc   :  { %v2267_v8 = vpop.permute.xlu0 %2266 }
 0x3cd   :  { %v2271_v22 = vmul.f32 %v2267_v8, %v4874_v4  ;;  %v2276_v4 = vld [vmem:[#allocation2 + $0x2] sm:$0x3] }
 0x3cf   :  { %v2272_v27 = vadd.f32 %v2271_v22, %v2270_v25 }
 0x3d1   :  { %3775 = vtanh.f32 %v2272_v27 }
 0x3d7   :  { %v3776_v39 = vpop.eup %3775 }
 0x3d8   :  { %v2274_v38 = vmul.f32 %v3776_v39, %v2269_v37 }
 0x3da   :  { %v2277_v28 = vpack.c.bf16 %v2274_v38, %v2274_v38 }
 0x3dc   :  { %2286 = vmatmul.bf16.vlgmr.msra.gmra.mxu2 %v2277_v28  ;;  %v2372_v28 = vld [vmem:[#allocation2 + $0x8] sm:$0x3] }
 0x3dd   :  { %2534 = vmatpush.bf16.msra.mxu2 %v4664_v14 }
 0x3e1   :  { %2535 = vmatpush.bf16.msra.mxu2 %v4685_v36 }
 0x3e5   :  { %2536 = vmatpush.bf16.msra.mxu2 %v4708_v20 }
 0x3e9   :  { %2537 = vmatpush.bf16.msra.mxu2 %v4732_v30 }
 0x3ed   :  { %2538 = vmatpush.bf16.msra.mxu2 %v4744_v43 }
 0x3f1   :  { %2539 = vmatpush.bf16.msra.mxu2 %v4755_v62 }
 0x3f5   :  { %2540 = vmatpush.bf16.msra.mxu2 %v4765_v11 }
 0x3f9   :  { %2541 = vmatpush.bf16.msra.mxu2 %v4777_v56 }
 0x45f   :  { %v2287_v57 = vpop.f32.mrf.mxu2 }
 0x460   :  { %v2291_v33 = vadd.f32 %v2287_v57, %v2276_v4 }
 0x462   :  { %v2292_v19 = vmul.f32 %v2291_v33, %v4863_v2 }
 0x464   :  { %3777 = vtanh.f32 %v2292_v19 }
 0x467   :  { %v2289_v47 = vpop.f32.mrf.mxu2 }
 0x46a   :  { %v3778_v35 = vpop.eup %3777 }
 0x46b   :  { %v2294_v13 = vmul.f32 %v3778_v35, %v4863_v2 }
 0x46d   :  { %v2295_v32 = vadd.f32 %v2294_v13, %v4870_v40 }
 0x46f   :  { %2298 = vrot.lane.b32.xlu2 %v2295_v32, %s3875_s22  ;;  %2296 = vrot.lane.b32.xlu1 %v2295_v32, %s3874_s21 }
 0x477   :  { %2300 = vrot.lane.b32.xlu2 %v2295_v32, %s3873_s2 }
 0x4c9   :  { %v2299_v17 = vpop.permute.xlu2 %2298 }
 0x4ca   :  { %v2303_v48 = vmul.f32 %v2299_v17, %v2295_v32 }
 0x4d1   :  { %v2301_v6 = vpop.permute.xlu2 %2300 }
 0x4e1   :  { %v2297_v0 = vpop.permute.xlu1 %2296 }
 0x4e2   :  { %v2302_v49 = vmul.f32 %v2297_v0, %v2272_v27 }
 0x4e4   :  { %v2304_v5 = vadd.f32 %v2303_v48, %v2302_v49 }
 0x4e6   :  { %3779 = vtanh.f32 %v2304_v5 }
 0x4ec   :  { %v3780_v50 = vpop.eup %3779 }
 0x4ed   :  { %v2306_v51 = vmul.f32 %v3780_v50, %v2301_v6 }
 0x4ef   :  { %v2309_v53 = vpack.c.bf16 %v2306_v51, %v2306_v51 }
 0x4f1   :  { %2318 = vmatmul.bf16.vlgmr.msra.gmra.mxu3 %v2309_v53  ;;  %v2404_v53 = vld [vmem:[#allocation2 + $0xa] sm:$0x3] }
 0x4f2   :  { %2566 = vmatpush.bf16.msra.mxu3 %v4664_v14 }
 0x4f6   :  { %2567 = vmatpush.bf16.msra.mxu3 %v4685_v36 }
 0x4fa   :  { %2568 = vmatpush.bf16.msra.mxu3 %v4708_v20 }
 0x4fe   :  { %2569 = vmatpush.bf16.msra.mxu3 %v4732_v30 }
 0x502   :  { %2570 = vmatpush.bf16.msra.mxu3 %v4744_v43 }
 0x506   :  { %2571 = vmatpush.bf16.msra.mxu3 %v4755_v62 }
 0x50a   :  { %2572 = vmatpush.bf16.msra.mxu3 %v4765_v11 }
 0x50e   :  { %2573 = vmatpush.bf16.msra.mxu3 %v4777_v56 }
 0x574   :  { %v2319_v10 = vpop.f32.mrf.mxu3 }
 0x575   :  { %v2323_v42 = vadd.f32 %v2319_v10, %v2308_v55 }
 0x577   :  { %v2324_v59 = vmul.f32 %v2323_v42, %v4863_v2 }
 0x579   :  { %3781 = vtanh.f32 %v2324_v59 }
 0x57c   :  { %v2321_v61 = vpop.f32.mrf.mxu3 }
 0x57f   :  { %v3782_v60 = vpop.eup %3781 }
 0x580   :  { %v2326_v26 = vmul.f32 %v3782_v60, %v4863_v2 }
 0x582   :  { %v2327_v23 = vadd.f32 %v2326_v26, %v4870_v40 }
 0x584   :  { %2332 = vrot.lane.b32.xlu2 %v2327_v23, %s3873_s2  ;;  %2330 = vrot.lane.b32.xlu1 %v2327_v23, %s3875_s22 }
 0x585   :  { %2328 = vrot.lane.b32.xlu0 %v2327_v23, %s3874_s21 }
 0x5de   :  { %v2333_v63 = vpop.permute.xlu2 %2332 }
 0x5f6   :  { %v2331_v34 = vpop.permute.xlu1 %2330 }
 0x5f7   :  { %v2335_v41 = vmul.f32 %v2331_v34, %v2327_v23  ;;  %v2329_v24 = vpop.permute.xlu0 %2328 }
 0x5f8   :  { %v2334_v31 = vmul.f32 %v2329_v24, %v2304_v5 }
 0x5fa   :  { %v2336_v3 = vadd.f32 %v2335_v41, %v2334_v31 }
 0x5fc   :  { %3783 = vtanh.f32 %v2336_v3 }
 0x602   :  { %v3784_v7 = vpop.eup %3783 }
 0x603   :  { %v2338_v12 = vmul.f32 %v3784_v7, %v2333_v63 }
 0x605   :  { %v2341_v52 = vpack.c.bf16 %v2338_v12, %v2338_v12  ;;  %v3837_v12 = vld [vmem:[%s5111_s6 + $0x38] sm:$0xff] }
 0x607   :  { %2350 = vmatmul.bf16.vlgmr.msrb.gmra.mxu0 %v2341_v52  ;;  %v2436_v52 = vld [vmem:[#allocation2 + $0xc] sm:$0x3] }
 0x608   :  { %2598 = vmatpush.bf16.msrb.mxu0 %v4664_v14 }
 0x60c   :  { %2599 = vmatpush.bf16.msrb.mxu0 %v4685_v36 }
 0x610   :  { %2600 = vmatpush.bf16.msrb.mxu0 %v4708_v20 }
 0x614   :  { %2601 = vmatpush.bf16.msrb.mxu0 %v4732_v30 }
 0x618   :  { %2602 = vmatpush.bf16.msrb.mxu0 %v4744_v43 }
 0x61c   :  { %2603 = vmatpush.bf16.msrb.mxu0 %v4755_v62 }
 0x620   :  { %2604 = vmatpush.bf16.msrb.mxu0 %v4765_v11 }
 0x624   :  { %2605 = vmatpush.bf16.msrb.mxu0 %v4777_v56 }
 0x684   :  { %v2351_v54 = vpop.f32.mrf.mxu0 }
 0x685   :  { %v2355_v1 = vadd.f32 %v2351_v54, %v2340_v15 }
 0x687   :  { %v2356_v46 = vmul.f32 %v2355_v1, %v4863_v2 }
 0x689   :  { %3785 = vtanh.f32 %v2356_v46 }
 0x68c   :  { %v2353_v16 = vpop.f32.mrf.mxu0 }
 0x68f   :  { %v3786_v58 = vpop.eup %3785 }
 0x690   :  { %v2358_v45 = vmul.f32 %v3786_v58, %v4863_v2 }
 0x692   :  { %v2359_v18 = vadd.f32 %v2358_v45, %v4870_v40 }
 0x694   :  { %2364 = vrot.lane.b32.xlu2 %v2359_v18, %s3873_s2  ;;  %2362 = vrot.lane.b32.xlu1 %v2359_v18, %s3875_s22 }
 0x695   :  { %2360 = vrot.lane.b32.xlu0 %v2359_v18, %s3874_s21 }
 0x6ee   :  { %v2365_v39 = vpop.permute.xlu2 %2364 }
 0x706   :  { %v2363_v21 = vpop.permute.xlu1 %2362 }
 0x707   :  { %v2367_v9 = vmul.f32 %v2363_v21, %v2359_v18  ;;  %v2361_v8 = vpop.permute.xlu0 %2360 }
 0x708   :  { %v2366_v25 = vmul.f32 %v2361_v8, %v2336_v3 }
 0x70a   :  { %v2368_v22 = vadd.f32 %v2367_v9, %v2366_v25 }
 0x70c   :  { %3787 = vtanh.f32 %v2368_v22 }
 0x712   :  { %v3788_v27 = vpop.eup %3787 }
 0x713   :  { %v2370_v37 = vmul.f32 %v3788_v27, %v2365_v39  ;;  %v3838_v39 = vld [vmem:[%s5111_s6 + $0x30] sm:$0xff] }
 0x715   :  { %v2373_v38 = vpack.c.bf16 %v2370_v37, %v2370_v37  ;;  %v3839_v37 = vld [vmem:[%s5111_s6 + $0x28] sm:$0xff] }
 0x717   :  { %2382 = vmatmul.bf16.vlgmr.msrb.gmra.mxu1 %v2373_v38  ;;  %v2468_v38 = vld [vmem:[#allocation2 + $0xe] sm:$0x3] }
 0x718   :  { %2630 = vmatpush.bf16.msrb.mxu1 %v4664_v14 }
 0x71c   :  { %2631 = vmatpush.bf16.msrb.mxu1 %v4685_v36 }
 0x720   :  { %2632 = vmatpush.bf16.msrb.mxu1 %v4708_v20 }
 0x724   :  { %2633 = vmatpush.bf16.msrb.mxu1 %v4732_v30 }
 0x728   :  { %2634 = vmatpush.bf16.msrb.mxu1 %v4744_v43 }
 0x72c   :  { %2635 = vmatpush.bf16.msrb.mxu1 %v4755_v62 }
 0x730   :  { %2636 = vmatpush.bf16.msrb.mxu1 %v4765_v11 }
 0x734   :  { %2637 = vmatpush.bf16.msrb.mxu1 %v4777_v56 }
 0x794   :  { %v2383_v4 = vpop.f32.mrf.mxu1 }
 0x795   :  { %v2387_v57 = vadd.f32 %v2383_v4, %v2372_v28 }
 0x797   :  { %v2388_v33 = vmul.f32 %v2387_v57, %v4863_v2 }
 0x799   :  { %3789 = vtanh.f32 %v2388_v33 }
 0x79c   :  { %v2385_v19 = vpop.f32.mrf.mxu1 }
 0x79f   :  { %v3790_v47 = vpop.eup %3789 }
 0x7a0   :  { %v2390_v35 = vmul.f32 %v3790_v47, %v4863_v2 }
 0x7a2   :  { %v2391_v13 = vadd.f32 %v2390_v35, %v4870_v40 }
 0x7a4   :  { %2396 = vrot.lane.b32.xlu2 %v2391_v13, %s3873_s2  ;;  %2394 = vrot.lane.b32.xlu1 %v2391_v13, %s3875_s22 }
 0x7a5   :  { %2392 = vrot.lane.b32.xlu0 %v2391_v13, %s3874_s21 }
 0x7fe   :  { %v2397_v50 = vpop.permute.xlu2 %2396 }
 0x816   :  { %v2395_v32 = vpop.permute.xlu1 %2394 }
 0x817   :  { %v2399_v17 = vmul.f32 %v2395_v32, %v2391_v13  ;;  %v2393_v0 = vpop.permute.xlu0 %2392 }
 0x818   :  { %v2398_v48 = vmul.f32 %v2393_v0, %v2368_v22 }
 0x81a   :  { %v2400_v49 = vadd.f32 %v2399_v17, %v2398_v48  ;;  %v2500_v48 = vld [vmem:[#allocation2 + $0x10] sm:$0x3] }
 0x81c   :  { %3791 = vtanh.f32 %v2400_v49 }
 0x822   :  { %v3792_v5 = vpop.eup %3791 }
 0x823   :  { %v2402_v6 = vmul.f32 %v3792_v5, %v2397_v50 }
 0x825   :  { %v2405_v51 = vpack.c.bf16 %v2402_v6, %v2402_v6 }
 0x827   :  { %2414 = vmatmul.bf16.vlgmr.msrb.gmra.mxu2 %v2405_v51 }
 0x828   :  { %2662 = vmatpush.bf16.msrb.mxu2 %v4664_v14 }
 0x82c   :  { %2663 = vmatpush.bf16.msrb.mxu2 %v4685_v36 }
 0x830   :  { %2664 = vmatpush.bf16.msrb.mxu2 %v4708_v20 }
 0x834   :  { %2665 = vmatpush.bf16.msrb.mxu2 %v4732_v30 }
 0x838   :  { %2666 = vmatpush.bf16.msrb.mxu2 %v4744_v43 }
 0x83c   :  { %2667 = vmatpush.bf16.msrb.mxu2 %v4755_v62 }
 0x840   :  { %2668 = vmatpush.bf16.msrb.mxu2 %v4765_v11 }
 0x844   :  { %2669 = vmatpush.bf16.msrb.mxu2 %v4777_v56 }
 0x8aa   :  { %v2415_v55 = vpop.f32.mrf.mxu2 }
 0x8ab   :  { %v2419_v10 = vadd.f32 %v2415_v55, %v2404_v53 }
 0x8ad   :  { %v2420_v42 = vmul.f32 %v2419_v10, %v4863_v2 }
 0x8af   :  { %3793 = vtanh.f32 %v2420_v42 }
 0x8b2   :  { %v2417_v14 = vpop.f32.mrf.mxu2 }
 0x8b5   :  { %v3794_v59 = vpop.eup %3793 }
 0x8b6   :  { %v2422_v61 = vmul.f32 %v3794_v59, %v4863_v2 }
 0x8b8   :  { %v2423_v60 = vadd.f32 %v2422_v61, %v4870_v40 }
 0x8ba   :  { %2428 = vrot.lane.b32.xlu2 %v2423_v60, %s3873_s2  ;;  %2426 = vrot.lane.b32.xlu1 %v2423_v60, %s3875_s22 }
 0x8bb   :  { %2424 = vrot.lane.b32.xlu0 %v2423_v60, %s3874_s21 }
 0x914   :  { %v2429_v3 = vpop.permute.xlu2 %2428 }
 0x92c   :  { %v2427_v26 = vpop.permute.xlu1 %2426 }
 0x92d   :  { %v2431_v23 = vmul.f32 %v2427_v26, %v2423_v60  ;;  %v2425_v34 = vpop.permute.xlu0 %2424 }
 0x92e   :  { %v2430_v41 = vmul.f32 %v2425_v34, %v2400_v49 }
 0x930   :  { %v2432_v24 = vadd.f32 %v2431_v23, %v2430_v41  ;;  %v2532_v41 = vld [vmem:[#allocation2 + $0x12] sm:$0x3] }
 0x932   :  { %3795 = vtanh.f32 %v2432_v24 }
 0x938   :  { %v3796_v31 = vpop.eup %3795 }
 0x939   :  { %v2434_v7 = vmul.f32 %v3796_v31, %v2429_v3 }
 0x93b   :  { %v2437_v63 = vpack.c.bf16 %v2434_v7, %v2434_v7 }
 0x93d   :  { %2446 = vmatmul.bf16.vlgmr.msrb.gmra.mxu3 %v2437_v63 }
 0x93e   :  { %2694 = vmatpush.bf16.msrb.mxu3 %v3837_v12 }
 0x942   :  { %2695 = vmatpush.bf16.msrb.mxu3 %v4685_v36 }
 0x946   :  { %2696 = vmatpush.bf16.msrb.mxu3 %v4708_v20 }
 0x94a   :  { %2697 = vmatpush.bf16.msrb.mxu3 %v4732_v30 }
 0x94e   :  { %2698 = vmatpush.bf16.msrb.mxu3 %v4744_v43 }
 0x952   :  { %2699 = vmatpush.bf16.msrb.mxu3 %v4755_v62 }
 0x956   :  { %2700 = vmatpush.bf16.msrb.mxu3 %v4765_v11 }
 0x95a   :  { %2701 = vmatpush.bf16.msrb.mxu3 %v4777_v56 }
 0x9c0   :  { %v2447_v15 = vpop.f32.mrf.mxu3 }
 0x9c1   :  { %v2451_v54 = vadd.f32 %v2447_v15, %v2436_v52 }
 0x9c3   :  { %v2452_v1 = vmul.f32 %v2451_v54, %v4863_v2 }
 0x9c5   :  { %3797 = vtanh.f32 %v2452_v1 }
 0x9c8   :  { %v2449_v46 = vpop.f32.mrf.mxu3 }
 0x9cb   :  { %v3798_v36 = vpop.eup %3797 }
 0x9cc   :  { %v2454_v20 = vmul.f32 %v3798_v36, %v4863_v2 }
 0x9ce   :  { %v2455_v16 = vadd.f32 %v2454_v20, %v4870_v40 }
 0x9d0   :  { %2460 = vrot.lane.b32.xlu2 %v2455_v16, %s3873_s2  ;;  %2458 = vrot.lane.b32.xlu1 %v2455_v16, %s3875_s22 }
 0x9d1   :  { %2456 = vrot.lane.b32.xlu0 %v2455_v16, %s3874_s21 }
 0xa2a   :  { %v2461_v25 = vpop.permute.xlu2 %2460 }
 0xa42   :  { %v2459_v58 = vpop.permute.xlu1 %2458 }
 0xa43   :  { %v2463_v45 = vmul.f32 %v2459_v58, %v2455_v16  ;;  %v2457_v18 = vpop.permute.xlu0 %2456 }
 0xa44   :  { %v2462_v21 = vmul.f32 %v2457_v18, %v2432_v24  ;;  %v2564_v18 = vld [vmem:[#allocation2 + $0x14] sm:$0x3] }
 0xa46   :  { %v2464_v9 = vadd.f32 %v2463_v45, %v2462_v21 }
 0xa48   :  { %3799 = vtanh.f32 %v2464_v9 }
 0xa4e   :  { %v3800_v8 = vpop.eup %3799 }
 0xa4f   :  { %v2466_v22 = vmul.f32 %v3800_v8, %v2461_v25 }
 0xa51   :  { %v2469_v27 = vpack.c.bf16 %v2466_v22, %v2466_v22 }
 0xa53   :  { %2478 = vmatmul.bf16.vlgmr.msra.gmra.mxu0 %v2469_v27 }
 0xa54   :  { %2726 = vmatpush.bf16.msra.mxu0 %v3837_v12 }
 0xa58   :  { %2727 = vmatpush.bf16.msra.mxu0 %v3838_v39 }
 0xa5c   :  { %2728 = vmatpush.bf16.msra.mxu0 %v3839_v37 }
 0xa60   :  { %2729 = vmatpush.bf16.msra.mxu0 %v4732_v30 }
 0xa64   :  { %2730 = vmatpush.bf16.msra.mxu0 %v4744_v43 }
 0xa68   :  { %2731 = vmatpush.bf16.msra.mxu0 %v4755_v62 }
 0xa6c   :  { %2732 = vmatpush.bf16.msra.mxu0 %v4765_v11 }
 0xa70   :  { %2733 = vmatpush.bf16.msra.mxu0 %v4777_v56 }
 0xad0   :  { %v2479_v28 = vpop.f32.mrf.mxu0 }
 0xad1   :  { %v2483_v4 = vadd.f32 %v2479_v28, %v2468_v38 }
 0xad3   :  { %v2484_v57 = vmul.f32 %v2483_v4, %v4863_v2 }
 0xad5   :  { %3801 = vtanh.f32 %v2484_v57 }
 0xad8   :  { %v2481_v33 = vpop.f32.mrf.mxu0 }
 0xadb   :  { %v3802_v19 = vpop.eup %3801 }
 0xadc   :  { %v2486_v47 = vmul.f32 %v3802_v19, %v4863_v2 }
 0xade   :  { %v2487_v30 = vadd.f32 %v2486_v47, %v4870_v40 }
 0xae0   :  { %2492 = vrot.lane.b32.xlu2 %v2487_v30, %s3873_s2  ;;  %2490 = vrot.lane.b32.xlu1 %v2487_v30, %s3875_s22 }
 0xae1   :  { %2488 = vrot.lane.b32.xlu0 %v2487_v30, %s3874_s21 }
 0xb3a   :  { %v2493_v32 = vpop.permute.xlu2 %2492 }
 0xb52   :  { %v2491_v43 = vpop.permute.xlu1 %2490 }
 0xb53   :  { %v2495_v62 = vmul.f32 %v2491_v43, %v2487_v30  ;;  %v2489_v11 = vpop.permute.xlu0 %2488  ;;  %v2596_v43 = vld [vmem:[#allocation2 + $0x16] sm:$0x3] }
 0xb54   :  { %v2494_v56 = vmul.f32 %v2489_v11, %v2464_v9 }
 0xb56   :  { %v2496_v35 = vadd.f32 %v2495_v62, %v2494_v56 }
 0xb58   :  { %3803 = vtanh.f32 %v2496_v35 }
 0xb5e   :  { %v3804_v13 = vpop.eup %3803 }
 0xb5f   :  { %v2498_v17 = vmul.f32 %v3804_v13, %v2493_v32 }
 0xb61   :  { %v2501_v0 = vpack.c.bf16 %v2498_v17, %v2498_v17 }
 0xb63   :  { %2510 = vmatmul.bf16.vlgmr.msra.gmra.mxu1 %v2501_v0  ;;  %v3743_v0 = vld [vmem:[%s5112_s7 + $0x38] sm:$0xff] }
 0xb64   :  { %2891 = vmatpush.bf16.msra.mxu1 %v3743_v0 }
 0xbe0   :  { %v2511_v49 = vpop.f32.mrf.mxu1 }
 0xbe1   :  { %v2515_v5 = vadd.f32 %v2511_v49, %v2500_v48  ;;  %v3742_v48 = vld [vmem:[%s5112_s7 + $0x30] sm:$0xff]  ;;  %v3741_v49 = vld [vmem:[%s5112_s7 + $0x28] sm:$0xff] }
 0xbe2   :  { %2892 = vmatpush.bf16.msra.mxu1 %v3742_v48 }
 0xbe3   :  { %v2516_v50 = vmul.f32 %v2515_v5, %v4863_v2  ;;  %v3740_v5 = vld [vmem:[%s5112_s7 + $0x20] sm:$0xff] }
 0xbe5   :  { %3805 = vtanh.f32 %v2516_v50  ;;  %v3739_v50 = vld [vmem:[%s5112_s7 + $0x18] sm:$0xff] }
 0xbe6   :  { %2893 = vmatpush.bf16.msra.mxu1 %v3741_v49 }
 0xbe8   :  { %v2513_v6 = vpop.f32.mrf.mxu1 }
 0xbe9   :  { %v3738_v6 = vld [vmem:[%s5112_s7 + $0x10] sm:$0xff] }
 0xbea   :  { %2894 = vmatpush.bf16.msra.mxu1 %v3740_v5 }
 0xbeb   :  { %v3806_v51 = vpop.eup %3805 }
 0xbec   :  { %v2518_v53 = vmul.f32 %v3806_v51, %v4863_v2  ;;  %v3737_v51 = vld [vmem:[%s5112_s7 + $0x8] sm:$0xff] }
 0xbee   :  { %v2519_v55 = vadd.f32 %v2518_v53, %v4870_v40  ;;  %2895 = vmatpush.bf16.msra.mxu1 %v3739_v50  ;;  %v3736_v53 = vld [vmem:[%s5112_s7] sm:$0xff] }
 0xbf0   :  { %2524 = vrot.lane.b32.xlu2 %v2519_v55, %s3873_s2  ;;  %2522 = vrot.lane.b32.xlu1 %v2519_v55, %s3875_s22 }
 0xbf1   :  { %2520 = vrot.lane.b32.xlu0 %v2519_v55, %s3874_s21 }
 0xbf2   :  { %2896 = vmatpush.bf16.msra.mxu1 %v3738_v6 }
 0xbf6   :  { %2897 = vmatpush.bf16.msra.mxu1 %v3737_v51 }
 0xbfa   :  { %2898 = vmatpush.bf16.msra.mxu1 %v3736_v53 }
 0xc4a   :  { %v2525_v26 = vpop.permute.xlu2 %2524 }
 0xc62   :  { %v2523_v10 = vpop.permute.xlu1 %2522 }
 0xc63   :  { %v2527_v42 = vmul.f32 %v2523_v10, %v2519_v55  ;;  %v2521_v14 = vpop.permute.xlu0 %2520 }
 0xc64   :  { %v2526_v59 = vmul.f32 %v2521_v14, %v2496_v35 }
 0xc66   :  { %v2528_v61 = vadd.f32 %v2527_v42, %v2526_v59 }
 0xc68   :  { %3807 = vtanh.f32 %v2528_v61 }
 0xc6e   :  { %v3808_v60 = vpop.eup %3807 }
 0xc6f   :  { %v2530_v23 = vmul.f32 %v3808_v60, %v2525_v26 }
 0xc71   :  { %v2533_v34 = vpack.c.bf16 %v2530_v23, %v2530_v23 }
 0xc73   :  { %2542 = vmatmul.bf16.vlgmr.msra.gmra.mxu2 %v2533_v34  ;;  %v2760_v34 = vpack.c.bf16 %v4894_v44, %v4894_v44 }
 0xcf6   :  { %v2543_v24 = vpop.f32.mrf.mxu2 }
 0xcf7   :  { %v2547_v31 = vadd.f32 %v2543_v24, %v2532_v41  ;;  %v2628_v41 = vld [vmem:[#allocation2 + $0x18] sm:$0x3] }
 0xcf9   :  { %v2548_v3 = vmul.f32 %v2547_v31, %v4863_v2 }
 0xcfb   :  { %3809 = vtanh.f32 %v2548_v3 }
 0xcfe   :  { %v2545_v7 = vpop.f32.mrf.mxu2 }
 0xd01   :  { %v3810_v63 = vpop.eup %3809 }
 0xd02   :  { %v2550_v12 = vmul.f32 %v3810_v63, %v4863_v2 }
 0xd04   :  { %v2551_v52 = vadd.f32 %v2550_v12, %v4870_v40 }
 0xd06   :  { %2556 = vrot.lane.b32.xlu2 %v2551_v52, %s3873_s2  ;;  %2554 = vrot.lane.b32.xlu1 %v2551_v52, %s3875_s22 }
 0xd07   :  { %2552 = vrot.lane.b32.xlu0 %v2551_v52, %s3874_s21 }
 0xd60   :  { %v2557_v16 = vpop.permute.xlu2 %2556 }
 0xd78   :  { %v2555_v15 = vpop.permute.xlu1 %2554 }
 0xd79   :  { %v2559_v54 = vmul.f32 %v2555_v15, %v2551_v52  ;;  %v2553_v1 = vpop.permute.xlu0 %2552 }
 0xd7a   :  { %v2558_v46 = vmul.f32 %v2553_v1, %v2528_v61 }
 0xd7c   :  { %v2560_v36 = vadd.f32 %v2559_v54, %v2558_v46 }
 0xd7e   :  { %3811 = vtanh.f32 %v2560_v36 }
 0xd84   :  { %v3812_v20 = vpop.eup %3811 }
 0xd85   :  { %v2562_v58 = vmul.f32 %v3812_v20, %v2557_v16 }
 0xd87   :  { %v2565_v45 = vpack.c.bf16 %v2562_v58, %v2562_v58 }
 0xd89   :  { %2574 = vmatmul.bf16.vlgmr.msra.gmra.mxu3 %v2565_v45 }
 0xe0c   :  { %v2575_v21 = vpop.f32.mrf.mxu3 }
 0xe0d   :  { %v2579_v9 = vadd.f32 %v2575_v21, %v2564_v18  ;;  %v2660_v21 = vld [vmem:[#allocation2 + $0x1a] sm:$0x3] }
 0xe0f   :  { %v2580_v8 = vmul.f32 %v2579_v9, %v4863_v2 }
 0xe11   :  { %3813 = vtanh.f32 %v2580_v8 }
 0xe14   :  { %v2577_v25 = vpop.f32.mrf.mxu3 }
 0xe17   :  { %v3814_v22 = vpop.eup %3813 }
 0xe18   :  { %v2582_v27 = vmul.f32 %v3814_v22, %v4863_v2 }
 0xe1a   :  { %v2583_v39 = vadd.f32 %v2582_v27, %v4870_v40 }
 0xe1c   :  { %2588 = vrot.lane.b32.xlu2 %v2583_v39, %s3873_s2  ;;  %2586 = vrot.lane.b32.xlu1 %v2583_v39, %s3875_s22 }
 0xe1d   :  { %2584 = vrot.lane.b32.xlu0 %v2583_v39, %s3874_s21 }
 0xe76   :  { %v2589_v19 = vpop.permute.xlu2 %2588 }
 0xe8e   :  { %v2587_v37 = vpop.permute.xlu1 %2586 }
 0xe8f   :  { %v2591_v38 = vmul.f32 %v2587_v37, %v2583_v39  ;;  %v2585_v28 = vpop.permute.xlu0 %2584 }
 0xe90   :  { %v2590_v4 = vmul.f32 %v2585_v28, %v2560_v36 }
 0xe92   :  { %v2592_v57 = vadd.f32 %v2591_v38, %v2590_v4 }
 0xe94   :  { %3815 = vtanh.f32 %v2592_v57 }
 0xe9a   :  { %v3816_v33 = vpop.eup %3815 }
 0xe9b   :  { %v2594_v47 = vmul.f32 %v3816_v33, %v2589_v19 }
 0xe9d   :  { %v2597_v30 = vpack.c.bf16 %v2594_v47, %v2594_v47 }
 0xe9f   :  { %2606 = vmatmul.bf16.vlgmr.msrb.gmra.mxu0 %v2597_v30 }
 0xf1c   :  { %v2607_v62 = vpop.f32.mrf.mxu0 }
 0xf1d   :  { %v2611_v11 = vadd.f32 %v2607_v62, %v2596_v43  ;;  %v2692_v62 = vld [vmem:[#allocation2 + $0x1c] sm:$0x3] }
 0xf1f   :  { %v2612_v56 = vmul.f32 %v2611_v11, %v4863_v2 }
 0xf21   :  { %3817 = vtanh.f32 %v2612_v56 }
 0xf24   :  { %v2609_v35 = vpop.f32.mrf.mxu0 }
 0xf27   :  { %v3818_v13 = vpop.eup %3817 }
 0xf28   :  { %v2614_v32 = vmul.f32 %v3818_v13, %v4863_v2 }
 0xf2a   :  { %v2615_v17 = vadd.f32 %v2614_v32, %v4870_v40 }
 0xf2c   :  { %2620 = vrot.lane.b32.xlu2 %v2615_v17, %s3873_s2  ;;  %2618 = vrot.lane.b32.xlu1 %v2615_v17, %s3875_s22 }
 0xf2d   :  { %2616 = vrot.lane.b32.xlu0 %v2615_v17, %s3874_s21 }
 0xf86   :  { %v2621_v60 = vpop.permute.xlu2 %2620 }
 0xf9e   :  { %v2619_v55 = vpop.permute.xlu1 %2618 }
 0xf9f   :  { %v2623_v10 = vmul.f32 %v2619_v55, %v2615_v17  ;;  %v2617_v42 = vpop.permute.xlu0 %2616 }
 0xfa0   :  { %v2622_v14 = vmul.f32 %v2617_v42, %v2592_v57  ;;  %v2724_v42 = vld [vmem:[#allocation2 + $0x1e] sm:$0x3] }
 0xfa2   :  { %v2624_v59 = vadd.f32 %v2623_v10, %v2622_v14 }
 0xfa4   :  { %3819 = vtanh.f32 %v2624_v59 }
 0xfaa   :  { %v3820_v61 = vpop.eup %3819 }
 0xfab   :  { %v2626_v26 = vmul.f32 %v3820_v61, %v2621_v60 }
 0xfad   :  { %v2629_v23 = vpack.c.bf16 %v2626_v26, %v2626_v26 }
 0xfaf   :  { %2638 = vmatmul.bf16.vlgmr.msrb.gmra.mxu1 %v2629_v23 }
 0xfbf   :  { %2899 = vmatmul.bf16.vlgmr.msra.gmra.mxu1 %v2760_v34 }
0x102c   :  { %v2639_v24 = vpop.f32.mrf.mxu1 }
0x102d   :  { %v2643_v31 = vadd.f32 %v2639_v24, %v2628_v41  ;;  %v3751_v41 = vld [vmem:[%s5112_s7 + $0x78] sm:$0xff]  ;;  %v3750_v24 = vld [vmem:[%s5112_s7 + $0x70] sm:$0xff] }
0x102e   :  { %2904 = vmatpush.bf16.msra.mxu2 %v3751_v41 }
0x102f   :  { %v2644_v3 = vmul.f32 %v2643_v31, %v4863_v2  ;;  %v3747_v31 = vld [vmem:[%s5112_s7 + $0x58] sm:$0xff] }
0x1031   :  { %3821 = vtanh.f32 %v2644_v3  ;;  %v3746_v3 = vld [vmem:[%s5112_s7 + $0x50] sm:$0xff] }
0x1032   :  { %2905 = vmatpush.bf16.msra.mxu2 %v3750_v24 }
0x1034   :  { %v2641_v7 = vpop.f32.mrf.mxu1 }
0x1035   :  { %v3745_v7 = vld [vmem:[%s5112_s7 + $0x48] sm:$0xff] }
0x1037   :  { %v3822_v63 = vpop.eup %3821 }
0x1038   :  { %v2646_v12 = vmul.f32 %v3822_v63, %v4863_v2  ;;  %v3744_v63 = vld [vmem:[%s5112_s7 + $0x40] sm:$0xff] }
0x103a   :  { %v2647_v52 = vadd.f32 %v2646_v12, %v4870_v40 }
0x103c   :  { %2652 = vrot.lane.b32.xlu2 %v2647_v52, %s3873_s2  ;;  %2650 = vrot.lane.b32.xlu1 %v2647_v52, %s3875_s22  ;;  %v5055_v15 = vpop.f32.mrf.mxu1 }
0x103d   :  { %2648 = vrot.lane.b32.xlu0 %v2647_v52, %s3874_s21 }
0x1044   :  { %v2902_v44 = vpop.f32.mrf.mxu1 }
0x1096   :  { %v2653_v58 = vpop.permute.xlu2 %2652 }
0x10ae   :  { %v2651_v54 = vpop.permute.xlu1 %2650 }
0x10af   :  { %v2655_v1 = vmul.f32 %v2651_v54, %v2647_v52  ;;  %v2649_v46 = vpop.permute.xlu0 %2648 }
0x10b0   :  { %v2654_v36 = vmul.f32 %v2649_v46, %v2624_v59 }
0x10b2   :  { %v2656_v20 = vadd.f32 %v2655_v1, %v2654_v36 }
0x10b4   :  { %3823 = vtanh.f32 %v2656_v20 }
0x10ba   :  { %v3824_v16 = vpop.eup %3823 }
0x10bb   :  { %v2658_v45 = vmul.f32 %v3824_v16, %v2653_v58  ;;  %v2794_v58 = vperm.slane %v4340_v29, 3 }
0x10bd   :  { %v2661_v18 = vpack.c.bf16 %v2658_v45, %v2658_v45  ;;  %v2901_v45 = vadd.f32 %v5055_v15, %v2794_v58 }
0x10bf   :  { %2670 = vmatmul.bf16.vlgmr.msrb.gmra.mxu2 %v2661_v18 }
0x1142   :  { %v2671_v9 = vpop.f32.mrf.mxu2 }
0x1143   :  { %v2675_v8 = vadd.f32 %v2671_v9, %v2660_v21 }
0x1145   :  { %v2676_v25 = vmul.f32 %v2675_v8, %v4863_v2 }
0x1147   :  { %3825 = vtanh.f32 %v2676_v25 }
0x114a   :  { %v2673_v22 = vpop.f32.mrf.mxu2 }
0x114d   :  { %v3826_v27 = vpop.eup %3825 }
0x114e   :  { %v2678_v39 = vmul.f32 %v3826_v27, %v4863_v2 }
0x1150   :  { %v2679_v37 = vadd.f32 %v2678_v39, %v4870_v40 }
0x1152   :  { %2684 = vrot.lane.b32.xlu2 %v2679_v37, %s3873_s2  ;;  %2682 = vrot.lane.b32.xlu1 %v2679_v37, %s3875_s22 }
0x1153   :  { %2680 = vrot.lane.b32.xlu0 %v2679_v37, %s3874_s21 }
0x11ac   :  { %v2685_v47 = vpop.permute.xlu2 %2684 }
0x11c4   :  { %v2683_v38 = vpop.permute.xlu1 %2682 }
0x11c5   :  { %v2687_v28 = vmul.f32 %v2683_v38, %v2679_v37  ;;  %v2681_v4 = vpop.permute.xlu0 %2680 }
0x11c6   :  { %v2686_v57 = vmul.f32 %v2681_v4, %v2656_v20 }
0x11c8   :  { %v2688_v33 = vadd.f32 %v2687_v28, %v2686_v57 }
0x11ca   :  { %3827 = vtanh.f32 %v2688_v33 }
0x11d0   :  { %v3828_v19 = vpop.eup %3827 }
0x11d1   :  { %v2690_v30 = vmul.f32 %v3828_v19, %v2685_v47 }
0x11d3   :  { %v2693_v43 = vpack.c.bf16 %v2690_v30, %v2690_v30 }
0x11d5   :  { %2702 = vmatmul.bf16.vlgmr.msrb.gmra.mxu3 %v2693_v43 }
0x1258   :  { %v2703_v11 = vpop.f32.mrf.mxu3 }
0x1259   :  { %v2707_v56 = vadd.f32 %v2703_v11, %v2692_v62 }
0x125b   :  { %v2708_v35 = vmul.f32 %v2707_v56, %v4863_v2 }
0x125d   :  { %3829 = vtanh.f32 %v2708_v35 }
0x1260   :  { %v2705_v13 = vpop.f32.mrf.mxu3 }
0x1263   :  { %v3830_v32 = vpop.eup %3829 }
0x1264   :  { %v2710_v17 = vmul.f32 %v3830_v32, %v4863_v2 }
0x1266   :  { %v2711_v0 = vadd.f32 %v2710_v17, %v4870_v40 }
0x1268   :  { %2716 = vrot.lane.b32.xlu2 %v2711_v0, %s3873_s2  ;;  %2714 = vrot.lane.b32.xlu1 %v2711_v0, %s3875_s22 }
0x1269   :  { %2712 = vrot.lane.b32.xlu0 %v2711_v0, %s3874_s21 }
0x12c2   :  { %v2717_v53 = vpop.permute.xlu2 %2716 }
0x12da   :  { %v2715_v48 = vpop.permute.xlu1 %2714 }
0x12db   :  { %v2719_v49 = vmul.f32 %v2715_v48, %v2711_v0  ;;  %v2713_v5 = vpop.permute.xlu0 %2712 }
0x12dc   :  { %v2718_v50 = vmul.f32 %v2713_v5, %v2688_v33 }
0x12de   :  { %v2720_v6 = vadd.f32 %v2719_v49, %v2718_v50 }
0x12e0   :  { %3831 = vtanh.f32 %v2720_v6 }
0x12e6   :  { %v3832_v51 = vpop.eup %3831 }
0x12e7   :  { %v2722_v55 = vmul.f32 %v3832_v51, %v2717_v53 }
0x12e9   :  { %v2725_v10 = vpack.c.bf16 %v2722_v55, %v2722_v55 }
0x12eb   :  { %2734 = vmatmul.bf16.vlgmr.msra.gmra.mxu0 %v2725_v10 }
0x1368   :  { %v2735_v14 = vpop.f32.mrf.mxu0 }
0x1369   :  { %v2739_v59 = vadd.f32 %v2735_v14, %v2724_v42 }
0x136b   :  { %v2740_v61 = vmul.f32 %v2739_v59, %v4863_v2 }
0x136d   :  { %3833 = vtanh.f32 %v2740_v61 }
0x1370   :  { %v2737_v60 = vpop.f32.mrf.mxu0 }
0x1373   :  { %v3834_v26 = vpop.eup %3833 }
0x1374   :  { %v2742_v23 = vmul.f32 %v3834_v26, %v4863_v2  ;;  %v3749_v2 = vld [vmem:[%s5112_s7 + $0x68] sm:$0xff] }
0x1375   :  { %2906 = vmatpush.bf16.msra.mxu2 %v3749_v2 }
0x1376   :  { %v2743_v34 = vadd.f32 %v2742_v23, %v4870_v40  ;;  %v3748_v40 = vld [vmem:[%s5112_s7 + $0x60] sm:$0xff]  ;;  %s2926_s7 = sshll.u32 %s5113_s8, 4  ;;  %s2927_s7 = int_to_ptr.hbm [resolvable:$true] %s2926_s7 }
0x1378   :  { %2748 = vrot.lane.b32.xlu2 %v2743_v34, %s3873_s2  ;;  %2746 = vrot.lane.b32.xlu1 %v2743_v34, %s3875_s22 }
0x1379   :  { %2744 = vrot.lane.b32.xlu0 %v2743_v34, %s3874_s21  ;;  %2907 = vmatpush.bf16.msra.mxu2 %v3748_v40 }
0x137d   :  { %2908 = vmatpush.bf16.msra.mxu2 %v3747_v31 }
0x1381   :  { %2909 = vmatpush.bf16.msra.mxu2 %v3746_v3 }
0x1385   :  { %2910 = vmatpush.bf16.msra.mxu2 %v3745_v7 }
0x1389   :  { %2911 = vmatpush.bf16.msra.mxu2 %v3744_v63 }
0x13d2   :  { %v2749_v36 = vpop.permute.xlu2 %2748 }
0x13ea   :  { %v2747_v12 = vpop.permute.xlu1 %2746 }
0x13eb   :  { %v2751_v52 = vmul.f32 %v2747_v12, %v2743_v34  ;;  %v2745_v44 = vpop.permute.xlu0 %2744 }
0x13ec   :  { %v2750_v54 = vmul.f32 %v2745_v44, %v2720_v6 }
0x13ee   :  { %v2752_v1 = vadd.f32 %v2751_v52, %v2750_v54 }
0x13f0   :  { %3835 = vtanh.f32 %v2752_v1 }
0x13f6   :  { %v3836_v46 = vpop.eup %3835 }
0x13f7   :  { %v2754_v20 = vmul.f32 %v3836_v46, %v2749_v36 }
0x13f9   :  { %v2761_v16 = vpack.c.bf16 %v2754_v20, %v2754_v20 }
0x13fb   :  { %2912 = vmatmul.bf16.vlgmr.msra.gmra.mxu2 %v2761_v16 }
0x147e   :  { %v2913_v18 = vpop.f32.mrf.mxu2 }
0x147f   :  { %v2914_v21 = vadd.f32 %v2913_v18, %v2901_v45 }
0x1481   :  { %2918 = vst.msk [vmem:[#allocation6] sm:$0x3] %vm2917_vm13, %v2914_v21 }
0x1482   :  { %2929 = dma.vmem_to_hbm [thread:$0]  %s2925_s5, 32, %s2927_s7, [#allocation7]  }
0x1486   :  { %v2915_v9 = vpop.f32.mrf.mxu2 }
0x1487   :  { %3868 = dma.done.wait [#allocation7], 32  }
0x1488   :  { %3869 = vsyncadd [#allocation7], 4294967264 }
0x1489   :  { %2934 = vsyncpa [#allocation7], 1 }
0x148a   :  { %2935 = vsyncmov [#allocation5] }
0x148d   :  { %s2936_s10 = vpop.sfrf %2935 }
0x148e   :  { %p3598_p0 = scmp.ne.s32.totalorder %s2936_s10, 0 }
0x1490   :  { %2940 = shalt.err (%p3598_p0)  }
0x1491   :  { %2942 = vsyncmov [#allocation5 + $0x1] }
0x1494   :  { %s2943_s11 = vpop.sfrf %2942 }
0x1495   :  { %p3599_p1 = scmp.ne.s32.totalorder %s2943_s11, 0 }
0x1497   :  { %2947 = shalt.err (%p3599_p1)  }

</bundles_post_ra>
